<compile_context>
chip_gen: v6e
topology: v6e:2x2x1
jax: 0.10.0
libtpu: 0.0.40
codegen_flags: <defaults>
</compile_context>

<pallas_src>
import functools

import jax
import jax.numpy as jnp
from jax import lax
from jax.experimental import pallas as pl
from jax.experimental.pallas import tpu as pltpu

_LANE = 128
_SUBLANE = 8


def _round_up(x, m):
    return ((x + m - 1) // m) * m


def _make_encoder_kernel(T, B, B_pad, E, Hp):
    """Build the kernel closure over static dimensions."""
    n_real = T * B
    H3 = 3 * Hp

    def kernel(tok_ref,        # SMEM (T*B,)   int32  token ids, time-major
               dst_ref,        # SMEM (T*B,)   int32  dst row = t*B_pad + b
               emb_hbm,        # ANY/HBM (V, E) f32   embedding table
               wi_ref,         # VMEM (E, 6*Hp) f32   [fwd r,z,n | bwd r,z,n]
               wh_ref,         # VMEM (Hp, 6*Hp) f32  [fwd 3Hp | bwd 3Hp]
               bfold_ref,      # VMEM (1, 6*Hp) f32   bi (+ bh folded for r,z)
               bhn_ref,        # VMEM (1, 2*Hp) f32   [bh_n fwd | bh_n bwd]
               out_ref,        # VMEM (B_pad, 2*Hp) f32
               emb_rows,       # VMEM scratch (T*B_pad, E)
               gi_scr,         # VMEM scratch (T, B_pad, 6*Hp)
               dma_sems):      # DMA sems (T*B,)
        # ---- 1) Gather only the real embedding rows from HBM ---------------
        if B_pad != B:
            # Padded batch rows are never DMA'd into: make them deterministic.
            emb_rows[...] = jnp.zeros_like(emb_rows)

        @pl.loop(0, n_real)
        def _(i):
            pltpu.make_async_copy(emb_hbm.at[tok_ref[i]],
                                  emb_rows.at[dst_ref[i]],
                                  dma_sems.at[i]).start()

        @pl.loop(0, n_real)
        def _(i):
            pltpu.make_async_copy(emb_hbm.at[0],
                                  emb_rows.at[dst_ref[i]],
                                  dma_sems.at[i]).wait()

        # ---- 2) Hoisted input projection (both directions, one matmul) -----
        gi_all = jnp.dot(emb_rows[...], wi_ref[...],
                         preferred_element_type=jnp.float32) + bfold_ref[...]
        gi_scr[...] = gi_all.reshape(T, B_pad, 6 * Hp)

        # ---- 3) Fused fwd/bwd recurrence (hidden matmuls only in the loop) -
        wh_f = wh_ref[:, :H3]
        wh_b = wh_ref[:, H3:]
        bh_f_n = bhn_ref[:, :Hp]
        bh_b_n = bhn_ref[:, Hp:]

        def gru_cell(gi, h, wh, bh_n):
            # PyTorch gate order [r, z, n]; bi (+ bh for r,z) already in gi.
            gh = jnp.dot(h, wh, preferred_element_type=jnp.float32)  # (B_pad, 3Hp)
            r = jax.nn.sigmoid(gi[:, :Hp] + gh[:, :Hp])
            z = jax.nn.sigmoid(gi[:, Hp:2 * Hp] + gh[:, Hp:2 * Hp])
            n = jnp.tanh(gi[:, 2 * Hp:] + r * (gh[:, 2 * Hp:] + bh_n))
            return (1.0 - z) * n + z * h

        def body(t, carry):
            h_f, h_b = carry
            gi_f = gi_scr[t]                 # (B_pad, 6*Hp)
            gi_b = gi_scr[T - 1 - t]
            h_f = gru_cell(gi_f[:, :H3], h_f, wh_f, bh_f_n)
            h_b = gru_cell(gi_b[:, H3:], h_b, wh_b, bh_b_n)
            return (h_f, h_b)

        h0 = jnp.zeros((B_pad, Hp), jnp.float32)
        h_f, h_b = lax.fori_loop(0, T, body, (h0, h0), unroll=True)

        # ---- 4) Lane-dense output write (full 128-lane stores) -------------
        out_ref[:, :Hp] = h_f
        out_ref[:, Hp:] = h_b

    return kernel


def encoder_forward(token_seq, params):
    """token_seq: (B, T) int32. Returns (B, 2*hidden_dim) float32."""
    emb_table = params["embedding"]                   # (V, E)
    wi_f, wh_f, bi_f, bh_f = params["fwd"]
    wi_b, wh_b, bi_b, bh_b = params["bwd"]

    B, T = token_seq.shape
    V, E = emb_table.shape
    H = wh_f.shape[0]
    Hp = _round_up(H, _LANE)                          # lane-align each gate
    B_pad = _round_up(B, _SUBLANE)                    # sublane-align batch

    def pad_gates(x):
        # (rows, 3H) -> (rows, 3*Hp); each gate zero-padded to Hp lanes.
        if H == Hp:
            return x
        pads = [(0, 0), (0, Hp - H)]
        return jnp.concatenate(
            [jnp.pad(x[:, g * H:(g + 1) * H], pads) for g in range(3)], axis=1)

    wi_cat = jnp.concatenate([pad_gates(wi_f), pad_gates(wi_b)], axis=1)     # (E, 6Hp)
    wh_f_p = jnp.pad(pad_gates(wh_f), [(0, Hp - H), (0, 0)])                 # (Hp, 3Hp)
    wh_b_p = jnp.pad(pad_gates(wh_b), [(0, Hp - H), (0, 0)])
    wh_cat = jnp.concatenate([wh_f_p, wh_b_p], axis=1)                       # (Hp, 6Hp)
    bi_f_p, bh_f_p = pad_gates(bi_f), pad_gates(bh_f)
    bi_b_p, bh_b_p = pad_gates(bi_b), pad_gates(bh_b)

    zeros_h = jnp.zeros((1, Hp), jnp.float32)
    # Fold bh into the hoisted projection for the r and z gates only.
    bfold = jnp.concatenate(
        [bi_f_p + jnp.concatenate([bh_f_p[:, :2 * Hp], zeros_h], axis=1),
         bi_b_p + jnp.concatenate([bh_b_p[:, :2 * Hp], zeros_h], axis=1)],
        axis=1)                                                              # (1, 6Hp)
    bhn = jnp.concatenate([bh_f_p[:, 2 * Hp:], bh_b_p[:, 2 * Hp:]], axis=1)  # (1, 2Hp)

    # Time-major flattened token ids + destination rows in the B_pad layout.
    tok_flat = jnp.transpose(token_seq, (1, 0)).reshape(T * B).astype(jnp.int32)
    t_idx = jnp.repeat(jnp.arange(T, dtype=jnp.int32), B)
    b_idx = jnp.tile(jnp.arange(B, dtype=jnp.int32), T)
    dst_rows = t_idx * jnp.int32(B_pad) + b_idx                              # (T*B,)

    vmem = pl.BlockSpec(memory_space=pltpu.MemorySpace.VMEM)
    smem = pl.BlockSpec(memory_space=pltpu.MemorySpace.SMEM)
    hbm = pl.BlockSpec(memory_space=pl.ANY)           # embedding table stays in HBM

    est_bytes = 4 * (wi_cat.size + wh_cat.size + bfold.size + bhn.size
                     + T * B_pad * E + T * B_pad * 6 * Hp + B_pad * 2 * Hp)
    vmem_limit = int(min(64 * 1024 * 1024, max(32 * 1024 * 1024, 2 * est_bytes)))

    kernel = _make_encoder_kernel(T, B, B_pad, E, Hp)

    out_raw = pl.pallas_call(
        kernel,
        out_shape=jax.ShapeDtypeStruct((B_pad, 2 * Hp), jnp.float32),
        in_specs=[smem, smem, hbm, vmem, vmem, vmem, vmem],
        out_specs=vmem,
        scratch_shapes=[
            pltpu.VMEM((T * B_pad, E), emb_table.dtype),
            pltpu.VMEM((T, B_pad, 6 * Hp), jnp.float32),
            pltpu.SemaphoreType.DMA((T * B,)),
        ],
        compiler_params=pltpu.CompilerParams(vmem_limit_bytes=vmem_limit),
    )(tok_flat, dst_rows, emb_table, wi_cat, wh_cat, bfold, bhn)

    # Slice the lane-dense padded output back to (B, 2*H).
    return jnp.concatenate([out_raw[:B, :H], out_raw[:B, Hp:Hp + H]], axis=1)


# ------------------------- parameter init (deterministic) -------------------
def init_params(key, input_dim, emb_dim, hidden_dim):
    H = hidden_dim
    k = 1.0 / jnp.sqrt(jnp.float32(H))
    keys = jax.random.split(key, 9)

    emb = jax.random.normal(keys[0], (input_dim, emb_dim), jnp.float32)

    def uni(k_, shape):
        return jax.random.uniform(k_, shape, jnp.float32, minval=-k, maxval=k)

    def direction(k_a, k_b, k_c, k_d):
        # stored already transposed: (in, 3H) / (H, 3H); gate order [r, z, n]
        wi = uni(k_a, (emb_dim, 3 * H))
        wh = uni(k_b, (H, 3 * H))
        bi = uni(k_c, (1, 3 * H))
        bh = uni(k_d, (1, 3 * H))
        return (wi, wh, bi, bh)

    return {
        "embedding": emb,
        "fwd": direction(keys[1], keys[2], keys[3], keys[4]),
        "bwd": direction(keys[5], keys[6], keys[7], keys[8]),
    }


# ------------------------- pure-JAX reference --------------------------------
def encoder_ref(token_seq, params):
    HIGH = jax.lax.Precision.HIGHEST
    emb_table = params["embedding"]
    embedded = emb_table[token_seq]                   # (B, T, E)
    B, T, E = embedded.shape
    H = params["fwd"][1].shape[0]

    def run(seq_order, p):
        wi, wh, bi, bh = p
        h = jnp.zeros((B, H), jnp.float32)
        for t in seq_order:
            x_t = embedded[:, t, :]
            gi = jnp.dot(x_t, wi, precision=HIGH) + bi
            gh = jnp.dot(h, wh, precision=HIGH) + bh
            r = jax.nn.sigmoid(gi[:, :H] + gh[:, :H])
            z = jax.nn.sigmoid(gi[:, H:2 * H] + gh[:, H:2 * H])
            n = jnp.tanh(gi[:, 2 * H:] + r * gh[:, 2 * H:])
            h = (1.0 - z) * n + z * h
        return h

    h_fwd = run(range(T), params["fwd"])
    h_bwd = run(range(T - 1, -1, -1), params["bwd"])
    return jnp.concatenate([h_fwd, h_bwd], axis=1)


if __name__ == "__main__":
    B, T = 2, 8                 # batch, sequence length
    input_dim, emb_dim, hidden_dim = 16, 16, 32

    key = jax.random.PRNGKey(0)
    k_tok, k_params = jax.random.split(key)

    token_seq = jax.random.randint(k_tok, (B, T), 0, input_dim, jnp.int32)
    params = init_params(k_params, input_dim, emb_dim, hidden_dim)

    out = encoder_forward(token_seq, params)
    out = jax.block_until_ready(out)

    ref = encoder_ref(token_seq, params)
    assert out.shape == (B, 2 * hidden_dim), out.shape
    max_err = float(jnp.max(jnp.abs(out - ref)))
    # Kernel matmuls use default MXU precision; reference uses f32 HIGHEST,
    # hence the slightly relaxed bound.
    assert jnp.allclose(out, ref, atol=5e-3, rtol=5e-3), (
        "max abs err: %s" % max_err)

    print("KERNEL_OK")
</pallas_src>

<mosaic_0001>
module attributes {stable_mosaic.version = 11 : i64} {
  func.func @kernel(%arg0: memref<16xi32, #tpu.memory_space<smem>>, %arg1: memref<16xi32, #tpu.memory_space<smem>>, %arg2: memref<16x16xf32, #tpu.memory_space<any>>, %arg3: memref<16x768xf32, #tpu.memory_space<vmem>>, %arg4: memref<128x768xf32, #tpu.memory_space<vmem>>, %arg5: memref<1x768xf32, #tpu.memory_space<vmem>>, %arg6: memref<1x256xf32, #tpu.memory_space<vmem>>, %arg7: memref<8x256xf32, #tpu.memory_space<vmem>>, %arg8: memref<64x16xf32, #tpu.memory_space<vmem>>, %arg9: memref<8x8x768xf32, #tpu.memory_space<vmem>>, %arg10: memref<16x!tpu.dma_semaphore, #tpu.memory_space<semaphore_mem>>) attributes {dimension_semantics = [], scalar_prefetch = 0 : i64, scratch_operands = 3 : i64, tpu.core_type = #tpu.core_type<tc>} {
    %cst = arith.constant 0.000000e+00 : f32
    %0 = vector.broadcast %cst : f32 to vector<64x16xf32>
    %c0 = arith.constant 0 : index
    %c0_0 = arith.constant 0 : index
    %1 = vector.load %arg8[%c0, %c0_0] : memref<64x16xf32, #tpu.memory_space<vmem>>, vector<64x16xf32>
    tpu.vector_store %arg8[%c0, %c0_0], %0 {strides = array<i32>} : memref<64x16xf32, #tpu.memory_space<vmem>>, vector<64x16xf32>,
    %c0_i32 = arith.constant 0 : i32
    %c16_i32 = arith.constant 16 : i32
    %2 = arith.addi %c0_i32, %c16_i32 : i32
    %c1_i32 = arith.constant 1 : i32
    scf.for %arg11 = %c0_i32 to %2 step %c1_i32  : i32 {
      %c1_i32_133 = arith.constant 1 : i32
      %555 = arith.muli %arg11, %c1_i32_133 : i32
      %c0_i32_134 = arith.constant 0 : i32
      %556 = arith.addi %c0_i32_134, %555 : i32
      %557 = arith.index_cast %556 : i32 to index
      %558 = memref.load %arg0[%557] : memref<16xi32, #tpu.memory_space<smem>>
      %559 = arith.index_cast %556 : i32 to index
      %560 = memref.load %arg1[%559] : memref<16xi32, #tpu.memory_space<smem>>
      %c0_i32_135 = arith.constant 0 : i32
      %561 = tpu.memref_slice %arg2[%558, %c0_i32_135] : memref<16x16xf32, #tpu.memory_space<any>> -> memref<1x16xf32, #tpu.memory_space<any>>
      %562 = tpu.memref_squeeze %561 : memref<1x16xf32, #tpu.memory_space<any>> -> memref<16xf32, #tpu.memory_space<any>>
      %c0_i32_136 = arith.constant 0 : i32
      %563 = tpu.memref_slice %arg8[%560, %c0_i32_136] : memref<64x16xf32, #tpu.memory_space<vmem>> -> memref<1x16xf32, #tpu.memory_space<vmem>>
      %564 = tpu.memref_squeeze %563 : memref<1x16xf32, #tpu.memory_space<vmem>> -> memref<16xf32, #tpu.memory_space<vmem>>
      %565 = tpu.memref_slice %arg10[%556] : memref<16x!tpu.dma_semaphore, #tpu.memory_space<semaphore_mem>> -> memref<1x!tpu.dma_semaphore, #tpu.memory_space<semaphore_mem>>
      %566 = tpu.memref_squeeze %565 : memref<1x!tpu.dma_semaphore, #tpu.memory_space<semaphore_mem>> -> memref<!tpu.dma_semaphore, #tpu.memory_space<semaphore_mem>>
      tpu.enqueue_dma source(%562 : memref<16xf32, #tpu.memory_space<any>>) target(%564 : memref<16xf32, #tpu.memory_space<vmem>>) target_semaphore(%566 : memref<!tpu.dma_semaphore, #tpu.memory_space<semaphore_mem>>)
    }
    %c16_i32_1 = arith.constant 16 : i32
    %c0_i32_2 = arith.constant 0 : i32
    %c16_i32_3 = arith.constant 16 : i32
    %3 = arith.addi %c0_i32_2, %c16_i32_3 : i32
    %c1_i32_4 = arith.constant 1 : i32
    scf.for %arg11 = %c0_i32_2 to %3 step %c1_i32_4  : i32 {
      %c1_i32_133 = arith.constant 1 : i32
      %555 = arith.muli %arg11, %c1_i32_133 : i32
      %c0_i32_134 = arith.constant 0 : i32
      %556 = arith.addi %c0_i32_134, %555 : i32
      %557 = arith.index_cast %556 : i32 to index
      %558 = memref.load %arg1[%557] : memref<16xi32, #tpu.memory_space<smem>>
      %c0_i32_135 = arith.constant 0 : i32
      %c0_i32_136 = arith.constant 0 : i32
      %559 = tpu.memref_slice %arg2[%c0_i32_135, %c0_i32_136] : memref<16x16xf32, #tpu.memory_space<any>> -> memref<1x16xf32, #tpu.memory_space<any>>
      %560 = tpu.memref_squeeze %559 : memref<1x16xf32, #tpu.memory_space<any>> -> memref<16xf32, #tpu.memory_space<any>>
      %c0_i32_137 = arith.constant 0 : i32
      %561 = tpu.memref_slice %arg8[%558, %c0_i32_137] : memref<64x16xf32, #tpu.memory_space<vmem>> -> memref<1x16xf32, #tpu.memory_space<vmem>>
      %562 = tpu.memref_squeeze %561 : memref<1x16xf32, #tpu.memory_space<vmem>> -> memref<16xf32, #tpu.memory_space<vmem>>
      %563 = tpu.memref_slice %arg10[%556] : memref<16x!tpu.dma_semaphore, #tpu.memory_space<semaphore_mem>> -> memref<1x!tpu.dma_semaphore, #tpu.memory_space<semaphore_mem>>
      %564 = tpu.memref_squeeze %563 : memref<1x!tpu.dma_semaphore, #tpu.memory_space<semaphore_mem>> -> memref<!tpu.dma_semaphore, #tpu.memory_space<semaphore_mem>>
      tpu.wait_dma2 semaphore(%564 : memref<!tpu.dma_semaphore, #tpu.memory_space<semaphore_mem>>) src(%560 : memref<16xf32, #tpu.memory_space<any>>) dst(%562 : memref<16xf32, #tpu.memory_space<vmem>>)
    }
    %c16_i32_5 = arith.constant 16 : i32
    %c0_6 = arith.constant 0 : index
    %c0_7 = arith.constant 0 : index
    %4 = vector.load %arg8[%c0_6, %c0_7] : memref<64x16xf32, #tpu.memory_space<vmem>>, vector<64x16xf32>
    %c0_8 = arith.constant 0 : index
    %c0_9 = arith.constant 0 : index
    %5 = vector.load %arg3[%c0_8, %c0_9] : memref<16x768xf32, #tpu.memory_space<vmem>>, vector<16x768xf32>
    %cst_10 = arith.constant dense<0.000000e+00> : vector<64x768xf32>
    %6 = tpu.matmul %4, %5, %cst_10 {dimension_numbers = #tpu.dot_dimension_numbers<[1], [0], [0], [1], [0, 0, 1, 1], [], []>} : vector<64x16xf32>, vector<16x768xf32>, vector<64x768xf32> -> vector<64x768xf32>
    %c0_11 = arith.constant 0 : index
    %c0_12 = arith.constant 0 : index
    %7 = vector.load %arg5[%c0_11, %c0_12] : memref<1x768xf32, #tpu.memory_space<vmem>>, vector<1x768xf32>
    %8 = vector.broadcast %7 : vector<1x768xf32> to vector<64x768xf32>
    %9 = arith.addf %6, %8 : vector<64x768xf32>
    %10 = vector.shape_cast %9 : vector<64x768xf32> to vector<8x8x768xf32>
    %c0_13 = arith.constant 0 : index
    %c0_14 = arith.constant 0 : index
    %c0_15 = arith.constant 0 : index
    %11 = vector.load %arg9[%c0_13, %c0_14, %c0_15] : memref<8x8x768xf32, #tpu.memory_space<vmem>>, vector<8x8x768xf32>
    tpu.vector_store %arg9[%c0_13, %c0_14, %c0_15], %10 {strides = array<i32>} : memref<8x8x768xf32, #tpu.memory_space<vmem>>, vector<8x8x768xf32>,
    %c0_16 = arith.constant 0 : index
    %c0_17 = arith.constant 0 : index
    %12 = vector.load %arg4[%c0_16, %c0_17] : memref<128x768xf32, #tpu.memory_space<vmem>>, vector<128x384xf32>
    %c0_18 = arith.constant 0 : index
    %c384 = arith.constant 384 : index
    %13 = vector.load %arg4[%c0_18, %c384] : memref<128x768xf32, #tpu.memory_space<vmem>>, vector<128x384xf32>
    %c0_19 = arith.constant 0 : index
    %c0_20 = arith.constant 0 : index
    %14 = vector.load %arg6[%c0_19, %c0_20] : memref<1x256xf32, #tpu.memory_space<vmem>>, vector<1x128xf32>
    %c0_21 = arith.constant 0 : index
    %c128 = arith.constant 128 : index
    %15 = vector.load %arg6[%c0_21, %c128] : memref<1x256xf32, #tpu.memory_space<vmem>>, vector<1x128xf32>
    %cst_22 = arith.constant 0.000000e+00 : f32
    %16 = vector.broadcast %cst_22 : f32 to vector<8x128xf32>
    %c0_i32_23 = arith.constant 0 : i32
    %17 = arith.index_cast %c0_i32_23 : i32 to index
    %c0_24 = arith.constant 0 : index
    %c0_25 = arith.constant 0 : index
    %18 = vector.load %arg9[%17, %c0_24, %c0_25] : memref<8x8x768xf32, #tpu.memory_space<vmem>>, vector<1x8x768xf32>
    %19 = vector.shape_cast %18 : vector<1x8x768xf32> to vector<8x768xf32>
    %c7_i32 = arith.constant 7 : i32
    %20 = arith.subi %c7_i32, %c0_i32_23 : i32
    %21 = arith.index_cast %20 : i32 to index
    %c0_26 = arith.constant 0 : index
    %c0_27 = arith.constant 0 : index
    %22 = vector.load %arg9[%21, %c0_26, %c0_27] : memref<8x8x768xf32, #tpu.memory_space<vmem>>, vector<1x8x768xf32>
    %23 = vector.shape_cast %22 : vector<1x8x768xf32> to vector<8x768xf32>
    %24 = vector.extract_strided_slice %19 {offsets = [0, 0], sizes = [8, 384], strides = [1, 1]} : vector<8x768xf32> to vector<8x384xf32>
    %cst_28 = arith.constant dense<0.000000e+00> : vector<8x384xf32>
    %25 = tpu.matmul %16, %12, %cst_28 {dimension_numbers = #tpu.dot_dimension_numbers<[1], [0], [0], [1], [0, 0, 1, 1], [], []>} : vector<8x128xf32>, vector<128x384xf32>, vector<8x384xf32> -> vector<8x384xf32>
    %26 = vector.extract_strided_slice %24 {offsets = [0, 0], sizes = [8, 128], strides = [1, 1]} : vector<8x384xf32> to vector<8x128xf32>
    %27 = vector.extract_strided_slice %25 {offsets = [0, 0], sizes = [8, 128], strides = [1, 1]} : vector<8x384xf32> to vector<8x128xf32>
    %28 = arith.addf %26, %27 : vector<8x128xf32>
    %29 = arith.negf %28 : vector<8x128xf32>
    %30 = math.exp %29 : vector<8x128xf32>
    %cst_29 = arith.constant 1.000000e+00 : f32
    %31 = vector.broadcast %cst_29 : f32 to vector<8x128xf32>
    %32 = arith.addf %31, %30 : vector<8x128xf32>
    %33 = arith.divf %31, %32 : vector<8x128xf32>
    %34 = vector.extract_strided_slice %24 {offsets = [0, 128], sizes = [8, 128], strides = [1, 1]} : vector<8x384xf32> to vector<8x128xf32>
    %35 = vector.extract_strided_slice %25 {offsets = [0, 128], sizes = [8, 128], strides = [1, 1]} : vector<8x384xf32> to vector<8x128xf32>
    %36 = arith.addf %34, %35 : vector<8x128xf32>
    %37 = arith.negf %36 : vector<8x128xf32>
    %38 = math.exp %37 : vector<8x128xf32>
    %cst_30 = arith.constant 1.000000e+00 : f32
    %39 = vector.broadcast %cst_30 : f32 to vector<8x128xf32>
    %40 = arith.addf %39, %38 : vector<8x128xf32>
    %41 = arith.divf %39, %40 : vector<8x128xf32>
    %42 = vector.extract_strided_slice %24 {offsets = [0, 256], sizes = [8, 128], strides = [1, 1]} : vector<8x384xf32> to vector<8x128xf32>
    %43 = vector.extract_strided_slice %25 {offsets = [0, 256], sizes = [8, 128], strides = [1, 1]} : vector<8x384xf32> to vector<8x128xf32>
    %44 = vector.broadcast %14 : vector<1x128xf32> to vector<8x128xf32>
    %45 = arith.addf %43, %44 : vector<8x128xf32>
    %46 = arith.mulf %33, %45 : vector<8x128xf32>
    %47 = arith.addf %42, %46 : vector<8x128xf32>
    %48 = math.tanh %47 : vector<8x128xf32>
    %cst_31 = arith.constant 1.000000e+00 : f32
    %49 = vector.broadcast %cst_31 : f32 to vector<8x128xf32>
    %50 = arith.subf %49, %41 : vector<8x128xf32>
    %51 = arith.mulf %50, %48 : vector<8x128xf32>
    %52 = arith.mulf %41, %16 : vector<8x128xf32>
    %53 = arith.addf %51, %52 : vector<8x128xf32>
    %54 = vector.extract_strided_slice %23 {offsets = [0, 384], sizes = [8, 384], strides = [1, 1]} : vector<8x768xf32> to vector<8x384xf32>
    %cst_32 = arith.constant dense<0.000000e+00> : vector<8x384xf32>
    %55 = tpu.matmul %16, %13, %cst_32 {dimension_numbers = #tpu.dot_dimension_numbers<[1], [0], [0], [1], [0, 0, 1, 1], [], []>} : vector<8x128xf32>, vector<128x384xf32>, vector<8x384xf32> -> vector<8x384xf32>
    %56 = vector.extract_strided_slice %54 {offsets = [0, 0], sizes = [8, 128], strides = [1, 1]} : vector<8x384xf32> to vector<8x128xf32>
    %57 = vector.extract_strided_slice %55 {offsets = [0, 0], sizes = [8, 128], strides = [1, 1]} : vector<8x384xf32> to vector<8x128xf32>
    %58 = arith.addf %56, %57 : vector<8x128xf32>
    %59 = arith.negf %58 : vector<8x128xf32>
    %60 = math.exp %59 : vector<8x128xf32>
    %cst_33 = arith.constant 1.000000e+00 : f32
    %61 = vector.broadcast %cst_33 : f32 to vector<8x128xf32>
    %62 = arith.addf %61, %60 : vector<8x128xf32>
    %63 = arith.divf %61, %62 : vector<8x128xf32>
    %64 = vector.extract_strided_slice %54 {offsets = [0, 128], sizes = [8, 128], strides = [1, 1]} : vector<8x384xf32> to vector<8x128xf32>
    %65 = vector.extract_strided_slice %55 {offsets = [0, 128], sizes = [8, 128], strides = [1, 1]} : vector<8x384xf32> to vector<8x128xf32>
    %66 = arith.addf %64, %65 : vector<8x128xf32>
    %67 = arith.negf %66 : vector<8x128xf32>
    %68 = math.exp %67 : vector<8x128xf32>
    %cst_34 = arith.constant 1.000000e+00 : f32
    %69 = vector.broadcast %cst_34 : f32 to vector<8x128xf32>
    %70 = arith.addf %69, %68 : vector<8x128xf32>
    %71 = arith.divf %69, %70 : vector<8x128xf32>
    %72 = vector.extract_strided_slice %54 {offsets = [0, 256], sizes = [8, 128], strides = [1, 1]} : vector<8x384xf32> to vector<8x128xf32>
    %73 = vector.extract_strided_slice %55 {offsets = [0, 256], sizes = [8, 128], strides = [1, 1]} : vector<8x384xf32> to vector<8x128xf32>
    %74 = vector.broadcast %15 : vector<1x128xf32> to vector<8x128xf32>
    %75 = arith.addf %73, %74 : vector<8x128xf32>
    %76 = arith.mulf %63, %75 : vector<8x128xf32>
    %77 = arith.addf %72, %76 : vector<8x128xf32>
    %78 = math.tanh %77 : vector<8x128xf32>
    %cst_35 = arith.constant 1.000000e+00 : f32
    %79 = vector.broadcast %cst_35 : f32 to vector<8x128xf32>
    %80 = arith.subf %79, %71 : vector<8x128xf32>
    %81 = arith.mulf %80, %78 : vector<8x128xf32>
    %82 = arith.mulf %71, %16 : vector<8x128xf32>
    %83 = arith.addf %81, %82 : vector<8x128xf32>
    %c1_i32_36 = arith.constant 1 : i32
    %84 = arith.index_cast %c1_i32_36 : i32 to index
    %c0_37 = arith.constant 0 : index
    %c0_38 = arith.constant 0 : index
    %85 = vector.load %arg9[%84, %c0_37, %c0_38] : memref<8x8x768xf32, #tpu.memory_space<vmem>>, vector<1x8x768xf32>
    %86 = vector.shape_cast %85 : vector<1x8x768xf32> to vector<8x768xf32>
    %c7_i32_39 = arith.constant 7 : i32
    %87 = arith.subi %c7_i32_39, %c1_i32_36 : i32
    %88 = arith.index_cast %87 : i32 to index
    %c0_40 = arith.constant 0 : index
    %c0_41 = arith.constant 0 : index
    %89 = vector.load %arg9[%88, %c0_40, %c0_41] : memref<8x8x768xf32, #tpu.memory_space<vmem>>, vector<1x8x768xf32>
    %90 = vector.shape_cast %89 : vector<1x8x768xf32> to vector<8x768xf32>
    %91 = vector.extract_strided_slice %86 {offsets = [0, 0], sizes = [8, 384], strides = [1, 1]} : vector<8x768xf32> to vector<8x384xf32>
    %cst_42 = arith.constant dense<0.000000e+00> : vector<8x384xf32>
    %92 = tpu.matmul %53, %12, %cst_42 {dimension_numbers = #tpu.dot_dimension_numbers<[1], [0], [0], [1], [0, 0, 1, 1], [], []>} : vector<8x128xf32>, vector<128x384xf32>, vector<8x384xf32> -> vector<8x384xf32>
    %93 = vector.extract_strided_slice %91 {offsets = [0, 0], sizes = [8, 128], strides = [1, 1]} : vector<8x384xf32> to vector<8x128xf32>
    %94 = vector.extract_strided_slice %92 {offsets = [0, 0], sizes = [8, 128], strides = [1, 1]} : vector<8x384xf32> to vector<8x128xf32>
    %95 = arith.addf %93, %94 : vector<8x128xf32>
    %96 = arith.negf %95 : vector<8x128xf32>
    %97 = math.exp %96 : vector<8x128xf32>
    %cst_43 = arith.constant 1.000000e+00 : f32
    %98 = vector.broadcast %cst_43 : f32 to vector<8x128xf32>
    %99 = arith.addf %98, %97 : vector<8x128xf32>
    %100 = arith.divf %98, %99 : vector<8x128xf32>
    %101 = vector.extract_strided_slice %91 {offsets = [0, 128], sizes = [8, 128], strides = [1, 1]} : vector<8x384xf32> to vector<8x128xf32>
    %102 = vector.extract_strided_slice %92 {offsets = [0, 128], sizes = [8, 128], strides = [1, 1]} : vector<8x384xf32> to vector<8x128xf32>
    %103 = arith.addf %101, %102 : vector<8x128xf32>
    %104 = arith.negf %103 : vector<8x128xf32>
    %105 = math.exp %104 : vector<8x128xf32>
    %cst_44 = arith.constant 1.000000e+00 : f32
    %106 = vector.broadcast %cst_44 : f32 to vector<8x128xf32>
    %107 = arith.addf %106, %105 : vector<8x128xf32>
    %108 = arith.divf %106, %107 : vector<8x128xf32>
    %109 = vector.extract_strided_slice %91 {offsets = [0, 256], sizes = [8, 128], strides = [1, 1]} : vector<8x384xf32> to vector<8x128xf32>
    %110 = vector.extract_strided_slice %92 {offsets = [0, 256], sizes = [8, 128], strides = [1, 1]} : vector<8x384xf32> to vector<8x128xf32>
    %111 = vector.broadcast %14 : vector<1x128xf32> to vector<8x128xf32>
    %112 = arith.addf %110, %111 : vector<8x128xf32>
    %113 = arith.mulf %100, %112 : vector<8x128xf32>
    %114 = arith.addf %109, %113 : vector<8x128xf32>
    %115 = math.tanh %114 : vector<8x128xf32>
    %cst_45 = arith.constant 1.000000e+00 : f32
    %116 = vector.broadcast %cst_45 : f32 to vector<8x128xf32>
    %117 = arith.subf %116, %108 : vector<8x128xf32>
    %118 = arith.mulf %117, %115 : vector<8x128xf32>
    %119 = arith.mulf %108, %53 : vector<8x128xf32>
    %120 = arith.addf %118, %119 : vector<8x128xf32>
    %121 = vector.extract_strided_slice %90 {offsets = [0, 384], sizes = [8, 384], strides = [1, 1]} : vector<8x768xf32> to vector<8x384xf32>
    %cst_46 = arith.constant dense<0.000000e+00> : vector<8x384xf32>
    %122 = tpu.matmul %83, %13, %cst_46 {dimension_numbers = #tpu.dot_dimension_numbers<[1], [0], [0], [1], [0, 0, 1, 1], [], []>} : vector<8x128xf32>, vector<128x384xf32>, vector<8x384xf32> -> vector<8x384xf32>
    %123 = vector.extract_strided_slice %121 {offsets = [0, 0], sizes = [8, 128], strides = [1, 1]} : vector<8x384xf32> to vector<8x128xf32>
    %124 = vector.extract_strided_slice %122 {offsets = [0, 0], sizes = [8, 128], strides = [1, 1]} : vector<8x384xf32> to vector<8x128xf32>
    %125 = arith.addf %123, %124 : vector<8x128xf32>
    %126 = arith.negf %125 : vector<8x128xf32>
    %127 = math.exp %126 : vector<8x128xf32>
    %cst_47 = arith.constant 1.000000e+00 : f32
    %128 = vector.broadcast %cst_47 : f32 to vector<8x128xf32>
    %129 = arith.addf %128, %127 : vector<8x128xf32>
    %130 = arith.divf %128, %129 : vector<8x128xf32>
    %131 = vector.extract_strided_slice %121 {offsets = [0, 128], sizes = [8, 128], strides = [1, 1]} : vector<8x384xf32> to vector<8x128xf32>
    %132 = vector.extract_strided_slice %122 {offsets = [0, 128], sizes = [8, 128], strides = [1, 1]} : vector<8x384xf32> to vector<8x128xf32>
    %133 = arith.addf %131, %132 : vector<8x128xf32>
    %134 = arith.negf %133 : vector<8x128xf32>
    %135 = math.exp %134 : vector<8x128xf32>
    %cst_48 = arith.constant 1.000000e+00 : f32
    %136 = vector.broadcast %cst_48 : f32 to vector<8x128xf32>
    %137 = arith.addf %136, %135 : vector<8x128xf32>
    %138 = arith.divf %136, %137 : vector<8x128xf32>
    %139 = vector.extract_strided_slice %121 {offsets = [0, 256], sizes = [8, 128], strides = [1, 1]} : vector<8x384xf32> to vector<8x128xf32>
    %140 = vector.extract_strided_slice %122 {offsets = [0, 256], sizes = [8, 128], strides = [1, 1]} : vector<8x384xf32> to vector<8x128xf32>
    %141 = vector.broadcast %15 : vector<1x128xf32> to vector<8x128xf32>
    %142 = arith.addf %140, %141 : vector<8x128xf32>
    %143 = arith.mulf %130, %142 : vector<8x128xf32>
    %144 = arith.addf %139, %143 : vector<8x128xf32>
    %145 = math.tanh %144 : vector<8x128xf32>
    %cst_49 = arith.constant 1.000000e+00 : f32
    %146 = vector.broadcast %cst_49 : f32 to vector<8x128xf32>
    %147 = arith.subf %146, %138 : vector<8x128xf32>
    %148 = arith.mulf %147, %145 : vector<8x128xf32>
    %149 = arith.mulf %138, %83 : vector<8x128xf32>
    %150 = arith.addf %148, %149 : vector<8x128xf32>
    %c2_i32 = arith.constant 2 : i32
    %151 = arith.index_cast %c2_i32 : i32 to index
    %c0_50 = arith.constant 0 : index
    %c0_51 = arith.constant 0 : index
    %152 = vector.load %arg9[%151, %c0_50, %c0_51] : memref<8x8x768xf32, #tpu.memory_space<vmem>>, vector<1x8x768xf32>
    %153 = vector.shape_cast %152 : vector<1x8x768xf32> to vector<8x768xf32>
    %c7_i32_52 = arith.constant 7 : i32
    %154 = arith.subi %c7_i32_52, %c2_i32 : i32
    %155 = arith.index_cast %154 : i32 to index
    %c0_53 = arith.constant 0 : index
    %c0_54 = arith.constant 0 : index
    %156 = vector.load %arg9[%155, %c0_53, %c0_54] : memref<8x8x768xf32, #tpu.memory_space<vmem>>, vector<1x8x768xf32>
    %157 = vector.shape_cast %156 : vector<1x8x768xf32> to vector<8x768xf32>
    %158 = vector.extract_strided_slice %153 {offsets = [0, 0], sizes = [8, 384], strides = [1, 1]} : vector<8x768xf32> to vector<8x384xf32>
    %cst_55 = arith.constant dense<0.000000e+00> : vector<8x384xf32>
    %159 = tpu.matmul %120, %12, %cst_55 {dimension_numbers = #tpu.dot_dimension_numbers<[1], [0], [0], [1], [0, 0, 1, 1], [], []>} : vector<8x128xf32>, vector<128x384xf32>, vector<8x384xf32> -> vector<8x384xf32>
    %160 = vector.extract_strided_slice %158 {offsets = [0, 0], sizes = [8, 128], strides = [1, 1]} : vector<8x384xf32> to vector<8x128xf32>
    %161 = vector.extract_strided_slice %159 {offsets = [0, 0], sizes = [8, 128], strides = [1, 1]} : vector<8x384xf32> to vector<8x128xf32>
    %162 = arith.addf %160, %161 : vector<8x128xf32>
    %163 = arith.negf %162 : vector<8x128xf32>
    %164 = math.exp %163 : vector<8x128xf32>
    %cst_56 = arith.constant 1.000000e+00 : f32
    %165 = vector.broadcast %cst_56 : f32 to vector<8x128xf32>
    %166 = arith.addf %165, %164 : vector<8x128xf32>
    %167 = arith.divf %165, %166 : vector<8x128xf32>
    %168 = vector.extract_strided_slice %158 {offsets = [0, 128], sizes = [8, 128], strides = [1, 1]} : vector<8x384xf32> to vector<8x128xf32>
    %169 = vector.extract_strided_slice %159 {offsets = [0, 128], sizes = [8, 128], strides = [1, 1]} : vector<8x384xf32> to vector<8x128xf32>
    %170 = arith.addf %168, %169 : vector<8x128xf32>
    %171 = arith.negf %170 : vector<8x128xf32>
    %172 = math.exp %171 : vector<8x128xf32>
    %cst_57 = arith.constant 1.000000e+00 : f32
    %173 = vector.broadcast %cst_57 : f32 to vector<8x128xf32>
    %174 = arith.addf %173, %172 : vector<8x128xf32>
    %175 = arith.divf %173, %174 : vector<8x128xf32>
    %176 = vector.extract_strided_slice %158 {offsets = [0, 256], sizes = [8, 128], strides = [1, 1]} : vector<8x384xf32> to vector<8x128xf32>
    %177 = vector.extract_strided_slice %159 {offsets = [0, 256], sizes = [8, 128], strides = [1, 1]} : vector<8x384xf32> to vector<8x128xf32>
    %178 = vector.broadcast %14 : vector<1x128xf32> to vector<8x128xf32>
    %179 = arith.addf %177, %178 : vector<8x128xf32>
    %180 = arith.mulf %167, %179 : vector<8x128xf32>
    %181 = arith.addf %176, %180 : vector<8x128xf32>
    %182 = math.tanh %181 : vector<8x128xf32>
    %cst_58 = arith.constant 1.000000e+00 : f32
    %183 = vector.broadcast %cst_58 : f32 to vector<8x128xf32>
    %184 = arith.subf %183, %175 : vector<8x128xf32>
    %185 = arith.mulf %184, %182 : vector<8x128xf32>
    %186 = arith.mulf %175, %120 : vector<8x128xf32>
    %187 = arith.addf %185, %186 : vector<8x128xf32>
    %188 = vector.extract_strided_slice %157 {offsets = [0, 384], sizes = [8, 384], strides = [1, 1]} : vector<8x768xf32> to vector<8x384xf32>
    %cst_59 = arith.constant dense<0.000000e+00> : vector<8x384xf32>
    %189 = tpu.matmul %150, %13, %cst_59 {dimension_numbers = #tpu.dot_dimension_numbers<[1], [0], [0], [1], [0, 0, 1, 1], [], []>} : vector<8x128xf32>, vector<128x384xf32>, vector<8x384xf32> -> vector<8x384xf32>
    %190 = vector.extract_strided_slice %188 {offsets = [0, 0], sizes = [8, 128], strides = [1, 1]} : vector<8x384xf32> to vector<8x128xf32>
    %191 = vector.extract_strided_slice %189 {offsets = [0, 0], sizes = [8, 128], strides = [1, 1]} : vector<8x384xf32> to vector<8x128xf32>
    %192 = arith.addf %190, %191 : vector<8x128xf32>
    %193 = arith.negf %192 : vector<8x128xf32>
    %194 = math.exp %193 : vector<8x128xf32>
    %cst_60 = arith.constant 1.000000e+00 : f32
    %195 = vector.broadcast %cst_60 : f32 to vector<8x128xf32>
    %196 = arith.addf %195, %194 : vector<8x128xf32>
    %197 = arith.divf %195, %196 : vector<8x128xf32>
    %198 = vector.extract_strided_slice %188 {offsets = [0, 128], sizes = [8, 128], strides = [1, 1]} : vector<8x384xf32> to vector<8x128xf32>
    %199 = vector.extract_strided_slice %189 {offsets = [0, 128], sizes = [8, 128], strides = [1, 1]} : vector<8x384xf32> to vector<8x128xf32>
    %200 = arith.addf %198, %199 : vector<8x128xf32>
    %201 = arith.negf %200 : vector<8x128xf32>
    %202 = math.exp %201 : vector<8x128xf32>
    %cst_61 = arith.constant 1.000000e+00 : f32
    %203 = vector.broadcast %cst_61 : f32 to vector<8x128xf32>
    %204 = arith.addf %203, %202 : vector<8x128xf32>
    %205 = arith.divf %203, %204 : vector<8x128xf32>
    %206 = vector.extract_strided_slice %188 {offsets = [0, 256], sizes = [8, 128], strides = [1, 1]} : vector<8x384xf32> to vector<8x128xf32>
    %207 = vector.extract_strided_slice %189 {offsets = [0, 256], sizes = [8, 128], strides = [1, 1]} : vector<8x384xf32> to vector<8x128xf32>
    %208 = vector.broadcast %15 : vector<1x128xf32> to vector<8x128xf32>
    %209 = arith.addf %207, %208 : vector<8x128xf32>
    %210 = arith.mulf %197, %209 : vector<8x128xf32>
    %211 = arith.addf %206, %210 : vector<8x128xf32>
    %212 = math.tanh %211 : vector<8x128xf32>
    %cst_62 = arith.constant 1.000000e+00 : f32
    %213 = vector.broadcast %cst_62 : f32 to vector<8x128xf32>
    %214 = arith.subf %213, %205 : vector<8x128xf32>
    %215 = arith.mulf %214, %212 : vector<8x128xf32>
    %216 = arith.mulf %205, %150 : vector<8x128xf32>
    %217 = arith.addf %215, %216 : vector<8x128xf32>
    %c3_i32 = arith.constant 3 : i32
    %218 = arith.index_cast %c3_i32 : i32 to index
    %c0_63 = arith.constant 0 : index
    %c0_64 = arith.constant 0 : index
    %219 = vector.load %arg9[%218, %c0_63, %c0_64] : memref<8x8x768xf32, #tpu.memory_space<vmem>>, vector<1x8x768xf32>
    %220 = vector.shape_cast %219 : vector<1x8x768xf32> to vector<8x768xf32>
    %c7_i32_65 = arith.constant 7 : i32
    %221 = arith.subi %c7_i32_65, %c3_i32 : i32
    %222 = arith.index_cast %221 : i32 to index
    %c0_66 = arith.constant 0 : index
    %c0_67 = arith.constant 0 : index
    %223 = vector.load %arg9[%222, %c0_66, %c0_67] : memref<8x8x768xf32, #tpu.memory_space<vmem>>, vector<1x8x768xf32>
    %224 = vector.shape_cast %223 : vector<1x8x768xf32> to vector<8x768xf32>
    %225 = vector.extract_strided_slice %220 {offsets = [0, 0], sizes = [8, 384], strides = [1, 1]} : vector<8x768xf32> to vector<8x384xf32>
    %cst_68 = arith.constant dense<0.000000e+00> : vector<8x384xf32>
    %226 = tpu.matmul %187, %12, %cst_68 {dimension_numbers = #tpu.dot_dimension_numbers<[1], [0], [0], [1], [0, 0, 1, 1], [], []>} : vector<8x128xf32>, vector<128x384xf32>, vector<8x384xf32> -> vector<8x384xf32>
    %227 = vector.extract_strided_slice %225 {offsets = [0, 0], sizes = [8, 128], strides = [1, 1]} : vector<8x384xf32> to vector<8x128xf32>
    %228 = vector.extract_strided_slice %226 {offsets = [0, 0], sizes = [8, 128], strides = [1, 1]} : vector<8x384xf32> to vector<8x128xf32>
    %229 = arith.addf %227, %228 : vector<8x128xf32>
    %230 = arith.negf %229 : vector<8x128xf32>
    %231 = math.exp %230 : vector<8x128xf32>
    %cst_69 = arith.constant 1.000000e+00 : f32
    %232 = vector.broadcast %cst_69 : f32 to vector<8x128xf32>
    %233 = arith.addf %232, %231 : vector<8x128xf32>
    %234 = arith.divf %232, %233 : vector<8x128xf32>
    %235 = vector.extract_strided_slice %225 {offsets = [0, 128], sizes = [8, 128], strides = [1, 1]} : vector<8x384xf32> to vector<8x128xf32>
    %236 = vector.extract_strided_slice %226 {offsets = [0, 128], sizes = [8, 128], strides = [1, 1]} : vector<8x384xf32> to vector<8x128xf32>
    %237 = arith.addf %235, %236 : vector<8x128xf32>
    %238 = arith.negf %237 : vector<8x128xf32>
    %239 = math.exp %238 : vector<8x128xf32>
    %cst_70 = arith.constant 1.000000e+00 : f32
    %240 = vector.broadcast %cst_70 : f32 to vector<8x128xf32>
    %241 = arith.addf %240, %239 : vector<8x128xf32>
    %242 = arith.divf %240, %241 : vector<8x128xf32>
    %243 = vector.extract_strided_slice %225 {offsets = [0, 256], sizes = [8, 128], strides = [1, 1]} : vector<8x384xf32> to vector<8x128xf32>
    %244 = vector.extract_strided_slice %226 {offsets = [0, 256], sizes = [8, 128], strides = [1, 1]} : vector<8x384xf32> to vector<8x128xf32>
    %245 = vector.broadcast %14 : vector<1x128xf32> to vector<8x128xf32>
    %246 = arith.addf %244, %245 : vector<8x128xf32>
    %247 = arith.mulf %234, %246 : vector<8x128xf32>
    %248 = arith.addf %243, %247 : vector<8x128xf32>
    %249 = math.tanh %248 : vector<8x128xf32>
    %cst_71 = arith.constant 1.000000e+00 : f32
    %250 = vector.broadcast %cst_71 : f32 to vector<8x128xf32>
    %251 = arith.subf %250, %242 : vector<8x128xf32>
    %252 = arith.mulf %251, %249 : vector<8x128xf32>
    %253 = arith.mulf %242, %187 : vector<8x128xf32>
    %254 = arith.addf %252, %253 : vector<8x128xf32>
    %255 = vector.extract_strided_slice %224 {offsets = [0, 384], sizes = [8, 384], strides = [1, 1]} : vector<8x768xf32> to vector<8x384xf32>
    %cst_72 = arith.constant dense<0.000000e+00> : vector<8x384xf32>
    %256 = tpu.matmul %217, %13, %cst_72 {dimension_numbers = #tpu.dot_dimension_numbers<[1], [0], [0], [1], [0, 0, 1, 1], [], []>} : vector<8x128xf32>, vector<128x384xf32>, vector<8x384xf32> -> vector<8x384xf32>
    %257 = vector.extract_strided_slice %255 {offsets = [0, 0], sizes = [8, 128], strides = [1, 1]} : vector<8x384xf32> to vector<8x128xf32>
    %258 = vector.extract_strided_slice %256 {offsets = [0, 0], sizes = [8, 128], strides = [1, 1]} : vector<8x384xf32> to vector<8x128xf32>
    %259 = arith.addf %257, %258 : vector<8x128xf32>
    %260 = arith.negf %259 : vector<8x128xf32>
    %261 = math.exp %260 : vector<8x128xf32>
    %cst_73 = arith.constant 1.000000e+00 : f32
    %262 = vector.broadcast %cst_73 : f32 to vector<8x128xf32>
    %263 = arith.addf %262, %261 : vector<8x128xf32>
    %264 = arith.divf %262, %263 : vector<8x128xf32>
    %265 = vector.extract_strided_slice %255 {offsets = [0, 128], sizes = [8, 128], strides = [1, 1]} : vector<8x384xf32> to vector<8x128xf32>
    %266 = vector.extract_strided_slice %256 {offsets = [0, 128], sizes = [8, 128], strides = [1, 1]} : vector<8x384xf32> to vector<8x128xf32>
    %267 = arith.addf %265, %266 : vector<8x128xf32>
    %268 = arith.negf %267 : vector<8x128xf32>
    %269 = math.exp %268 : vector<8x128xf32>
    %cst_74 = arith.constant 1.000000e+00 : f32
    %270 = vector.broadcast %cst_74 : f32 to vector<8x128xf32>
    %271 = arith.addf %270, %269 : vector<8x128xf32>
    %272 = arith.divf %270, %271 : vector<8x128xf32>
    %273 = vector.extract_strided_slice %255 {offsets = [0, 256], sizes = [8, 128], strides = [1, 1]} : vector<8x384xf32> to vector<8x128xf32>
    %274 = vector.extract_strided_slice %256 {offsets = [0, 256], sizes = [8, 128], strides = [1, 1]} : vector<8x384xf32> to vector<8x128xf32>
    %275 = vector.broadcast %15 : vector<1x128xf32> to vector<8x128xf32>
    %276 = arith.addf %274, %275 : vector<8x128xf32>
    %277 = arith.mulf %264, %276 : vector<8x128xf32>
    %278 = arith.addf %273, %277 : vector<8x128xf32>
    %279 = math.tanh %278 : vector<8x128xf32>
    %cst_75 = arith.constant 1.000000e+00 : f32
    %280 = vector.broadcast %cst_75 : f32 to vector<8x128xf32>
    %281 = arith.subf %280, %272 : vector<8x128xf32>
    %282 = arith.mulf %281, %279 : vector<8x128xf32>
    %283 = arith.mulf %272, %217 : vector<8x128xf32>
    %284 = arith.addf %282, %283 : vector<8x128xf32>
    %c4_i32 = arith.constant 4 : i32
    %285 = arith.index_cast %c4_i32 : i32 to index
    %c0_76 = arith.constant 0 : index
    %c0_77 = arith.constant 0 : index
    %286 = vector.load %arg9[%285, %c0_76, %c0_77] : memref<8x8x768xf32, #tpu.memory_space<vmem>>, vector<1x8x768xf32>
    %287 = vector.shape_cast %286 : vector<1x8x768xf32> to vector<8x768xf32>
    %c7_i32_78 = arith.constant 7 : i32
    %288 = arith.subi %c7_i32_78, %c4_i32 : i32
    %289 = arith.index_cast %288 : i32 to index
    %c0_79 = arith.constant 0 : index
    %c0_80 = arith.constant 0 : index
    %290 = vector.load %arg9[%289, %c0_79, %c0_80] : memref<8x8x768xf32, #tpu.memory_space<vmem>>, vector<1x8x768xf32>
    %291 = vector.shape_cast %290 : vector<1x8x768xf32> to vector<8x768xf32>
    %292 = vector.extract_strided_slice %287 {offsets = [0, 0], sizes = [8, 384], strides = [1, 1]} : vector<8x768xf32> to vector<8x384xf32>
    %cst_81 = arith.constant dense<0.000000e+00> : vector<8x384xf32>
    %293 = tpu.matmul %254, %12, %cst_81 {dimension_numbers = #tpu.dot_dimension_numbers<[1], [0], [0], [1], [0, 0, 1, 1], [], []>} : vector<8x128xf32>, vector<128x384xf32>, vector<8x384xf32> -> vector<8x384xf32>
    %294 = vector.extract_strided_slice %292 {offsets = [0, 0], sizes = [8, 128], strides = [1, 1]} : vector<8x384xf32> to vector<8x128xf32>
    %295 = vector.extract_strided_slice %293 {offsets = [0, 0], sizes = [8, 128], strides = [1, 1]} : vector<8x384xf32> to vector<8x128xf32>
    %296 = arith.addf %294, %295 : vector<8x128xf32>
    %297 = arith.negf %296 : vector<8x128xf32>
    %298 = math.exp %297 : vector<8x128xf32>
    %cst_82 = arith.constant 1.000000e+00 : f32
    %299 = vector.broadcast %cst_82 : f32 to vector<8x128xf32>
    %300 = arith.addf %299, %298 : vector<8x128xf32>
    %301 = arith.divf %299, %300 : vector<8x128xf32>
    %302 = vector.extract_strided_slice %292 {offsets = [0, 128], sizes = [8, 128], strides = [1, 1]} : vector<8x384xf32> to vector<8x128xf32>
    %303 = vector.extract_strided_slice %293 {offsets = [0, 128], sizes = [8, 128], strides = [1, 1]} : vector<8x384xf32> to vector<8x128xf32>
    %304 = arith.addf %302, %303 : vector<8x128xf32>
    %305 = arith.negf %304 : vector<8x128xf32>
    %306 = math.exp %305 : vector<8x128xf32>
    %cst_83 = arith.constant 1.000000e+00 : f32
    %307 = vector.broadcast %cst_83 : f32 to vector<8x128xf32>
    %308 = arith.addf %307, %306 : vector<8x128xf32>
    %309 = arith.divf %307, %308 : vector<8x128xf32>
    %310 = vector.extract_strided_slice %292 {offsets = [0, 256], sizes = [8, 128], strides = [1, 1]} : vector<8x384xf32> to vector<8x128xf32>
    %311 = vector.extract_strided_slice %293 {offsets = [0, 256], sizes = [8, 128], strides = [1, 1]} : vector<8x384xf32> to vector<8x128xf32>
    %312 = vector.broadcast %14 : vector<1x128xf32> to vector<8x128xf32>
    %313 = arith.addf %311, %312 : vector<8x128xf32>
    %314 = arith.mulf %301, %313 : vector<8x128xf32>
    %315 = arith.addf %310, %314 : vector<8x128xf32>
    %316 = math.tanh %315 : vector<8x128xf32>
    %cst_84 = arith.constant 1.000000e+00 : f32
    %317 = vector.broadcast %cst_84 : f32 to vector<8x128xf32>
    %318 = arith.subf %317, %309 : vector<8x128xf32>
    %319 = arith.mulf %318, %316 : vector<8x128xf32>
    %320 = arith.mulf %309, %254 : vector<8x128xf32>
    %321 = arith.addf %319, %320 : vector<8x128xf32>
    %322 = vector.extract_strided_slice %291 {offsets = [0, 384], sizes = [8, 384], strides = [1, 1]} : vector<8x768xf32> to vector<8x384xf32>
    %cst_85 = arith.constant dense<0.000000e+00> : vector<8x384xf32>
    %323 = tpu.matmul %284, %13, %cst_85 {dimension_numbers = #tpu.dot_dimension_numbers<[1], [0], [0], [1], [0, 0, 1, 1], [], []>} : vector<8x128xf32>, vector<128x384xf32>, vector<8x384xf32> -> vector<8x384xf32>
    %324 = vector.extract_strided_slice %322 {offsets = [0, 0], sizes = [8, 128], strides = [1, 1]} : vector<8x384xf32> to vector<8x128xf32>
    %325 = vector.extract_strided_slice %323 {offsets = [0, 0], sizes = [8, 128], strides = [1, 1]} : vector<8x384xf32> to vector<8x128xf32>
    %326 = arith.addf %324, %325 : vector<8x128xf32>
    %327 = arith.negf %326 : vector<8x128xf32>
    %328 = math.exp %327 : vector<8x128xf32>
    %cst_86 = arith.constant 1.000000e+00 : f32
    %329 = vector.broadcast %cst_86 : f32 to vector<8x128xf32>
    %330 = arith.addf %329, %328 : vector<8x128xf32>
    %331 = arith.divf %329, %330 : vector<8x128xf32>
    %332 = vector.extract_strided_slice %322 {offsets = [0, 128], sizes = [8, 128], strides = [1, 1]} : vector<8x384xf32> to vector<8x128xf32>
    %333 = vector.extract_strided_slice %323 {offsets = [0, 128], sizes = [8, 128], strides = [1, 1]} : vector<8x384xf32> to vector<8x128xf32>
    %334 = arith.addf %332, %333 : vector<8x128xf32>
    %335 = arith.negf %334 : vector<8x128xf32>
    %336 = math.exp %335 : vector<8x128xf32>
    %cst_87 = arith.constant 1.000000e+00 : f32
    %337 = vector.broadcast %cst_87 : f32 to vector<8x128xf32>
    %338 = arith.addf %337, %336 : vector<8x128xf32>
    %339 = arith.divf %337, %338 : vector<8x128xf32>
    %340 = vector.extract_strided_slice %322 {offsets = [0, 256], sizes = [8, 128], strides = [1, 1]} : vector<8x384xf32> to vector<8x128xf32>
    %341 = vector.extract_strided_slice %323 {offsets = [0, 256], sizes = [8, 128], strides = [1, 1]} : vector<8x384xf32> to vector<8x128xf32>
    %342 = vector.broadcast %15 : vector<1x128xf32> to vector<8x128xf32>
    %343 = arith.addf %341, %342 : vector<8x128xf32>
    %344 = arith.mulf %331, %343 : vector<8x128xf32>
    %345 = arith.addf %340, %344 : vector<8x128xf32>
    %346 = math.tanh %345 : vector<8x128xf32>
    %cst_88 = arith.constant 1.000000e+00 : f32
    %347 = vector.broadcast %cst_88 : f32 to vector<8x128xf32>
    %348 = arith.subf %347, %339 : vector<8x128xf32>
    %349 = arith.mulf %348, %346 : vector<8x128xf32>
    %350 = arith.mulf %339, %284 : vector<8x128xf32>
    %351 = arith.addf %349, %350 : vector<8x128xf32>
    %c5_i32 = arith.constant 5 : i32
    %352 = arith.index_cast %c5_i32 : i32 to index
    %c0_89 = arith.constant 0 : index
    %c0_90 = arith.constant 0 : index
    %353 = vector.load %arg9[%352, %c0_89, %c0_90] : memref<8x8x768xf32, #tpu.memory_space<vmem>>, vector<1x8x768xf32>
    %354 = vector.shape_cast %353 : vector<1x8x768xf32> to vector<8x768xf32>
    %c7_i32_91 = arith.constant 7 : i32
    %355 = arith.subi %c7_i32_91, %c5_i32 : i32
    %356 = arith.index_cast %355 : i32 to index
    %c0_92 = arith.constant 0 : index
    %c0_93 = arith.constant 0 : index
    %357 = vector.load %arg9[%356, %c0_92, %c0_93] : memref<8x8x768xf32, #tpu.memory_space<vmem>>, vector<1x8x768xf32>
    %358 = vector.shape_cast %357 : vector<1x8x768xf32> to vector<8x768xf32>
    %359 = vector.extract_strided_slice %354 {offsets = [0, 0], sizes = [8, 384], strides = [1, 1]} : vector<8x768xf32> to vector<8x384xf32>
    %cst_94 = arith.constant dense<0.000000e+00> : vector<8x384xf32>
    %360 = tpu.matmul %321, %12, %cst_94 {dimension_numbers = #tpu.dot_dimension_numbers<[1], [0], [0], [1], [0, 0, 1, 1], [], []>} : vector<8x128xf32>, vector<128x384xf32>, vector<8x384xf32> -> vector<8x384xf32>
    %361 = vector.extract_strided_slice %359 {offsets = [0, 0], sizes = [8, 128], strides = [1, 1]} : vector<8x384xf32> to vector<8x128xf32>
    %362 = vector.extract_strided_slice %360 {offsets = [0, 0], sizes = [8, 128], strides = [1, 1]} : vector<8x384xf32> to vector<8x128xf32>
    %363 = arith.addf %361, %362 : vector<8x128xf32>
    %364 = arith.negf %363 : vector<8x128xf32>
    %365 = math.exp %364 : vector<8x128xf32>
    %cst_95 = arith.constant 1.000000e+00 : f32
    %366 = vector.broadcast %cst_95 : f32 to vector<8x128xf32>
    %367 = arith.addf %366, %365 : vector<8x128xf32>
    %368 = arith.divf %366, %367 : vector<8x128xf32>
    %369 = vector.extract_strided_slice %359 {offsets = [0, 128], sizes = [8, 128], strides = [1, 1]} : vector<8x384xf32> to vector<8x128xf32>
    %370 = vector.extract_strided_slice %360 {offsets = [0, 128], sizes = [8, 128], strides = [1, 1]} : vector<8x384xf32> to vector<8x128xf32>
    %371 = arith.addf %369, %370 : vector<8x128xf32>
    %372 = arith.negf %371 : vector<8x128xf32>
    %373 = math.exp %372 : vector<8x128xf32>
    %cst_96 = arith.constant 1.000000e+00 : f32
    %374 = vector.broadcast %cst_96 : f32 to vector<8x128xf32>
    %375 = arith.addf %374, %373 : vector<8x128xf32>
    %376 = arith.divf %374, %375 : vector<8x128xf32>
    %377 = vector.extract_strided_slice %359 {offsets = [0, 256], sizes = [8, 128], strides = [1, 1]} : vector<8x384xf32> to vector<8x128xf32>
    %378 = vector.extract_strided_slice %360 {offsets = [0, 256], sizes = [8, 128], strides = [1, 1]} : vector<8x384xf32> to vector<8x128xf32>
    %379 = vector.broadcast %14 : vector<1x128xf32> to vector<8x128xf32>
    %380 = arith.addf %378, %379 : vector<8x128xf32>
    %381 = arith.mulf %368, %380 : vector<8x128xf32>
    %382 = arith.addf %377, %381 : vector<8x128xf32>
    %383 = math.tanh %382 : vector<8x128xf32>
    %cst_97 = arith.constant 1.000000e+00 : f32
    %384 = vector.broadcast %cst_97 : f32 to vector<8x128xf32>
    %385 = arith.subf %384, %376 : vector<8x128xf32>
    %386 = arith.mulf %385, %383 : vector<8x128xf32>
    %387 = arith.mulf %376, %321 : vector<8x128xf32>
    %388 = arith.addf %386, %387 : vector<8x128xf32>
    %389 = vector.extract_strided_slice %358 {offsets = [0, 384], sizes = [8, 384], strides = [1, 1]} : vector<8x768xf32> to vector<8x384xf32>
    %cst_98 = arith.constant dense<0.000000e+00> : vector<8x384xf32>
    %390 = tpu.matmul %351, %13, %cst_98 {dimension_numbers = #tpu.dot_dimension_numbers<[1], [0], [0], [1], [0, 0, 1, 1], [], []>} : vector<8x128xf32>, vector<128x384xf32>, vector<8x384xf32> -> vector<8x384xf32>
    %391 = vector.extract_strided_slice %389 {offsets = [0, 0], sizes = [8, 128], strides = [1, 1]} : vector<8x384xf32> to vector<8x128xf32>
    %392 = vector.extract_strided_slice %390 {offsets = [0, 0], sizes = [8, 128], strides = [1, 1]} : vector<8x384xf32> to vector<8x128xf32>
    %393 = arith.addf %391, %392 : vector<8x128xf32>
    %394 = arith.negf %393 : vector<8x128xf32>
    %395 = math.exp %394 : vector<8x128xf32>
    %cst_99 = arith.constant 1.000000e+00 : f32
    %396 = vector.broadcast %cst_99 : f32 to vector<8x128xf32>
    %397 = arith.addf %396, %395 : vector<8x128xf32>
    %398 = arith.divf %396, %397 : vector<8x128xf32>
    %399 = vector.extract_strided_slice %389 {offsets = [0, 128], sizes = [8, 128], strides = [1, 1]} : vector<8x384xf32> to vector<8x128xf32>
    %400 = vector.extract_strided_slice %390 {offsets = [0, 128], sizes = [8, 128], strides = [1, 1]} : vector<8x384xf32> to vector<8x128xf32>
    %401 = arith.addf %399, %400 : vector<8x128xf32>
    %402 = arith.negf %401 : vector<8x128xf32>
    %403 = math.exp %402 : vector<8x128xf32>
    %cst_100 = arith.constant 1.000000e+00 : f32
    %404 = vector.broadcast %cst_100 : f32 to vector<8x128xf32>
    %405 = arith.addf %404, %403 : vector<8x128xf32>
    %406 = arith.divf %404, %405 : vector<8x128xf32>
    %407 = vector.extract_strided_slice %389 {offsets = [0, 256], sizes = [8, 128], strides = [1, 1]} : vector<8x384xf32> to vector<8x128xf32>
    %408 = vector.extract_strided_slice %390 {offsets = [0, 256], sizes = [8, 128], strides = [1, 1]} : vector<8x384xf32> to vector<8x128xf32>
    %409 = vector.broadcast %15 : vector<1x128xf32> to vector<8x128xf32>
    %410 = arith.addf %408, %409 : vector<8x128xf32>
    %411 = arith.mulf %398, %410 : vector<8x128xf32>
    %412 = arith.addf %407, %411 : vector<8x128xf32>
    %413 = math.tanh %412 : vector<8x128xf32>
    %cst_101 = arith.constant 1.000000e+00 : f32
    %414 = vector.broadcast %cst_101 : f32 to vector<8x128xf32>
    %415 = arith.subf %414, %406 : vector<8x128xf32>
    %416 = arith.mulf %415, %413 : vector<8x128xf32>
    %417 = arith.mulf %406, %351 : vector<8x128xf32>
    %418 = arith.addf %416, %417 : vector<8x128xf32>
    %c6_i32 = arith.constant 6 : i32
    %419 = arith.index_cast %c6_i32 : i32 to index
    %c0_102 = arith.constant 0 : index
    %c0_103 = arith.constant 0 : index
    %420 = vector.load %arg9[%419, %c0_102, %c0_103] : memref<8x8x768xf32, #tpu.memory_space<vmem>>, vector<1x8x768xf32>
    %421 = vector.shape_cast %420 : vector<1x8x768xf32> to vector<8x768xf32>
    %c7_i32_104 = arith.constant 7 : i32
    %422 = arith.subi %c7_i32_104, %c6_i32 : i32
    %423 = arith.index_cast %422 : i32 to index
    %c0_105 = arith.constant 0 : index
    %c0_106 = arith.constant 0 : index
    %424 = vector.load %arg9[%423, %c0_105, %c0_106] : memref<8x8x768xf32, #tpu.memory_space<vmem>>, vector<1x8x768xf32>
    %425 = vector.shape_cast %424 : vector<1x8x768xf32> to vector<8x768xf32>
    %426 = vector.extract_strided_slice %421 {offsets = [0, 0], sizes = [8, 384], strides = [1, 1]} : vector<8x768xf32> to vector<8x384xf32>
    %cst_107 = arith.constant dense<0.000000e+00> : vector<8x384xf32>
    %427 = tpu.matmul %388, %12, %cst_107 {dimension_numbers = #tpu.dot_dimension_numbers<[1], [0], [0], [1], [0, 0, 1, 1], [], []>} : vector<8x128xf32>, vector<128x384xf32>, vector<8x384xf32> -> vector<8x384xf32>
    %428 = vector.extract_strided_slice %426 {offsets = [0, 0], sizes = [8, 128], strides = [1, 1]} : vector<8x384xf32> to vector<8x128xf32>
    %429 = vector.extract_strided_slice %427 {offsets = [0, 0], sizes = [8, 128], strides = [1, 1]} : vector<8x384xf32> to vector<8x128xf32>
    %430 = arith.addf %428, %429 : vector<8x128xf32>
    %431 = arith.negf %430 : vector<8x128xf32>
    %432 = math.exp %431 : vector<8x128xf32>
    %cst_108 = arith.constant 1.000000e+00 : f32
    %433 = vector.broadcast %cst_108 : f32 to vector<8x128xf32>
    %434 = arith.addf %433, %432 : vector<8x128xf32>
    %435 = arith.divf %433, %434 : vector<8x128xf32>
    %436 = vector.extract_strided_slice %426 {offsets = [0, 128], sizes = [8, 128], strides = [1, 1]} : vector<8x384xf32> to vector<8x128xf32>
    %437 = vector.extract_strided_slice %427 {offsets = [0, 128], sizes = [8, 128], strides = [1, 1]} : vector<8x384xf32> to vector<8x128xf32>
    %438 = arith.addf %436, %437 : vector<8x128xf32>
    %439 = arith.negf %438 : vector<8x128xf32>
    %440 = math.exp %439 : vector<8x128xf32>
    %cst_109 = arith.constant 1.000000e+00 : f32
    %441 = vector.broadcast %cst_109 : f32 to vector<8x128xf32>
    %442 = arith.addf %441, %440 : vector<8x128xf32>
    %443 = arith.divf %441, %442 : vector<8x128xf32>
    %444 = vector.extract_strided_slice %426 {offsets = [0, 256], sizes = [8, 128], strides = [1, 1]} : vector<8x384xf32> to vector<8x128xf32>
    %445 = vector.extract_strided_slice %427 {offsets = [0, 256], sizes = [8, 128], strides = [1, 1]} : vector<8x384xf32> to vector<8x128xf32>
    %446 = vector.broadcast %14 : vector<1x128xf32> to vector<8x128xf32>
    %447 = arith.addf %445, %446 : vector<8x128xf32>
    %448 = arith.mulf %435, %447 : vector<8x128xf32>
    %449 = arith.addf %444, %448 : vector<8x128xf32>
    %450 = math.tanh %449 : vector<8x128xf32>
    %cst_110 = arith.constant 1.000000e+00 : f32
    %451 = vector.broadcast %cst_110 : f32 to vector<8x128xf32>
    %452 = arith.subf %451, %443 : vector<8x128xf32>
    %453 = arith.mulf %452, %450 : vector<8x128xf32>
    %454 = arith.mulf %443, %388 : vector<8x128xf32>
    %455 = arith.addf %453, %454 : vector<8x128xf32>
    %456 = vector.extract_strided_slice %425 {offsets = [0, 384], sizes = [8, 384], strides = [1, 1]} : vector<8x768xf32> to vector<8x384xf32>
    %cst_111 = arith.constant dense<0.000000e+00> : vector<8x384xf32>
    %457 = tpu.matmul %418, %13, %cst_111 {dimension_numbers = #tpu.dot_dimension_numbers<[1], [0], [0], [1], [0, 0, 1, 1], [], []>} : vector<8x128xf32>, vector<128x384xf32>, vector<8x384xf32> -> vector<8x384xf32>
    %458 = vector.extract_strided_slice %456 {offsets = [0, 0], sizes = [8, 128], strides = [1, 1]} : vector<8x384xf32> to vector<8x128xf32>
    %459 = vector.extract_strided_slice %457 {offsets = [0, 0], sizes = [8, 128], strides = [1, 1]} : vector<8x384xf32> to vector<8x128xf32>
    %460 = arith.addf %458, %459 : vector<8x128xf32>
    %461 = arith.negf %460 : vector<8x128xf32>
    %462 = math.exp %461 : vector<8x128xf32>
    %cst_112 = arith.constant 1.000000e+00 : f32
    %463 = vector.broadcast %cst_112 : f32 to vector<8x128xf32>
    %464 = arith.addf %463, %462 : vector<8x128xf32>
    %465 = arith.divf %463, %464 : vector<8x128xf32>
    %466 = vector.extract_strided_slice %456 {offsets = [0, 128], sizes = [8, 128], strides = [1, 1]} : vector<8x384xf32> to vector<8x128xf32>
    %467 = vector.extract_strided_slice %457 {offsets = [0, 128], sizes = [8, 128], strides = [1, 1]} : vector<8x384xf32> to vector<8x128xf32>
    %468 = arith.addf %466, %467 : vector<8x128xf32>
    %469 = arith.negf %468 : vector<8x128xf32>
    %470 = math.exp %469 : vector<8x128xf32>
    %cst_113 = arith.constant 1.000000e+00 : f32
    %471 = vector.broadcast %cst_113 : f32 to vector<8x128xf32>
    %472 = arith.addf %471, %470 : vector<8x128xf32>
    %473 = arith.divf %471, %472 : vector<8x128xf32>
    %474 = vector.extract_strided_slice %456 {offsets = [0, 256], sizes = [8, 128], strides = [1, 1]} : vector<8x384xf32> to vector<8x128xf32>
    %475 = vector.extract_strided_slice %457 {offsets = [0, 256], sizes = [8, 128], strides = [1, 1]} : vector<8x384xf32> to vector<8x128xf32>
    %476 = vector.broadcast %15 : vector<1x128xf32> to vector<8x128xf32>
    %477 = arith.addf %475, %476 : vector<8x128xf32>
    %478 = arith.mulf %465, %477 : vector<8x128xf32>
    %479 = arith.addf %474, %478 : vector<8x128xf32>
    %480 = math.tanh %479 : vector<8x128xf32>
    %cst_114 = arith.constant 1.000000e+00 : f32
    %481 = vector.broadcast %cst_114 : f32 to vector<8x128xf32>
    %482 = arith.subf %481, %473 : vector<8x128xf32>
    %483 = arith.mulf %482, %480 : vector<8x128xf32>
    %484 = arith.mulf %473, %418 : vector<8x128xf32>
    %485 = arith.addf %483, %484 : vector<8x128xf32>
    %c7_i32_115 = arith.constant 7 : i32
    %486 = arith.index_cast %c7_i32_115 : i32 to index
    %c0_116 = arith.constant 0 : index
    %c0_117 = arith.constant 0 : index
    %487 = vector.load %arg9[%486, %c0_116, %c0_117] : memref<8x8x768xf32, #tpu.memory_space<vmem>>, vector<1x8x768xf32>
    %488 = vector.shape_cast %487 : vector<1x8x768xf32> to vector<8x768xf32>
    %c7_i32_118 = arith.constant 7 : i32
    %489 = arith.subi %c7_i32_118, %c7_i32_115 : i32
    %490 = arith.index_cast %489 : i32 to index
    %c0_119 = arith.constant 0 : index
    %c0_120 = arith.constant 0 : index
    %491 = vector.load %arg9[%490, %c0_119, %c0_120] : memref<8x8x768xf32, #tpu.memory_space<vmem>>, vector<1x8x768xf32>
    %492 = vector.shape_cast %491 : vector<1x8x768xf32> to vector<8x768xf32>
    %493 = vector.extract_strided_slice %488 {offsets = [0, 0], sizes = [8, 384], strides = [1, 1]} : vector<8x768xf32> to vector<8x384xf32>
    %cst_121 = arith.constant dense<0.000000e+00> : vector<8x384xf32>
    %494 = tpu.matmul %455, %12, %cst_121 {dimension_numbers = #tpu.dot_dimension_numbers<[1], [0], [0], [1], [0, 0, 1, 1], [], []>} : vector<8x128xf32>, vector<128x384xf32>, vector<8x384xf32> -> vector<8x384xf32>
    %495 = vector.extract_strided_slice %493 {offsets = [0, 0], sizes = [8, 128], strides = [1, 1]} : vector<8x384xf32> to vector<8x128xf32>
    %496 = vector.extract_strided_slice %494 {offsets = [0, 0], sizes = [8, 128], strides = [1, 1]} : vector<8x384xf32> to vector<8x128xf32>
    %497 = arith.addf %495, %496 : vector<8x128xf32>
    %498 = arith.negf %497 : vector<8x128xf32>
    %499 = math.exp %498 : vector<8x128xf32>
    %cst_122 = arith.constant 1.000000e+00 : f32
    %500 = vector.broadcast %cst_122 : f32 to vector<8x128xf32>
    %501 = arith.addf %500, %499 : vector<8x128xf32>
    %502 = arith.divf %500, %501 : vector<8x128xf32>
    %503 = vector.extract_strided_slice %493 {offsets = [0, 128], sizes = [8, 128], strides = [1, 1]} : vector<8x384xf32> to vector<8x128xf32>
    %504 = vector.extract_strided_slice %494 {offsets = [0, 128], sizes = [8, 128], strides = [1, 1]} : vector<8x384xf32> to vector<8x128xf32>
    %505 = arith.addf %503, %504 : vector<8x128xf32>
    %506 = arith.negf %505 : vector<8x128xf32>
    %507 = math.exp %506 : vector<8x128xf32>
    %cst_123 = arith.constant 1.000000e+00 : f32
    %508 = vector.broadcast %cst_123 : f32 to vector<8x128xf32>
    %509 = arith.addf %508, %507 : vector<8x128xf32>
    %510 = arith.divf %508, %509 : vector<8x128xf32>
    %511 = vector.extract_strided_slice %493 {offsets = [0, 256], sizes = [8, 128], strides = [1, 1]} : vector<8x384xf32> to vector<8x128xf32>
    %512 = vector.extract_strided_slice %494 {offsets = [0, 256], sizes = [8, 128], strides = [1, 1]} : vector<8x384xf32> to vector<8x128xf32>
    %513 = vector.broadcast %14 : vector<1x128xf32> to vector<8x128xf32>
    %514 = arith.addf %512, %513 : vector<8x128xf32>
    %515 = arith.mulf %502, %514 : vector<8x128xf32>
    %516 = arith.addf %511, %515 : vector<8x128xf32>
    %517 = math.tanh %516 : vector<8x128xf32>
    %cst_124 = arith.constant 1.000000e+00 : f32
    %518 = vector.broadcast %cst_124 : f32 to vector<8x128xf32>
    %519 = arith.subf %518, %510 : vector<8x128xf32>
    %520 = arith.mulf %519, %517 : vector<8x128xf32>
    %521 = arith.mulf %510, %455 : vector<8x128xf32>
    %522 = arith.addf %520, %521 : vector<8x128xf32>
    %523 = vector.extract_strided_slice %492 {offsets = [0, 384], sizes = [8, 384], strides = [1, 1]} : vector<8x768xf32> to vector<8x384xf32>
    %cst_125 = arith.constant dense<0.000000e+00> : vector<8x384xf32>
    %524 = tpu.matmul %485, %13, %cst_125 {dimension_numbers = #tpu.dot_dimension_numbers<[1], [0], [0], [1], [0, 0, 1, 1], [], []>} : vector<8x128xf32>, vector<128x384xf32>, vector<8x384xf32> -> vector<8x384xf32>
    %525 = vector.extract_strided_slice %523 {offsets = [0, 0], sizes = [8, 128], strides = [1, 1]} : vector<8x384xf32> to vector<8x128xf32>
    %526 = vector.extract_strided_slice %524 {offsets = [0, 0], sizes = [8, 128], strides = [1, 1]} : vector<8x384xf32> to vector<8x128xf32>
    %527 = arith.addf %525, %526 : vector<8x128xf32>
    %528 = arith.negf %527 : vector<8x128xf32>
    %529 = math.exp %528 : vector<8x128xf32>
    %cst_126 = arith.constant 1.000000e+00 : f32
    %530 = vector.broadcast %cst_126 : f32 to vector<8x128xf32>
    %531 = arith.addf %530, %529 : vector<8x128xf32>
    %532 = arith.divf %530, %531 : vector<8x128xf32>
    %533 = vector.extract_strided_slice %523 {offsets = [0, 128], sizes = [8, 128], strides = [1, 1]} : vector<8x384xf32> to vector<8x128xf32>
    %534 = vector.extract_strided_slice %524 {offsets = [0, 128], sizes = [8, 128], strides = [1, 1]} : vector<8x384xf32> to vector<8x128xf32>
    %535 = arith.addf %533, %534 : vector<8x128xf32>
    %536 = arith.negf %535 : vector<8x128xf32>
    %537 = math.exp %536 : vector<8x128xf32>
    %cst_127 = arith.constant 1.000000e+00 : f32
    %538 = vector.broadcast %cst_127 : f32 to vector<8x128xf32>
    %539 = arith.addf %538, %537 : vector<8x128xf32>
    %540 = arith.divf %538, %539 : vector<8x128xf32>
    %541 = vector.extract_strided_slice %523 {offsets = [0, 256], sizes = [8, 128], strides = [1, 1]} : vector<8x384xf32> to vector<8x128xf32>
    %542 = vector.extract_strided_slice %524 {offsets = [0, 256], sizes = [8, 128], strides = [1, 1]} : vector<8x384xf32> to vector<8x128xf32>
    %543 = vector.broadcast %15 : vector<1x128xf32> to vector<8x128xf32>
    %544 = arith.addf %542, %543 : vector<8x128xf32>
    %545 = arith.mulf %532, %544 : vector<8x128xf32>
    %546 = arith.addf %541, %545 : vector<8x128xf32>
    %547 = math.tanh %546 : vector<8x128xf32>
    %cst_128 = arith.constant 1.000000e+00 : f32
    %548 = vector.broadcast %cst_128 : f32 to vector<8x128xf32>
    %549 = arith.subf %548, %540 : vector<8x128xf32>
    %550 = arith.mulf %549, %547 : vector<8x128xf32>
    %551 = arith.mulf %540, %485 : vector<8x128xf32>
    %552 = arith.addf %550, %551 : vector<8x128xf32>
    %c8_i32 = arith.constant 8 : i32
    %c0_129 = arith.constant 0 : index
    %c0_130 = arith.constant 0 : index
    %553 = vector.load %arg7[%c0_129, %c0_130] : memref<8x256xf32, #tpu.memory_space<vmem>>, vector<8x128xf32>
    tpu.vector_store %arg7[%c0_129, %c0_130], %522 {strides = array<i32>} : memref<8x256xf32, #tpu.memory_space<vmem>>, vector<8x128xf32>,
    %c0_131 = arith.constant 0 : index
    %c128_132 = arith.constant 128 : index
    %554 = vector.load %arg7[%c0_131, %c128_132] : memref<8x256xf32, #tpu.memory_space<vmem>>, vector<8x128xf32>
    tpu.vector_store %arg7[%c0_131, %c128_132], %552 {strides = array<i32>} : memref<8x256xf32, #tpu.memory_space<vmem>>, vector<8x128xf32>,
    return
  }
}

</mosaic_0001>

<bundles_post_ra>
// kernel: tpu_custom_call.1
= control target key start
LH: loop header
LB: loop body
LE: loop exit
PB: predicated region body
PF: predicated region fallthrough
CT: control target
= control target key end

     0   :  { %12 = vsyncpa [#allocation8], 0  ;;  %s7067_s0 = inlined_call_operand.hbm [shape: s32[16], index: 0, kind: input, shape index: {}]   ;;  %s7068_s1 = inlined_call_operand.vmem [shape: s32[16], index: 1, kind: input, shape index: {}]   ;;  %s7069_s2 = inlined_call_operand.hbm [shape: f32[16,16], index: 2, kind: input, shape index: {}]   ;;  %s7070_s3 = inlined_call_operand.hbm [shape: f32[16,768], index: 3, kind: input, shape index: {}]   ;;  %s7071_s4 = inlined_call_operand.hbm [shape: f32[128,768], index: 4, kind: input, shape index: {}]   ;;  %s7072_s5 = inlined_call_operand.vmem [shape: f32[1,768], index: 5, kind: input, shape index: {}]   ;;  %s7073_s6 = inlined_call_operand.vmem [shape: f32[1,256], index: 6, kind: input, shape index: {}]   ;;  %s7074_s7 = inlined_call_operand.hbm [shape: f32[8,256], index: 7, kind: output, shape index: {}]  }
   0x1   :  { %13 = vsyncpa [#allocation9], 0 }
   0x2   :  { %14 = vsyncpa [#allocation6], 0 }
   0x3   :  { %15 = vsyncpa [#allocation13], 0 }
   0x4   :  { %16 = vsyncpa [#allocation7], 0  ;;  %s31_s26 = sshll.u32 %s7068_s1, 4  ;;  %s4922_s27 = smov [#allocation5]   ;;  %s32_s26 = int_to_ptr.vmem [resolvable:$true] %s31_s26 }
   0x5   :  { %24 = dma.hbm_to_smem %s7067_s0, 16, %s4922_s27, [#allocation8]  }
   0x6   :  { %s4800_s30 = scalar_lea.vmem %s32_s26, 16  ;;  %p4805_p1 = scmp.lt.s32.totalorder %s32_s26, %s32_s26 }
   0x7   :  { %p4801_p0 = scmp.ne.s32.totalorder %s32_s26, %s4800_s30  ;;  %p4806_p2 = scmp.lt.s32.totalorder %s4800_s30, %s4800_s30 }
   0x9   :  { %p4807_p3 = por %p4806_p2, %p4805_p1 }
   0xb   :  { %p4808_p4 = pnand %p4807_p3, %p4801_p0 }
   0xd   :  { %4811 = shalt.err (!%p4808_p4)
}
   0xe   :  { %s4923_s8 = smov [#allocation10]   ;;  %s4924_s9 = smov [#allocation11]  }
   0xf   :  { %34 = dma.vmem_to_smem %s32_s26, 16, %s4923_s8, [#allocation9]  }
  0x10   :  { %s40_s10 = sshll.u32 %s4924_s9, 4  ;;  %s41_s10 = int_to_ptr.vmem [resolvable:$true] %s40_s10 }
  0x11   :  { %s4820_s11 = scalar_lea.vmem %s41_s10, 1536  ;;  %p4825_p6 = scmp.lt.s32.totalorder %s41_s10, %s41_s10 }
  0x12   :  { %p4821_p5 = scmp.ne.s32.totalorder %s41_s10, %s4820_s11  ;;  %p4826_p7 = scmp.lt.s32.totalorder %s4820_s11, %s4820_s11 }
  0x14   :  { %p4827_p8 = por %p4826_p7, %p4825_p6 }
  0x16   :  { %p4828_p9 = pnand %p4827_p8, %p4821_p5 }
  0x18   :  { %4831 = shalt.err (!%p4828_p9)
}
  0x19   :  { %s4925_s0 = smov 768   ;;  %s4926_s1 = smov 48  }
  0x1a   :  { %46 = dma.hbm_to_vmem [thread:$0]  %s7070_s3, 1536, %s41_s10, [#allocation6], %s4925_s0, %s4925_s0, %s4926_s1  }
  0x1b   :  { %s4927_s14 = smov [#allocation12]  }
  0x1c   :  { %s52_s15 = sshll.u32 %s4927_s14, 4  ;;  %s53_s15 = int_to_ptr.vmem [resolvable:$true] %s52_s15 }
  0x1d   :  { %s4840_s16 = scalar_lea.vmem %s53_s15, 12288  ;;  %p4845_p11 = scmp.lt.s32.totalorder %s53_s15, %s53_s15 }
  0x1e   :  { %p4841_p10 = scmp.ne.s32.totalorder %s53_s15, %s4840_s16  ;;  %p4846_p12 = scmp.lt.s32.totalorder %s4840_s16, %s4840_s16 }
  0x20   :  { %p4847_p13 = por %p4846_p12, %p4845_p11 }
  0x22   :  { %p4848_p0 = pnand %p4847_p13, %p4841_p10 }
  0x24   :  { %4851 = shalt.err (!%p4848_p0)
}
  0x25   :  { %58 = dma.hbm_to_vmem [thread:$0]  %s7071_s4, 12288, %s53_s15, [#allocation13], %s4925_s0, %s4925_s0, %s4926_s1  }
  0x26   :  { %4902 = dma.done.wait [#allocation8], 16  }
  0x27   :  { %4903 = vsyncadd [#allocation8], 4294967280 }
  0x28   :  { %4904 = dma.done.wait [#allocation9], 16  }
  0x29   :  { %4905 = vsyncadd [#allocation9], 4294967280 }
  0x2a   :  { %4906 = dma.done.wait [#allocation6], 1536  }
  0x2b   :  { %4907 = vsyncadd [#allocation6], 4294965760 }
  0x2c   :  { %4908 = dma.done.wait [#allocation13], 12288  }
  0x2d   :  { %4909 = vsyncadd [#allocation13], 4294955008 }
  0x2e   :  { %75 = sfence }
  0x2f   :  { %vm76_vm0 = vcmask 130048   ;;  %v7097_v0 = vmov 0.0   ;;  %s5000_s3 = smov 0  }
  0x30   :  { %77 = vst.msk [vmem:[#allocation2] sm:$0xff] %vm76_vm0, %v7097_v0  ;;  %78 = vst.msk [vmem:[#allocation2 + $0x8] sm:$0xff] %vm76_vm0, %v7097_v0 }
  0x31   :  { %79 = vst.msk [vmem:[#allocation2 + $0x10] sm:$0xff] %vm76_vm0, %v7097_v0  ;;  %80 = vst.msk [vmem:[#allocation2 + $0x18] sm:$0xff] %vm76_vm0, %v7097_v0 }
  0x32   :  { %81 = vst.msk [vmem:[#allocation2 + $0x20] sm:$0xff] %vm76_vm0, %v7097_v0  ;;  %82 = vst.msk [vmem:[#allocation2 + $0x28] sm:$0xff] %vm76_vm0, %v7097_v0 }
  0x33   :  { %83 = vst.msk [vmem:[#allocation2 + $0x30] sm:$0xff] %vm76_vm0, %v7097_v0  ;;  %84 = vst.msk [vmem:[#allocation2 + $0x38] sm:$0xff] %vm76_vm0, %v7097_v0 }
  0x34 LB: > { %s91_s4 = sld [smem:[#allocation5 + %s4916_s3]]  ;;  %s96_s26 = scalar_lea.sflag [#allocation4], %s4916_s3  ;;  %s4916_s3 = sphi %s5000_s3, %s90_s3  }
  0x35   : > { %s92_s19 = sld [smem:[#allocation10 + %s4916_s3]]  ;;  %s4854_s30 = scalar_lea.hbm %s7069_s2, 256 }
  0x3a   : > { %s3500_s20 = sshll.u32 %s91_s4, 4 }
  0x3b   : > { %s94_s23 = scalar_lea.hbm %s7069_s2, %s3500_s20  ;;  %s95_s24 = scalar_lea.vmem [#allocation2], %s92_s19 }
  0x3c   : > { %s104_s25 = sshll.u32 %s95_s24, 4  ;;  %s4852_s27 = scalar_lea.hbm %s94_s23, 16  ;;  %s105_s25 = int_to_ptr.vmem [resolvable:$true] %s104_s25 }
  0x3d   : > { %p4853_p1 = scmp.ne.s32.totalorder %s94_s23, %s4852_s27  ;;  %p4855_p2 = scmp.lt.s32.totalorder %s94_s23, %s7069_s2 }
  0x3e   : > { %p4856_p3 = scmp.lt.s32.totalorder %s4854_s30, %s4852_s27 }
  0x40   : > { %p4857_p4 = por %p4856_p3, %p4855_p2 }
  0x42   : > { %p4858_p5 = pnand %p4857_p4, %p4853_p1 }
  0x44   : > { %4861 = shalt.err (!%p4858_p5)  }
  0x45   : > { %s4862_s10 = scalar_lea.vmem %s105_s25, 16  ;;  %s4929_s11 = smov [#allocation2]  }
  0x46   : > { %p4863_p6 = scmp.ne.s32.totalorder %s105_s25, %s4862_s10  ;;  %s4864_s0 = sshll.u32 %s4929_s11, 4  ;;  %s4865_s0 = int_to_ptr.vmem [resolvable:$false] %s4864_s0 }
  0x47   : > { %s4866_s1 = scalar_lea.vmem %s4865_s0, 1024  ;;  %p4867_p7 = scmp.lt.s32.totalorder %s105_s25, %s4865_s0 }
  0x48   : > { %p4868_p8 = scmp.lt.s32.totalorder %s4866_s1, %s4862_s10 }
  0x4a   : > { %p4869_p9 = por %p4868_p8, %p4867_p7 }
  0x4c   : > { %p4870_p10 = pnand %p4869_p9, %p4863_p6 }
  0x4e   : > { %4873 = shalt.err (!%p4870_p10)  }
  0x4f   : > { %107 = dma.hbm_to_vmem [thread:$0]  %s94_s23, 16, %s105_s25, %s96_s26 }
  0x50   : > { %s90_s3 = sadd.s32 1, %s4916_s3  }
  0x51   : > { %p87_p11 = scmp.ge.s32.totalorder %s90_s3, 16  }
  0x52   :  { %s4918_s12 = smov (%p87_p11), 0  }
  0x53   :  { %89 = sbr.rel (!%p87_p11) target bundleno = 52 (0x34), region = 104 }
  0x58 LB: > { %s115_s13 = scalar_lea.sflag [#allocation4], %s4920_s12  ;;  %s4920_s12 = sphi %s4918_s12, %s113_s12  }
  0x59   : > { %4910 = dma.done.wait %s115_s13, 16 }
  0x5a   : > { %4911 = vsyncadd %s115_s13, 4294967280  ;;  %s113_s12 = sadd.s32 1, %s4920_s12  }
  0x5b   : > { %p110_p12 = scmp.ge.s32.totalorder %s113_s12, 16  }
  0x5c   :  { %v133_v1 = vld [vmem:[#allocation11 + $0x38] sm:$0xff] (%p110_p12)  ;;  %v132_v2 = vld [vmem:[#allocation11 + $0x30] sm:$0xff] (%p110_p12)  ;;  %v127_v3 = vld [vmem:[#allocation11 + $0x8] sm:$0xff] (%p110_p12)  ;;  %282 = vmatprep.mubr.f32.mxu1 (%p110_p12), %v7097_v0  ;;  %258 = vmatprep.mubr.f32.mxu0 (%p110_p12), %v7097_v0  ;;  %vm4930_vm1 = vmmov (%p110_p12), 0  }
  0x5d   :  { %112 = sbr.rel (!%p110_p12) target bundleno = 88 (0x58), region = 115  ;;  %4407 = vmatprep.subr.mxu1 (%p110_p12), %v133_v1  ;;  %v126_v4 = vld [vmem:[#allocation11] sm:$0xff] (%p110_p12)  ;;  %222 = vmatprep.subr.mxu0 (%p110_p12), %v133_v1  ;;  %v135_v6 = vld [vmem:[#allocation11 + $0x48] sm:$0xff] (%p110_p12)  ;;  %v129_v8 = vld [vmem:[#allocation11 + $0x18] sm:$0xff] (%p110_p12) }
  0x5e   :  { %4409 = vmatpush1.msra.mxu1 (%p110_p12), %v132_v2  ;;  %v5022_v5 = vld [vmem:[#allocation2 + $0x20] sm:$0xff] (%p110_p12)  ;;  %223 = vmatpush1.msra.mxu0 (%p110_p12), %v132_v2  ;;  %v128_v9 = vld [vmem:[#allocation11 + $0x10] sm:$0xff] (%p110_p12)  ;;  %v5027_v10 = vld [vmem:[#allocation2 + $0x28] sm:$0xff] (%p110_p12) }
  0x5f   :  { %4408 = vmatprep.subr.mxu1 (%p110_p12), %v127_v3  ;;  %v134_v7 = vld [vmem:[#allocation11 + $0x40] sm:$0xff] (%p110_p12)  ;;  %224 = vmatprep.subr.mxu0 (%p110_p12), %v127_v3  ;;  %v5029_v11 = vld [vmem:[#allocation12 + $0x2d8] sm:$0xff] (%p110_p12)  ;;  %v5037_v13 = vld [vmem:[#allocation2 + $0x30] sm:$0xff] (%p110_p12) }
  0x60   :  { %4410 = vmatpush1.msra.mxu1 (%p110_p12), %v126_v4  ;;  %225 = vmatpush1.msra.mxu0 (%p110_p12), %v126_v4  ;;  %v118_v12 = vld [vmem:[#allocation2] sm:$0xff] (%p110_p12)  ;;  %v5039_v14 = vld [vmem:[#allocation2 + $0x8] sm:$0xff] (%p110_p12)  ;;  %v137_v15 = vld [vmem:[#allocation11 + $0x58] sm:$0xff] (%p110_p12) }
  0x61   :  { %3505 = vmatmul.mubr.msk.f32.vlgmr.msra.gmra.mxu1 (%p110_p12), %vm76_vm0, %v5022_v5  ;;  %335 = vmatprep.subr.mxu1 (%p110_p12), %v135_v6  ;;  %v136_v16 = vld [vmem:[#allocation11 + $0x50] sm:$0xff] (%p110_p12)  ;;  %v5047_v17 = vld [vmem:[#allocation2 + $0x38] sm:$0xff] (%p110_p12)  ;;  %v131_v19 = vld [vmem:[#allocation11 + $0x28] sm:$0xff] (%p110_p12) }
  0x62   :  { %336 = vmatpush1.msra.mxu1 %v134_v7  ;;  %288 = vmatprep.mubr.f32.mxu1 %v7097_v0  ;;  %v5049_v18 = vld [vmem:[#allocation2 + $0x10] sm:$0xff]  ;;  %v130_v20 = vld [vmem:[#allocation11 + $0x20] sm:$0xff]  ;;  %v5058_v21 = vld [vmem:[#allocation2 + $0x18] sm:$0xff] }
  0x63   :  { %337 = vmatprep.subr.mxu1 %v129_v8  ;;  %3501 = vmatmul.mubr.msk.f32.vlgmr.msra.gmra.mxu0 %vm76_vm0, %v118_v12  ;;  %v5060_v22 = vld [vmem:[#allocation12 + $0x2d0] sm:$0xff]  ;;  %v5064_v23 = vld [vmem:[#allocation12 + $0x2a8] sm:$0xff]  ;;  %v5068_v24 = vld [vmem:[#allocation12 + $0x2a0] sm:$0xff] }
  0x64   :  { %338 = vmatpush1.msra.mxu1 %v128_v9  ;;  %264 = vmatprep.mubr.f32.mxu0 %v7097_v0  ;;  %v5070_v25 = vld [vmem:[#allocation12 + $0x2e0] sm:$0xff]  ;;  %v5074_v26 = vld [vmem:[#allocation12 + $0x278] sm:$0xff]  ;;  %v5077_v27 = vld [vmem:[#allocation12 + $0x270] sm:$0xff] }
  0x65   :  { %3506 = vmatmul.mubr.msk.f32.gmra.mxu1 %vm76_vm0, %v5027_v10  ;;  %692 = vmatprep.subr.mxu1 %v5029_v11  ;;  %v5081_v28 = vld [vmem:[#allocation12 + $0x248] sm:$0xff]  ;;  %v5087_v29 = vld [vmem:[#allocation12 + $0x240] sm:$0xff]  ;;  %v5089_v30 = vld [vmem:[#allocation12 + $0x2b0] sm:$0xff] }
  0x66   :  { %294 = vmatprep.mubr.f32.mxu1 %v7097_v0  ;;  %448 = vmatprep.subr.mxu0 %v137_v15  ;;  %v5093_v31 = vld [vmem:[#allocation12 + $0x218] sm:$0xff]  ;;  %v5096_v32 = vld [vmem:[#allocation12 + $0x210] sm:$0xff]  ;;  %v5100_v33 = vld [vmem:[#allocation12 + $0x1e8] sm:$0xff] }
  0x67   :  { %3502 = vmatmul.mubr.msk.f32.gmra.mxu0 %vm76_vm0, %v5039_v14  ;;  %v5106_v34 = vld [vmem:[#allocation12 + $0x1e0] sm:$0xff]  ;;  %v5110_v35 = vld [vmem:[#allocation12 + $0x1b8] sm:$0xff]  ;;  %v5113_v36 = vld [vmem:[#allocation12 + $0x1b0] sm:$0xff] }
  0x68   :  { %270 = vmatprep.mubr.f32.mxu0 %v7097_v0  ;;  %449 = vmatpush1.msra.mxu0 %v136_v16  ;;  %v5117_v37 = vld [vmem:[#allocation12 + $0x188] sm:$0xff]  ;;  %v5123_v38 = vld [vmem:[#allocation12 + $0x180] sm:$0xff]  ;;  %v5129_v40 = vld [vmem:[#allocation12 + $0x158] sm:$0xff] }
  0x69   :  { %3507 = vmatmul.mubr.msk.f32.gmra.mxu1 %vm76_vm0, %v5037_v13  ;;  %450 = vmatprep.subr.mxu0 %v131_v19  ;;  %v5125_v39 = vld [vmem:[#allocation12 + $0x280] sm:$0xff]  ;;  %v5132_v41 = vld [vmem:[#allocation12 + $0x150] sm:$0xff]  ;;  %v5137_v42 = vld [vmem:[#allocation12 + $0x128] sm:$0xff] }
  0x6a   :  { %300 = vmatprep.mubr.f32.mxu1 %v7097_v0  ;;  %451 = vmatpush1.msra.mxu0 %v130_v20  ;;  %v5143_v43 = vld [vmem:[#allocation12 + $0x120] sm:$0xff]  ;;  %v5145_v44 = vld [vmem:[#allocation12 + $0x250] sm:$0xff]  ;;  %v5149_v45 = vld [vmem:[#allocation12 + $0xf8] sm:$0xff] }
  0x6b   :  { %3503 = vmatmul.mubr.msk.f32.gmra.mxu0 %vm76_vm0, %v5049_v18  ;;  %3847 = vmatprep.subr.mxu0 %v7097_v0  ;;  %v5152_v46 = vld [vmem:[#allocation12 + $0xf0] sm:$0xff]  ;;  %v5156_v47 = vld [vmem:[#allocation12 + $0xc8] sm:$0xff]  ;;  %v5162_v48 = vld [vmem:[#allocation12 + $0xc0] sm:$0xff] }
  0x6c   :  { %276 = vmatprep.mubr.f32.mxu0 %v7097_v0  ;;  %v5166_v49 = vld [vmem:[#allocation12 + $0x98] sm:$0xff]  ;;  %v5169_v50 = vld [vmem:[#allocation12 + $0x90] sm:$0xff]  ;;  %v5173_v51 = vld [vmem:[#allocation12 + $0x68] sm:$0xff] }
  0x6d   :  { %3508 = vmatmul.mubr.msk.f32.gmra.mxu1 %vm76_vm0, %v5047_v17  ;;  %v5179_v52 = vld [vmem:[#allocation12 + $0x60] sm:$0xff]  ;;  %v5185_v54 = vld [vmem:[#allocation12 + $0x38] sm:$0xff]  ;;  %v5188_v55 = vld [vmem:[#allocation12 + $0x30] sm:$0xff] }
  0x6e   :  { %371 = vmatprep.mubr.f32.mxu1 %v7097_v0  ;;  %v5181_v53 = vld [vmem:[#allocation12 + $0x220] sm:$0xff]  ;;  %v5193_v56 = vld [vmem:[#allocation12 + $0x8] sm:$0xff]  ;;  %v5201_v58 = vld [vmem:[#allocation12 + $0x1f0] sm:$0xff] }
  0x6f   :  { %3504 = vmatmul.mubr.msk.f32.gmra.mxu0 %vm76_vm0, %v5058_v21  ;;  %v5199_v57 = vld [vmem:[#allocation12] sm:$0xff]  ;;  %v5205_v59 = vld [vmem:[#allocation12 + $0x2f0] sm:$0xff]  ;;  %v5208_v60 = vld [vmem:[#allocation12 + $0x2e8] sm:$0xff] }
  0x70   :  { %484 = vmatprep.mubr.f32.mxu0 %v7097_v0  ;;  %v5212_v61 = vld [vmem:[#allocation12 + $0x2c0] sm:$0xff]  ;;  %v5217_v62 = vld [vmem:[#allocation12 + $0x2b8] sm:$0xff]  ;;  %v5220_v63 = vld [vmem:[#allocation12 + $0x290] sm:$0xff] }
  0x71   :  { %3509 = vmatmul.mubr.msk.f32.vlgmr.msra.gmra.mxu1 %vm76_vm0, %v118_v12  ;;  %v5223_v1 = vld [vmem:[#allocation12 + $0x1c0] sm:$0xff]  ;;  %v5226_v2 = vld [vmem:[#allocation12 + $0x288] sm:$0xff]  ;;  %v5234_v4 = vld [vmem:[#allocation12 + $0x190] sm:$0xff] }
  0x72   :  { %693 = vmatpush1.msra.mxu1 %v5060_v22  ;;  %377 = vmatprep.mubr.f32.mxu1 %v7097_v0  ;;  %v5230_v3 = vld [vmem:[#allocation12 + $0x260] sm:$0xff]  ;;  %v5237_v6 = vld [vmem:[#allocation12 + $0x258] sm:$0xff]  ;;  %v5241_v7 = vld [vmem:[#allocation12 + $0x230] sm:$0xff] }
  0x73   :  { %694 = vmatprep.subr.mxu1 %v5064_v23  ;;  %3517 = vmatmul.mubr.msk.f32.vlgmr.msra.gmra.mxu0 %vm76_vm0, %v118_v12  ;;  %7248 = vst [vmem:[#allocation25_spill] sm:$0xff] %v5241_v7  ;;  %v5245_v8 = vld [vmem:[#allocation12 + $0x228] sm:$0xff]  ;;  %v5249_v9 = vld [vmem:[#allocation12 + $0x200] sm:$0xff]  ;;  %v5259_v15 = vld [vmem:[#allocation12 + $0x1d0] sm:$0xff] }
  0x74   :  { %695 = vmatpush1.msra.mxu1 %v5068_v24  ;;  %3848 = vmatpush3.msra.mxu0 %v5070_v25  ;;  %7249 = vst [vmem:[#allocation26_spill] sm:$0xff] %v5245_v8  ;;  %7250 = vst [vmem:[#allocation27_spill] sm:$0xff] %v5249_v9  ;;  %v5252_v12 = vld [vmem:[#allocation12 + $0x160] sm:$0xff]  ;;  %v5263_v16 = vld [vmem:[#allocation12 + $0x130] sm:$0xff] }
  0x75   :  { %696 = vmatprep.subr.mxu1 %v5074_v26  ;;  %3510 = vmatmul.mubr.msk.f32.gmra.mxu1 %vm76_vm0, %v5039_v14  ;;  %7252 = vst [vmem:[#allocation29_spill] sm:$0xff] %v5259_v15  ;;  %v5270_v19 = vld [vmem:[#allocation12 + $0x1a0] sm:$0xff]  ;;  %v5274_v20 = vld [vmem:[#allocation12 + $0x198] sm:$0xff] }
  0x76   :  { %697 = vmatpush1.msra.mxu1 %v5077_v27  ;;  %383 = vmatprep.mubr.f32.mxu1 %v7097_v0  ;;  %7254 = vst [vmem:[#allocation31_spill] sm:$0xff] %v5270_v19  ;;  %7255 = vst [vmem:[#allocation32_spill] sm:$0xff] %v5274_v20 }
  0x77   :  { %698 = vmatprep.subr.mxu1 %v5081_v28  ;;  %3849 = vmatprep.subr.mxu0 %v7097_v0 }
  0x78   :  { %699 = vmatpush1.msra.mxu1 %v5087_v29  ;;  %3850 = vmatpush3.msra.mxu0 %v5089_v30 }
  0x79   :  { %700 = vmatprep.subr.mxu1 %v5093_v31  ;;  %3511 = vmatmul.mubr.msk.f32.gmra.mxu1 %vm76_vm0, %v5049_v18 }
  0x7a   :  { %701 = vmatpush1.msra.mxu1 %v5096_v32  ;;  %389 = vmatprep.mubr.f32.mxu1 %v7097_v0 }
  0x7b   :  { %702 = vmatprep.subr.mxu1 %v5100_v33  ;;  %490 = vmatprep.mubr.f32.mxu0 %v7097_v0 }
  0x7c   :  { %703 = vmatpush1.msra.mxu1 %v5106_v34  ;;  %3851 = vmatprep.subr.mxu0 %v7097_v0 }
  0x7d   :  { %704 = vmatprep.subr.mxu1 %v5110_v35  ;;  %3512 = vmatmul.mubr.msk.f32.gmra.mxu1 %vm76_vm0, %v5058_v21 }
  0x7e   :  { %705 = vmatpush1.msra.mxu1 %v5113_v36  ;;  %395 = vmatprep.mubr.f32.mxu1 %v7097_v0 }
  0x7f   :  { %706 = vmatprep.subr.mxu1 %v5117_v37  ;;  %3518 = vmatmul.mubr.msk.f32.gmra.mxu0 %vm76_vm0, %v5039_v14  ;;  %v5255_v14 = vld [vmem:[#allocation12 + $0x1f8] sm:$0xff] }
  0x80   :  { %707 = vmatpush1.msra.mxu1 %v5123_v38  ;;  %3852 = vmatpush3.msra.mxu0 %v5125_v39  ;;  %7251 = vst [vmem:[#allocation28_spill] sm:$0xff] %v5255_v14 }
  0x81   :  { %708 = vmatprep.subr.mxu1 %v5129_v40  ;;  %3513 = vmatmul.mubr.msk.f32.gmra.mxu1 %vm76_vm0, %v5022_v5 }
  0x82   :  { %709 = vmatpush1.msra.mxu1 %v5132_v41  ;;  %401 = vmatprep.mubr.f32.mxu1 %v7097_v0 }
  0x83   :  { %710 = vmatprep.subr.mxu1 %v5137_v42  ;;  %3853 = vmatprep.subr.mxu0 %v7097_v0 }
  0x84   :  { %711 = vmatpush1.msra.mxu1 %v5143_v43  ;;  %3854 = vmatpush3.msra.mxu0 %v5145_v44 }
  0x85   :  { %712 = vmatprep.subr.mxu1 %v5149_v45  ;;  %3514 = vmatmul.mubr.msk.f32.gmra.mxu1 %vm76_vm0, %v5027_v10 }
  0x86   :  { %713 = vmatpush1.msra.mxu1 %v5152_v46  ;;  %407 = vmatprep.mubr.f32.mxu1 %v7097_v0 }
  0x87   :  { %714 = vmatprep.subr.mxu1 %v5156_v47  ;;  %496 = vmatprep.mubr.f32.mxu0 %v7097_v0 }
  0x88   :  { %715 = vmatpush1.msra.mxu1 %v5162_v48  ;;  %3855 = vmatprep.subr.mxu0 %v7097_v0 }
  0x89   :  { %716 = vmatprep.subr.mxu1 %v5166_v49  ;;  %3515 = vmatmul.mubr.msk.f32.gmra.mxu1 %vm76_vm0, %v5037_v13 }
  0x8a   :  { %717 = vmatpush1.msra.mxu1 %v5169_v50  ;;  %413 = vmatprep.mubr.f32.mxu1 %v7097_v0 }
  0x8b   :  { %718 = vmatprep.subr.mxu1 %v5173_v51  ;;  %3519 = vmatmul.mubr.msk.f32.gmra.mxu0 %vm76_vm0, %v5049_v18  ;;  %v5266_v18 = vld [vmem:[#allocation12 + $0x1c8] sm:$0xff] }
  0x8c   :  { %719 = vmatpush1.msra.mxu1 %v5179_v52  ;;  %3856 = vmatpush3.msra.mxu0 %v5181_v53  ;;  %7253 = vst [vmem:[#allocation30_spill] sm:$0xff] %v5266_v18 }
  0x8d   :  { %720 = vmatprep.subr.mxu1 %v5185_v54  ;;  %3516 = vmatmul.mubr.msk.f32.gmra.mxu1 %vm76_vm0, %v5047_v17 }
  0x8e   :  { %721 = vmatpush1.msra.mxu1 %v5188_v55  ;;  %756 = vmatprep.mubr.f32.mxu1 %v7097_v0 }
  0x8f   :  { %722 = vmatprep.subr.mxu1 %v5193_v56  ;;  %3857 = vmatprep.subr.mxu0 %v7097_v0 }
  0x90   :  { %723 = vmatpush1.msra.mxu1 %v5199_v57  ;;  %3858 = vmatpush3.msra.mxu0 %v5201_v58 }
  0x91   :  { %861 = vmatprep.subr.mxu1 %v5205_v59  ;;  %757 = vmatmul.mubr.f32.vlgmr.msra.gmra.mxu1 %v7097_v0 }
  0x92   :  { %862 = vmatpush1.msra.mxu1 %v5208_v60  ;;  %502 = vmatprep.mubr.f32.mxu0 %v7097_v0 }
  0x93   :  { %863 = vmatprep.subr.mxu1 %v5212_v61  ;;  %3859 = vmatprep.subr.mxu0 %v7097_v0 }
  0x94   :  { %864 = vmatpush1.msra.mxu1 %v5217_v62  ;;  %3520 = vmatmul.mubr.msk.f32.gmra.mxu0 %vm76_vm0, %v5058_v21  ;;  %v5281_v21 = vld [vmem:[#allocation12 + $0x100] sm:$0xff] }
  0x95   :  { %865 = vmatprep.subr.mxu1 %v5220_v63  ;;  %3860 = vmatpush3.msra.mxu0 %v5223_v1 }
  0x96   :  { %866 = vmatpush1.msra.mxu1 %v5226_v2  ;;  %3861 = vmatprep.subr.mxu0 %v7097_v0 }
  0x97   :  { %867 = vmatprep.subr.mxu1 %v5230_v3  ;;  %3862 = vmatpush3.msra.mxu0 %v5234_v4 }
  0x98   :  { %868 = vmatpush1.msra.mxu1 %v5237_v6  ;;  %508 = vmatprep.mubr.f32.mxu0 %v7097_v0 }
  0x99   :  { %869 = vmatprep.subr.mxu1 %v5241_v7  ;;  %3863 = vmatprep.subr.mxu0 %v7097_v0  ;;  %v5354_v7 = vld [vmem:[#allocation12 + $0x18] sm:$0xff] }
  0x9a   :  { %870 = vmatpush1.msra.mxu1 %v5245_v8  ;;  %3521 = vmatmul.mubr.msk.f32.gmra.mxu0 %vm76_vm0, %v5022_v5  ;;  %v5278_v5 = vld [vmem:[#allocation12 + $0x170] sm:$0xff]  ;;  %v5325_v8 = vld [vmem:[#allocation12 + $0xa8] sm:$0xff]  ;;  %7269 = vst [vmem:[#allocation46_spill] sm:$0xff] %v5354_v7 }
  0x9b   :  { %871 = vmatprep.subr.mxu1 %v5249_v9  ;;  %3864 = vmatpush3.msra.mxu0 %v5252_v12  ;;  %7256 = vst [vmem:[#allocation33_spill] sm:$0xff] %v5278_v5  ;;  %v5295_v9 = vld [vmem:[#allocation12 + $0x138] sm:$0xff]  ;;  %7265 = vst [vmem:[#allocation42_spill] sm:$0xff] %v5325_v8 }
  0x9c   :  { %872 = vmatpush1.msra.mxu1 %v5255_v14  ;;  %3865 = vmatprep.subr.mxu0 %v7097_v0  ;;  %v5284_v14 = vld [vmem:[#allocation12 + $0x168] sm:$0xff]  ;;  %7259 = vst [vmem:[#allocation36_spill] sm:$0xff] %v5295_v9 }
  0x9d   :  { %873 = vmatprep.subr.mxu1 %v5259_v15  ;;  %3866 = vmatpush3.msra.mxu0 %v5263_v16  ;;  %7257 = vst [vmem:[#allocation34_spill] sm:$0xff] %v5284_v14  ;;  %v5288_v15 = vld [vmem:[#allocation12 + $0x140] sm:$0xff] }
  0x9e   :  { %874 = vmatpush1.msra.mxu1 %v5266_v18  ;;  %514 = vmatprep.mubr.f32.mxu0 %v7097_v0  ;;  %7258 = vst [vmem:[#allocation35_spill] sm:$0xff] %v5288_v15  ;;  %v5292_v18 = vld [vmem:[#allocation12 + $0xd0] sm:$0xff] }
  0x9f   :  { %875 = vmatprep.subr.mxu1 %v5270_v19  ;;  %3867 = vmatprep.subr.mxu0 %v7097_v0  ;;  %v5299_v19 = vld [vmem:[#allocation12 + $0x110] sm:$0xff] }
  0xa0   :  { %876 = vmatpush1.msra.mxu1 %v5274_v20  ;;  %3522 = vmatmul.mubr.msk.f32.gmra.mxu0 %vm76_vm0, %v5027_v10  ;;  %7260 = vst [vmem:[#allocation37_spill] sm:$0xff] %v5299_v19  ;;  %v5303_v20 = vld [vmem:[#allocation12 + $0x108] sm:$0xff]  ;;  %v5307_v10 = vld [vmem:[#allocation12 + $0xe0] sm:$0xff] }
  0xa1   :  { %877 = vmatprep.subr.mxu1 %v5278_v5  ;;  %3868 = vmatpush3.msra.mxu0 %v5281_v21  ;;  %7261 = vst [vmem:[#allocation38_spill] sm:$0xff] %v5303_v20  ;;  %7262 = vst [vmem:[#allocation39_spill] sm:$0xff] %v5307_v10  ;;  %v5310_v5 = vld [vmem:[#allocation12 + $0xa0] sm:$0xff] }
  0xa2   :  { %878 = vmatpush1.msra.mxu1 %v5284_v14  ;;  %3869 = vmatprep.subr.mxu0 %v7097_v0  ;;  %v5314_v14 = vld [vmem:[#allocation12 + $0xd8] sm:$0xff] }
  0xa3   :  { %879 = vmatprep.subr.mxu1 %v5288_v15  ;;  %3870 = vmatpush3.msra.mxu0 %v5292_v18  ;;  %7263 = vst [vmem:[#allocation40_spill] sm:$0xff] %v5314_v14  ;;  %v5319_v15 = vld [vmem:[#allocation12 + $0xb0] sm:$0xff] }
  0xa4   :  { %880 = vmatpush1.msra.mxu1 %v5295_v9  ;;  %520 = vmatprep.mubr.f32.mxu0 %v7097_v0  ;;  %7264 = vst [vmem:[#allocation41_spill] sm:$0xff] %v5319_v15  ;;  %v5321_v9 = vld [vmem:[#allocation12 + $0x70] sm:$0xff] }
  0xa5   :  { %881 = vmatprep.subr.mxu1 %v5299_v19  ;;  %3871 = vmatprep.subr.mxu0 %v7097_v0  ;;  %v5329_v19 = vld [vmem:[#allocation12 + $0x80] sm:$0xff] }
  0xa6   :  { %882 = vmatpush1.msra.mxu1 %v5303_v20  ;;  %3523 = vmatmul.mubr.msk.f32.gmra.mxu0 %vm76_vm0, %v5037_v13  ;;  %v5333_v13 = vld [vmem:[#allocation12 + $0x78] sm:$0xff]  ;;  %v5339_v20 = vld [vmem:[#allocation12 + $0x50] sm:$0xff] }
  0xa7   :  { %883 = vmatprep.subr.mxu1 %v5307_v10  ;;  %3872 = vmatpush3.msra.mxu0 %v5310_v5  ;;  %v5337_v10 = vld [vmem:[#allocation12 + $0x40] sm:$0xff]  ;;  %7266 = vst [vmem:[#allocation43_spill] sm:$0xff] %v5339_v20 }
  0xa8   :  { %884 = vmatpush1.msra.mxu1 %v5314_v14  ;;  %3873 = vmatprep.subr.mxu0 %v7097_v0  ;;  %v5343_v14 = vld [vmem:[#allocation12 + $0x48] sm:$0xff] }
  0xa9   :  { %885 = vmatprep.subr.mxu1 %v5319_v15  ;;  %3874 = vmatpush3.msra.mxu0 %v5321_v9  ;;  %7267 = vst [vmem:[#allocation44_spill] sm:$0xff] %v5343_v14  ;;  %v5348_v15 = vld [vmem:[#allocation12 + $0x10] sm:$0xff] }
  0xaa   :  { %886 = vmatpush1.msra.mxu1 %v5325_v8  ;;  %526 = vmatprep.mubr.f32.mxu0 %v7097_v0  ;;  %v5350_v8 = vld [vmem:[#allocation12 + $0x20] sm:$0xff] }
  0xab   :  { %887 = vmatprep.subr.mxu1 %v5329_v19  ;;  %3875 = vmatprep.subr.mxu0 %v7097_v0  ;;  %7268 = vst [vmem:[#allocation45_spill] sm:$0xff] %v5350_v8 }
  0xac   :  { %888 = vmatpush1.msra.mxu1 %v5333_v13  ;;  %3524 = vmatmul.mubr.msk.f32.gmra.mxu0 %vm76_vm0, %v5047_v17  ;;  %v5363_v17 = vld [vmem:[#allocation12 + $0x2f8] sm:$0xff] }
  0xad   :  { %3876 = vmatpush3.msra.mxu0 %v5337_v10  ;;  %889 = vmatprep.subr.mxu1 %v5339_v20  ;;  %v5387_v20 = vld [vmem:[#allocation12 + $0x238] sm:$0xff] }
  0xae   :  { %3877 = vmatprep.subr.mxu0 %v7097_v0  ;;  %890 = vmatpush1.msra.mxu1 %v5343_v14  ;;  %v5369_v14 = vld [vmem:[#allocation12 + $0x2c8] sm:$0xff] }
  0xaf   :  { %3878 = vmatpush3.msra.mxu0 %v5348_v15  ;;  %891 = vmatprep.subr.mxu1 %v5350_v8  ;;  %v5381_v8 = vld [vmem:[#allocation12 + $0x268] sm:$0xff] }
  0xb0   :  { %3879 = vmatprep.mubr.msk.f32.mxu0 %vm4930_vm1, %v7097_v0  ;;  %892 = vmatpush1.msra.mxu1 %v5354_v7  ;;  %v5375_v7 = vld [vmem:[#allocation12 + $0x298] sm:$0xff] }
  0xb1   :  { %925 = vmatprep.mubr.f32.mxu1 %v7097_v0  ;;  %3882 = vmatprep.subr.mxu0 %v7097_v0 }
  0xb2   :  { %3880 = vmatmul.mubr.f32.vlgmr.msra.gmra.mxu0 %v7097_v0  ;;  %926 = vmatmul.mubr.f32.vlgmr.msra.gmra.mxu1 %v7097_v0 }
  0xb3   :  { %3883 = vmatpush3.msra.mxu0 %v5363_v17  ;;  %3914 = vmatprep.mubr.msk.f32.mxu0 %vm4930_vm1, %v7097_v0 }
  0xb4   :  { %3884 = vmatprep.subr.mxu0 %v7097_v0  ;;  %1044 = vmatprep.subr.mxu1 %v5029_v11  ;;  %v5393_v11 = vld [vmem:[#allocation12 + $0x208] sm:$0xff] }
  0xb5   :  { %3885 = vmatpush3.msra.mxu0 %v5369_v14  ;;  %1045 = vmatpush1.msra.mxu1 %v5060_v22  ;;  %v5399_v22 = vld [vmem:[#allocation12 + $0x1d8] sm:$0xff] }
  0xb6   :  { %3886 = vmatprep.subr.mxu0 %v7097_v0  ;;  %1046 = vmatprep.subr.mxu1 %v5064_v23  ;;  %v5405_v23 = vld [vmem:[#allocation12 + $0x1a8] sm:$0xff] }
  0xb7   :  { %3887 = vmatpush3.msra.mxu0 %v5375_v7  ;;  %1047 = vmatpush1.msra.mxu1 %v5068_v24  ;;  %v5411_v24 = vld [vmem:[#allocation12 + $0x178] sm:$0xff] }
  0xb8   :  { %3888 = vmatprep.subr.mxu0 %v7097_v0  ;;  %1048 = vmatprep.subr.mxu1 %v5074_v26  ;;  %v5417_v26 = vld [vmem:[#allocation12 + $0x148] sm:$0xff] }
  0xb9   :  { %3889 = vmatpush3.msra.mxu0 %v5381_v8  ;;  %1049 = vmatpush1.msra.mxu1 %v5077_v27  ;;  %v5423_v27 = vld [vmem:[#allocation12 + $0x118] sm:$0xff] }
  0xba   :  { %3890 = vmatprep.subr.mxu0 %v7097_v0  ;;  %1050 = vmatprep.subr.mxu1 %v5081_v28  ;;  %v5429_v28 = vld [vmem:[#allocation12 + $0xe8] sm:$0xff] }
  0xbb   :  { %3891 = vmatpush3.msra.mxu0 %v5387_v20  ;;  %1051 = vmatpush1.msra.mxu1 %v5087_v29  ;;  %v5435_v29 = vld [vmem:[#allocation12 + $0xb8] sm:$0xff] }
  0xbc   :  { %3892 = vmatprep.subr.mxu0 %v7097_v0  ;;  %1052 = vmatprep.subr.mxu1 %v5093_v31  ;;  %v5441_v31 = vld [vmem:[#allocation12 + $0x88] sm:$0xff] }
  0xbd   :  { %3893 = vmatpush3.msra.mxu0 %v5393_v11  ;;  %1053 = vmatpush1.msra.mxu1 %v5096_v32  ;;  %v5447_v32 = vld [vmem:[#allocation12 + $0x58] sm:$0xff] }
  0xbe   :  { %3894 = vmatprep.subr.mxu0 %v7097_v0  ;;  %1054 = vmatprep.subr.mxu1 %v5100_v33  ;;  %v5453_v33 = vld [vmem:[#allocation12 + $0x28] sm:$0xff] }
  0xbf   :  { %3895 = vmatpush3.msra.mxu0 %v5399_v22  ;;  %1055 = vmatpush1.msra.mxu1 %v5106_v34 }
  0xc0   :  { %3896 = vmatprep.subr.mxu0 %v7097_v0  ;;  %1056 = vmatprep.subr.mxu1 %v5110_v35  ;;  %v138_v35 = vld [vmem:[%s7072_s5] sm:$0x3f] }
  0xc1   :  { %3897 = vmatpush3.msra.mxu0 %v5405_v23  ;;  %1057 = vmatpush1.msra.mxu1 %v5113_v36 }
  0xc2   :  { %3898 = vmatprep.subr.mxu0 %v7097_v0  ;;  %1058 = vmatprep.subr.mxu1 %v5117_v37 }
  0xc3   :  { %3899 = vmatpush3.msra.mxu0 %v5411_v24  ;;  %1059 = vmatpush1.msra.mxu1 %v5123_v38 }
  0xc4   :  { %3900 = vmatprep.subr.mxu0 %v7097_v0  ;;  %1060 = vmatprep.subr.mxu1 %v5129_v40 }
  0xc5   :  { %3901 = vmatpush3.msra.mxu0 %v5417_v26  ;;  %1061 = vmatpush1.msra.mxu1 %v5132_v41 }
  0xc6   :  { %3902 = vmatprep.subr.mxu0 %v7097_v0  ;;  %1062 = vmatprep.subr.mxu1 %v5137_v42 }
  0xc7   :  { %3903 = vmatpush3.msra.mxu0 %v5423_v27  ;;  %1063 = vmatpush1.msra.mxu1 %v5143_v43 }
  0xc8   :  { %3904 = vmatprep.subr.mxu0 %v7097_v0  ;;  %1064 = vmatprep.subr.mxu1 %v5149_v45 }
  0xc9   :  { %3905 = vmatpush3.msra.mxu0 %v5429_v28  ;;  %1065 = vmatpush1.msra.mxu1 %v5152_v46 }
  0xca   :  { %3906 = vmatprep.subr.mxu0 %v7097_v0  ;;  %1066 = vmatprep.subr.mxu1 %v5156_v47 }
  0xcb   :  { %3907 = vmatpush3.msra.mxu0 %v5435_v29  ;;  %1067 = vmatpush1.msra.mxu1 %v5162_v48 }
  0xcc   :  { %3908 = vmatprep.subr.mxu0 %v7097_v0  ;;  %1068 = vmatprep.subr.mxu1 %v5166_v49 }
  0xcd   :  { %3909 = vmatpush3.msra.mxu0 %v5441_v31  ;;  %1069 = vmatpush1.msra.mxu1 %v5169_v50 }
  0xce   :  { %3910 = vmatprep.subr.mxu0 %v7097_v0  ;;  %1070 = vmatprep.subr.mxu1 %v5173_v51 }
  0xcf   :  { %3911 = vmatpush3.msra.mxu0 %v5447_v32  ;;  %1071 = vmatpush1.msra.mxu1 %v5179_v52 }
  0xd0   :  { %3912 = vmatprep.subr.mxu0 %v7097_v0  ;;  %1072 = vmatprep.subr.mxu1 %v5185_v54 }
  0xd1   :  { %3913 = vmatpush3.msra.mxu0 %v5453_v33  ;;  %1073 = vmatpush1.msra.mxu1 %v5188_v55 }
  0xd2   :  { %3915 = vmatmul.mubr.f32.vlgmr.msra.gmra.mxu0 %v7097_v0  ;;  %3917 = vmatprep.subr.mxu0 %v7097_v0 }
  0xd3   :  { %3918 = vmatpush3.msra.mxu0 %v5070_v25  ;;  %1074 = vmatprep.subr.mxu1 %v5193_v56  ;;  %v140_v25 = vlaneseq }
  0xd4   :  { %3919 = vmatprep.subr.mxu0 %v7097_v0  ;;  %1075 = vmatpush1.msra.mxu1 %v5199_v57 }
  0xd5   :  { %3920 = vmatpush3.msra.mxu0 %v5089_v30  ;;  %1108 = vmatprep.mubr.f32.mxu1 %v7097_v0  ;;  %v141_v30 = vshrl.u32 %v140_v25, 7 }
  0xd6   :  { %3921 = vmatprep.subr.mxu0 %v7097_v0  ;;  %3949 = vmatprep.mubr.msk.f32.mxu0 %vm4930_vm1, %v7097_v0 }
  0xd7   :  { %3922 = vmatpush3.msra.mxu0 %v5125_v39  ;;  %1207 = vmatprep.subr.mxu1 %v5205_v59  ;;  %v142_v34 = vsub.s32 0, %v141_v30  ;;  %v146_v36 = vsub.s32 1, %v141_v30  ;;  %v154_v25 = vsub.s32 3, %v141_v30 }
  0xd8   :  { %3923 = vmatprep.subr.mxu0 %v7097_v0 }
  0xd9   :  { %3924 = vmatpush3.msra.mxu0 %v5145_v44  ;;  %v5505_v37 = vrot.slane %v138_v35, %v142_v34  ;;  %v5507_v38 = vrot.slane %v138_v35, %v146_v36  ;;  %v158_v36 = vsub.s32 4, %v141_v30 }
  0xda   :  { %3925 = vmatprep.subr.mxu0 %v7097_v0 }
  0xdb   :  { %3926 = vmatpush3.msra.mxu0 %v5181_v53 }
  0xdc   :  { %3927 = vmatprep.subr.mxu0 %v7097_v0 }
  0xdd   :  { %3928 = vmatpush3.msra.mxu0 %v5201_v58 }
  0xde   :  { %3929 = vmatprep.subr.mxu0 %v7097_v0 }
  0xdf   :  { %3930 = vmatpush3.msra.mxu0 %v5223_v1 }
  0xe0   :  { %3931 = vmatprep.subr.mxu0 %v7097_v0 }
  0xe1   :  { %3932 = vmatpush3.msra.mxu0 %v5234_v4 }
  0xe2   :  { %3933 = vmatprep.subr.mxu0 %v7097_v0 }
  0xe3   :  { %3934 = vmatpush3.msra.mxu0 %v5252_v12 }
  0xe4   :  { %3935 = vmatprep.subr.mxu0 %v7097_v0 }
  0xe5   :  { %3936 = vmatpush3.msra.mxu0 %v5263_v16 }
  0xe6   :  { %3937 = vmatprep.subr.mxu0 %v7097_v0 }
  0xe7   :  { %3938 = vmatpush3.msra.mxu0 %v5281_v21 }
  0xe8   :  { %3939 = vmatprep.subr.mxu0 %v7097_v0 }
  0xe9   :  { %3940 = vmatpush3.msra.mxu0 %v5292_v18 }
  0xea   :  { %3941 = vmatprep.subr.mxu0 %v7097_v0 }
  0xeb   :  { %3942 = vmatpush3.msra.mxu0 %v5310_v5 }
  0xec   :  { %3943 = vmatprep.subr.mxu0 %v7097_v0 }
  0xed   :  { %3944 = vmatpush3.msra.mxu0 %v5321_v9 }
  0xee   :  { %3945 = vmatprep.subr.mxu0 %v7097_v0 }
  0xef   :  { %3946 = vmatpush3.msra.mxu0 %v5337_v10 }
  0xf0   :  { %3947 = vmatprep.subr.mxu0 %v7097_v0 }
  0xf1   :  { %3948 = vmatpush3.msra.mxu0 %v5348_v15 }
  0xf2   :  { %3952 = vmatprep.subr.mxu0 %v7097_v0 }
 0x121   :  { %v284_v39 = vpop.f32.mrf.mxu1 }
 0x122   :  { %v5510_v40 = vadd.f32 %v284_v39, %v5505_v37 }
 0x123   :  { %v286_v41 = vpop.f32.mrf.mxu1  ;;  %v5512_v42 = vpop.f32.mrf.mxu0 }
 0x124   :  { %7270 = vst [vmem:[#allocation47_spill] sm:$0xff] %v5510_v40  ;;  %v5515_v43 = vadd.f32 %v286_v41, %v5507_v38 }
 0x125   :  { %v290_v44 = vpop.f32.mrf.mxu1  ;;  %v5517_v45 = vpop.f32.mrf.mxu0 }
 0x126   :  { %7271 = vst [vmem:[#allocation48_spill] sm:$0xff] %v5515_v43  ;;  %v5520_v46 = vadd.f32 %v290_v44, %v5505_v37 }
 0x127   :  { %v292_v47 = vpop.f32.mrf.mxu1  ;;  %v266_v48 = vpop.f32.mrf.mxu0 }
 0x128   :  { %7272 = vst [vmem:[#allocation49_spill] sm:$0xff] %v5520_v46  ;;  %v5523_v49 = vadd.f32 %v292_v47, %v5507_v38  ;;  %v5526_v50 = vadd.f32 %v266_v48, %v5505_v37  ;;  %v162_v48 = vsub.s32 5, %v141_v30 }
 0x129   :  { %v296_v51 = vpop.f32.mrf.mxu1  ;;  %v268_v52 = vpop.f32.mrf.mxu0 }
 0x12a   :  { %7273 = vst [vmem:[#allocation50_spill] sm:$0xff] %v5523_v49  ;;  %v5529_v54 = vadd.f32 %v296_v51, %v5505_v37  ;;  %v5532_v55 = vadd.f32 %v268_v52, %v5507_v38  ;;  %v150_v52 = vsub.s32 2, %v141_v30 }
 0x12b   :  { %v298_v56 = vpop.f32.mrf.mxu1  ;;  %v272_v57 = vpop.f32.mrf.mxu0 }
 0x12c   :  { %7274 = vst [vmem:[#allocation51_spill] sm:$0xff] %v5529_v54  ;;  %v5535_v59 = vadd.f32 %v298_v56, %v5507_v38  ;;  %v5538_v34 = vadd.f32 %v272_v57, %v5505_v37  ;;  %v5554_v54 = vrot.slane %v138_v35, %v158_v36  ;;  %v5563_v43 = vrot.slane %v138_v35, %v150_v52 }
 0x12d   :  { %v302_v39 = vpop.f32.mrf.mxu1  ;;  %v274_v41 = vpop.f32.mrf.mxu0 }
 0x12e   :  { %7275 = vst [vmem:[#allocation52_spill] sm:$0xff] %v5535_v59  ;;  %7276 = vst [vmem:[#allocation53_spill] sm:$0xff] %v5538_v34  ;;  %v5541_v44 = vadd.f32 %v302_v39, %v5505_v37  ;;  %v5544_v47 = vadd.f32 %v274_v41, %v5507_v38  ;;  %v5549_v59 = vrot.slane %v138_v35, %v154_v25 }
 0x12f   :  { %v304_v51 = vpop.f32.mrf.mxu1  ;;  %v278_v0 = vpop.f32.mrf.mxu0 }
 0x130   :  { %7277 = vst [vmem:[#allocation54_spill] sm:$0xff] %v5541_v44  ;;  %7278 = vst [vmem:[#allocation55_spill] sm:$0xff] %v5544_v47  ;;  %v5547_v56 = vadd.f32 %v304_v51, %v5507_v38  ;;  %v5552_v57 = vadd.f32 %v278_v0, %v5505_v37  ;;  %v5561_v44 = vrot.slane %v138_v35, %v162_v48 }
 0x131   :  { %v5556_v49 = vpop.f32.mrf.mxu1  ;;  %v280_v39 = vpop.f32.mrf.mxu0 }
 0x132   :  { %7279 = vst [vmem:[#allocation56_spill] sm:$0xff] %v5547_v56  ;;  %7280 = vst [vmem:[#allocation57_spill] sm:$0xff] %v5552_v57  ;;  %v5559_v41 = vadd.f32 %v280_v39, %v5507_v38 }
 0x133   :  { %v375_v30 = vpop.f32.mrf.mxu1  ;;  %v486_v46 = vpop.f32.mrf.mxu0 }
 0x134   :  { %7281 = vst [vmem:[#allocation58_spill] sm:$0xff] %v5559_v41  ;;  %v5566_v25 = vadd.f32 %v375_v30, %v5549_v59  ;;  %v5569_v0 = vadd.f32 %v486_v46, %v5554_v54 }
 0x135   :  { %v379_v36 = vpop.f32.mrf.mxu1  ;;  %v488_v51 = vpop.f32.mrf.mxu0 }
 0x136   :  { %7282 = vst [vmem:[#allocation59_spill] sm:$0xff] %v5566_v25  ;;  %7283 = vst [vmem:[#allocation60_spill] sm:$0xff] %v5569_v0  ;;  %v5572_v56 = vadd.f32 %v379_v36, %v5563_v43  ;;  %v5575_v39 = vadd.f32 %v488_v51, %v5561_v44 }
 0x137   :  { %v381_v48 = vpop.f32.mrf.mxu1 }
 0x138   :  { %7284 = vst [vmem:[#allocation61_spill] sm:$0xff] %v5572_v56  ;;  %7285 = vst [vmem:[#allocation62_spill] sm:$0xff] %v5575_v39  ;;  %v5578_v40 = vadd.f32 %v381_v48, %v5549_v59 }
 0x139   :  { %v385_v35 = vpop.f32.mrf.mxu1 }
 0x13a   :  { %7286 = vst [vmem:[#allocation63_spill] sm:$0xff] %v5578_v40  ;;  %v5581_v52 = vadd.f32 %v385_v35, %v5563_v43 }
 0x13b   :  { %v387_v30 = vpop.f32.mrf.mxu1 }
 0x13c   :  { %7287 = vst [vmem:[#allocation64_spill] sm:$0xff] %v5581_v52  ;;  %v5584_v46 = vadd.f32 %v387_v30, %v5549_v59 }
 0x13d   :  { %v391_v0 = vpop.f32.mrf.mxu1 }
 0x13e   :  { %7288 = vst [vmem:[#allocation65_spill] sm:$0xff] %v5584_v46  ;;  %v5587_v25 = vadd.f32 %v391_v0, %v5563_v43 }
 0x13f   :  { %v393_v36 = vpop.f32.mrf.mxu1  ;;  %v492_v41 = vpop.f32.mrf.mxu0 }
 0x140   :  { %7289 = vst [vmem:[#allocation66_spill] sm:$0xff] %v5587_v25  ;;  %v5590_v51 = vadd.f32 %v393_v36, %v5549_v59  ;;  %v5593_v48 = vadd.f32 %v492_v41, %v5554_v54 }
 0x141   :  { %v397_v39 = vpop.f32.mrf.mxu1  ;;  %v494_v40 = vpop.f32.mrf.mxu0 }
 0x142   :  { %7290 = vst [vmem:[#allocation67_spill] sm:$0xff] %v5590_v51  ;;  %7291 = vst [vmem:[#allocation68_spill] sm:$0xff] %v5593_v48  ;;  %v5596_v35 = vadd.f32 %v397_v39, %v5563_v43  ;;  %v5599_v30 = vadd.f32 %v494_v40, %v5561_v44 }
 0x143   :  { %v399_v46 = vpop.f32.mrf.mxu1 }
 0x144   :  { %7292 = vst [vmem:[#allocation69_spill] sm:$0xff] %v5596_v35  ;;  %7293 = vst [vmem:[#allocation70_spill] sm:$0xff] %v5599_v30  ;;  %v5602_v0 = vadd.f32 %v399_v46, %v5549_v59 }
 0x145   :  { %v403_v25 = vpop.f32.mrf.mxu1 }
 0x146   :  { %7294 = vst [vmem:[#allocation71_spill] sm:$0xff] %v5602_v0  ;;  %v5605_v57 = vadd.f32 %v403_v25, %v5563_v43 }
 0x147   :  { %v405_v36 = vpop.f32.mrf.mxu1 }
 0x148   :  { %7295 = vst [vmem:[#allocation72_spill] sm:$0xff] %v5605_v57  ;;  %v5608_v41 = vadd.f32 %v405_v36, %v5549_v59 }
 0x149   :  { %v409_v48 = vpop.f32.mrf.mxu1 }
 0x14a   :  { %7296 = vst [vmem:[#allocation73_spill] sm:$0xff] %v5608_v41  ;;  %v5611_v51 = vadd.f32 %v409_v48, %v5563_v43  ;;  %v261_v48 = vadd.f32 %v5512_v42, %v5505_v37 }
 0x14b   :  { %v411_v39 = vpop.f32.mrf.mxu1  ;;  %v498_v35 = vpop.f32.mrf.mxu0 }
 0x14c   :  { %7297 = vst [vmem:[#allocation74_spill] sm:$0xff] %v5611_v51  ;;  %v5614_v40 = vadd.f32 %v411_v39, %v5549_v59  ;;  %v5617_v46 = vadd.f32 %v498_v35, %v5554_v54 }
 0x14d   :  { %v415_v30 = vpop.f32.mrf.mxu1  ;;  %v500_v0 = vpop.f32.mrf.mxu0 }
 0x14e   :  { %7298 = vst [vmem:[#allocation75_spill] sm:$0xff] %v5614_v40  ;;  %7299 = vst [vmem:[#allocation76_spill] sm:$0xff] %v5617_v46  ;;  %v5620_v25 = vadd.f32 %v415_v30, %v5563_v43  ;;  %v5623_v36 = vadd.f32 %v500_v0, %v5561_v44  ;;  %v263_v30 = vadd.f32 %v5517_v45, %v5507_v38 }
 0x14f   :  { %v417_v57 = vpop.f32.mrf.mxu1 }
 0x150   :  { %7300 = vst [vmem:[#allocation77_spill] sm:$0xff] %v5620_v25  ;;  %7301 = vst [vmem:[#allocation78_spill] sm:$0xff] %v5623_v36 }
 0x151   :  { %v758_v51 = vpop.f32.mrf.mxu1 }
 0x152   :  { %v833_v52 = vadd.f32 %v758_v51, %v261_v48 }
 0x153   :  { %v760_v35 = vpop.f32.mrf.mxu1 }
 0x154   :  { %v3525_v41 = vmul.f32 -1.442695, %v833_v52  ;;  %v504_v39 = vpop.f32.mrf.mxu0  ;;  %v840_v25 = vadd.f32 %v760_v35, %v263_v30 }
 0x155   :  { %v5628_v47 = vadd.f32 %v504_v39, %v5554_v54 }
 0x156   :  { %4436 = vpow2.f32 %v3525_v41  ;;  %v506_v46 = vpop.f32.mrf.mxu0  ;;  %v3526_v52 = vmul.f32 -1.442695, %v840_v25 }
 0x157   :  { %7302 = vst [vmem:[#allocation79_spill] sm:$0xff] %v5628_v47  ;;  %v5633_v0 = vadd.f32 %v506_v46, %v5561_v44 }
 0x158   :  { %4438 = vpow2.f32 %v3526_v52 }
 0x159   :  { %7303 = vst [vmem:[#allocation80_spill] sm:$0xff] %v5633_v0 }
 0x15a   :  { %v510_v36 = vpop.f32.mrf.mxu0 }
 0x15b   :  { %v5636_v37 = vadd.f32 %v510_v36, %v5554_v54 }
 0x15c   :  { %v512_v42 = vpop.f32.mrf.mxu0 }
 0x15d   :  { %7304 = vst [vmem:[#allocation81_spill] sm:$0xff] %v5636_v37  ;;  %v5639_v51 = vadd.f32 %v512_v42, %v5561_v44 }
 0x15f   :  { %7305 = vst [vmem:[#allocation82_spill] sm:$0xff] %v5639_v51 }
 0x160   :  { %v516_v48 = vpop.f32.mrf.mxu0 }
 0x161   :  { %v5642_v41 = vadd.f32 %v516_v48, %v5554_v54  ;;  %v5656_v48 = vld [vmem:[%s7073_s6] ss:$0 sm:$0xff] }
 0x162   :  { %v518_v39 = vpop.f32.mrf.mxu0  ;;  %7310 = vst [vmem:[#allocation87_spill] sm:$0xff] %v5656_v48 }
 0x163   :  { %7306 = vst [vmem:[#allocation83_spill] sm:$0xff] %v5642_v41  ;;  %v4437_v38 = vpop.eup %4436  ;;  %v5645_v45 = vadd.f32 %v518_v39, %v5561_v44  ;;  %v418_v39 = vadd.f32 %v417_v57, %v5549_v59 }
 0x164   :  { %v837_v46 = vadd.f32 1.0, %v4437_v38 }
 0x165   :  { %7307 = vst [vmem:[#allocation84_spill] sm:$0xff] %v5645_v45  ;;  %v4439_v52 = vpop.eup %4438 }
 0x166   :  { %4440 = vrcp.f32 %v837_v46  ;;  %v522_v35 = vpop.f32.mrf.mxu0  ;;  %v844_v38 = vadd.f32 1.0, %v4439_v52 }
 0x167   :  { %v5648_v36 = vadd.f32 %v522_v35, %v5554_v54 }
 0x168   :  { %v524_v25 = vpop.f32.mrf.mxu0  ;;  %4442 = vrcp.f32 %v844_v38  ;;  %v7320_v38 = vld [vmem:[#allocation33_spill] sm:$0xff] }
 0x169   :  { %7308 = vst [vmem:[#allocation85_spill] sm:$0xff] %v5648_v36  ;;  %v5651_v30 = vadd.f32 %v524_v25, %v5561_v44  ;;  %v374_v25 = vadd.f32 %v5556_v49, %v5563_v43 }
 0x16b   :  { %7309 = vst [vmem:[#allocation86_spill] sm:$0xff] %v5651_v30 }
 0x16c   :  { %v528_v42 = vpop.f32.mrf.mxu0 }
 0x16d   :  { %v529_v36 = vadd.f32 %v528_v42, %v5554_v54  ;;  %v7311_v54 = vmov 0.0   ;;  %v7317_v42 = vld [vmem:[#allocation30_spill] sm:$0xff] }
 0x16e   :  { %v530_v0 = vpop.f32.mrf.mxu0 }
 0x172   :  { %v829_v46 = vpop.f32.mrf.mxu0  ;;  %v927_v47 = vpop.f32.mrf.mxu1 }
 0x173   :  { %v4441_v51 = vpop.eup %4440  ;;  %v853_v35 = vadd.f32 %v5656_v48, %v829_v46  ;;  %v1002_v37 = vadd.f32 %v927_v47, %v418_v39 }
 0x174   :  { %v3881_v45 = vpop.f32.mrf.mxu0  ;;  %v929_v30 = vpop.f32.mrf.mxu1 }
 0x175   :  { %v854_v41 = vmul.f32 %v4441_v51, %v853_v35  ;;  %v3528_v34 = vmul.f32 -1.442695, %v1002_v37  ;;  %v1009_v59 = vadd.f32 %v929_v30, %v529_v36  ;;  %v4443_v52 = vpop.eup %4442  ;;  %v7313_v37 = vld [vmem:[#allocation26_spill] sm:$0xff]  ;;  %v7316_v30 = vld [vmem:[#allocation29_spill] sm:$0xff] }
 0x176   :  { %v857_v47 = vsub.f32 1.0, %v4443_v52  ;;  %v859_v43 = vmul.f32 0.0, %v4443_v52  ;;  %v7321_v35 = vld [vmem:[#allocation34_spill] sm:$0xff] }
 0x177   :  { %v855_v56 = vadd.f32 %v854_v41, %v374_v25  ;;  %4444 = vpow2.f32 %v3528_v34  ;;  %v3529_v57 = vmul.f32 -1.442695, %v1009_v59  ;;  %v7314_v41 = vld [vmem:[#allocation27_spill] sm:$0xff]  ;;  %v7323_v59 = vld [vmem:[#allocation36_spill] sm:$0xff]  ;;  %v7325_v52 = vld [vmem:[#allocation38_spill] sm:$0xff] }
 0x178   :  { %v7322_v25 = vld [vmem:[#allocation35_spill] sm:$0xff] }
 0x179   :  { %4446 = vtanh.f32 %v855_v56 }
 0x17a   :  { %4448 = vpow2.f32 %v3529_v57  ;;  %v7324_v57 = vld [vmem:[#allocation37_spill] sm:$0xff] }
 0x184   :  { %v4445_v40 = vpop.eup %4444 }
 0x185   :  { %v1006_v46 = vadd.f32 1.0, %v4445_v40 }
 0x186   :  { %v4447_v45 = vpop.eup %4446 }
 0x187   :  { %4450 = vrcp.f32 %v1006_v46  ;;  %v858_v39 = vmul.f32 %v4447_v45, %v857_v47  ;;  %v4449_v34 = vpop.eup %4448  ;;  %v7326_v46 = vld [vmem:[#allocation39_spill] sm:$0xff]  ;;  %v7327_v45 = vld [vmem:[#allocation40_spill] sm:$0xff] }
 0x189   :  { %v5663_v49 = vadd.f32 %v859_v43, %v858_v39  ;;  %v7328_v39 = vld [vmem:[#allocation41_spill] sm:$0xff]  ;;  %v7329_v43 = vld [vmem:[#allocation42_spill] sm:$0xff] }
 0x18b   :  { %1109 = vmatmul.mubr.f32.vlgmr.msra.gmra.mxu1 %v5663_v49  ;;  %3950 = vmatmul.mubr.f32.vlgmr.msra.gmra.mxu0 %v5663_v49 }
 0x18c   :  { %1208 = vmatpush1.msra.mxu1 %v5208_v60  ;;  %3953 = vmatpush3.msra.mxu0 %v5363_v17  ;;  %v5680_v60 = vld [vmem:[%s7073_s6 + $0x1] ss:$0 sm:$0xff] }
 0x18d   :  { %1209 = vmatprep.subr.mxu1 %v5212_v61  ;;  %3954 = vmatprep.subr.mxu0 %v7311_v54  ;;  %v1013_v61 = vadd.f32 1.0, %v4449_v34 }
 0x18e   :  { %1210 = vmatpush1.msra.mxu1 %v5217_v62  ;;  %3955 = vmatpush3.msra.mxu0 %v5369_v14 }
 0x18f   :  { %1211 = vmatprep.subr.mxu1 %v5220_v63  ;;  %3956 = vmatprep.subr.mxu0 %v7311_v54  ;;  %4452 = vrcp.f32 %v1013_v61 }
 0x190   :  { %1212 = vmatpush1.msra.mxu1 %v5226_v2  ;;  %3957 = vmatpush3.msra.mxu0 %v5375_v7  ;;  %v7312_v2 = vld [vmem:[#allocation25_spill] sm:$0xff] }
 0x191   :  { %1213 = vmatprep.subr.mxu1 %v5230_v3  ;;  %3958 = vmatprep.subr.mxu0 %v7311_v54  ;;  %v531_v3 = vadd.f32 %v530_v0, %v5561_v44  ;;  %v7318_v44 = vld [vmem:[#allocation31_spill] sm:$0xff]  ;;  %v7319_v0 = vld [vmem:[#allocation32_spill] sm:$0xff] }
 0x192   :  { %v998_v62 = vpop.f32.mrf.mxu0  ;;  %1214 = vmatpush1.msra.mxu1 %v5237_v6  ;;  %3959 = vmatpush3.msra.mxu0 %v5381_v8  ;;  %v7315_v6 = vld [vmem:[#allocation28_spill] sm:$0xff] }
 0x193   :  { %v1022_v63 = vadd.f32 %v5680_v60, %v998_v62  ;;  %1215 = vmatprep.subr.mxu1 %v7312_v2  ;;  %3960 = vmatprep.subr.mxu0 %v7311_v54  ;;  %v7330_v62 = vld [vmem:[#allocation43_spill] sm:$0xff] }
 0x194   :  { %v4451_v56 = vpop.eup %4450  ;;  %v3916_v40 = vpop.f32.mrf.mxu0  ;;  %1216 = vmatpush1.msra.mxu1 %v7313_v37  ;;  %3961 = vmatpush3.msra.mxu0 %v5387_v20  ;;  %v7333_v37 = vld [vmem:[#allocation46_spill] sm:$0xff] }
 0x195   :  { %v1023_v51 = vmul.f32 %v4451_v56, %v1022_v63  ;;  %1217 = vmatprep.subr.mxu1 %v7314_v41  ;;  %3962 = vmatprep.subr.mxu0 %v7311_v54  ;;  %v7331_v56 = vld [vmem:[#allocation44_spill] sm:$0xff]  ;;  %v7332_v40 = vld [vmem:[#allocation45_spill] sm:$0xff] }
 0x196   :  { %1218 = vmatpush1.msra.mxu1 %v7315_v6  ;;  %3963 = vmatpush3.msra.mxu0 %v5393_v11  ;;  %v5753_v41 = vld [vmem:[#allocation12 + $0x2a8] sm:$0xff]  ;;  %v5757_v6 = vld [vmem:[#allocation12 + $0x2a0] sm:$0xff] }
 0x197   :  { %v1024_v36 = vadd.f32 %v1023_v51, %v531_v3  ;;  %1219 = vmatprep.subr.mxu1 %v7316_v30  ;;  %3964 = vmatprep.subr.mxu0 %v7311_v54  ;;  %v5747_v3 = vld [vmem:[#allocation12 + $0x2d0] sm:$0xff]  ;;  %v5750_v51 = vld [vmem:[#allocation12 + $0x2e0] sm:$0xff]  ;;  %v5763_v30 = vld [vmem:[#allocation12 + $0x278] sm:$0xff] }
 0x198   :  { %1220 = vmatpush1.msra.mxu1 %v7317_v42  ;;  %3965 = vmatpush3.msra.mxu0 %v5399_v22  ;;  %v5767_v42 = vld [vmem:[#allocation12 + $0x270] sm:$0xff] }
 0x199   :  { %4454 = vtanh.f32 %v1024_v36  ;;  %1221 = vmatprep.subr.mxu1 %v7318_v44  ;;  %3966 = vmatprep.subr.mxu0 %v7311_v54  ;;  %v5760_v36 = vld [vmem:[#allocation12 + $0x2b0] sm:$0xff]  ;;  %v5770_v44 = vld [vmem:[#allocation12 + $0x280] sm:$0xff] }
 0x19a   :  { %1222 = vmatpush1.msra.mxu1 %v7319_v0  ;;  %3967 = vmatpush3.msra.mxu0 %v5405_v23  ;;  %7334 = vst [vmem:[#allocation25_spill] sm:$0xff] %v5770_v44  ;;  %v5773_v0 = vld [vmem:[#allocation12 + $0x248] sm:$0xff] }
 0x19b   :  { %1223 = vmatprep.subr.mxu1 %v7320_v38  ;;  %3968 = vmatprep.subr.mxu0 %v7311_v54  ;;  %7335 = vst [vmem:[#allocation26_spill] sm:$0xff] %v5773_v0  ;;  %v5777_v38 = vld [vmem:[#allocation12 + $0x240] sm:$0xff] }
 0x19c   :  { %1224 = vmatpush1.msra.mxu1 %v7321_v35  ;;  %3969 = vmatpush3.msra.mxu0 %v5411_v24  ;;  %v4453_v47 = vpop.eup %4452  ;;  %7336 = vst [vmem:[#allocation27_spill] sm:$0xff] %v5777_v38  ;;  %v5780_v35 = vld [vmem:[#allocation12 + $0x250] sm:$0xff] }
 0x19d   :  { %1225 = vmatprep.subr.mxu1 %v7322_v25  ;;  %3970 = vmatprep.subr.mxu0 %v7311_v54  ;;  %v1026_v34 = vsub.f32 1.0, %v4453_v47  ;;  %v1028_v2 = vmul.f32 0.0, %v4453_v47  ;;  %7337 = vst [vmem:[#allocation28_spill] sm:$0xff] %v5780_v35  ;;  %v5783_v25 = vld [vmem:[#allocation12 + $0x218] sm:$0xff]  ;;  %v5803_v47 = vld [vmem:[#allocation12 + $0x1b0] sm:$0xff] }
 0x19e   :  { %1226 = vmatpush1.msra.mxu1 %v7323_v59  ;;  %3971 = vmatpush3.msra.mxu0 %v5417_v26  ;;  %7338 = vst [vmem:[#allocation29_spill] sm:$0xff] %v5783_v25  ;;  %v5787_v59 = vld [vmem:[#allocation12 + $0x210] sm:$0xff]  ;;  %7343 = vst [vmem:[#allocation34_spill] sm:$0xff] %v5803_v47 }
 0x19f   :  { %1227 = vmatprep.subr.mxu1 %v7324_v57  ;;  %3972 = vmatprep.subr.mxu0 %v7311_v54  ;;  %7339 = vst [vmem:[#allocation30_spill] sm:$0xff] %v5787_v59  ;;  %v5791_v57 = vld [vmem:[#allocation12 + $0x1e8] sm:$0xff] }
 0x1a0   :  { %1228 = vmatpush1.msra.mxu1 %v7325_v52  ;;  %3973 = vmatpush3.msra.mxu0 %v5423_v27  ;;  %7340 = vst [vmem:[#allocation31_spill] sm:$0xff] %v5791_v57  ;;  %v5795_v52 = vld [vmem:[#allocation12 + $0x1e0] sm:$0xff] }
 0x1a1   :  { %1229 = vmatprep.subr.mxu1 %v7326_v46  ;;  %3974 = vmatprep.subr.mxu0 %v7311_v54  ;;  %7341 = vst [vmem:[#allocation32_spill] sm:$0xff] %v5795_v52  ;;  %v5799_v46 = vld [vmem:[#allocation12 + $0x1b8] sm:$0xff] }
 0x1a2   :  { %1230 = vmatpush1.msra.mxu1 %v7327_v45  ;;  %3975 = vmatpush3.msra.mxu0 %v5429_v28  ;;  %7342 = vst [vmem:[#allocation33_spill] sm:$0xff] %v5799_v46  ;;  %v5811_v45 = vld [vmem:[#allocation12 + $0x180] sm:$0xff] }
 0x1a3   :  { %1231 = vmatprep.subr.mxu1 %v7328_v39  ;;  %3976 = vmatprep.subr.mxu0 %v7311_v54  ;;  %7345 = vst [vmem:[#allocation36_spill] sm:$0xff] %v5811_v45  ;;  %v5819_v39 = vld [vmem:[#allocation12 + $0x150] sm:$0xff] }
 0x1a4   :  { %1232 = vmatpush1.msra.mxu1 %v7329_v43  ;;  %3977 = vmatpush3.msra.mxu0 %v5435_v29  ;;  %7347 = vst [vmem:[#allocation38_spill] sm:$0xff] %v5819_v39  ;;  %v5827_v43 = vld [vmem:[#allocation12 + $0x120] sm:$0xff] }
 0x1a5   :  { %1233 = vmatprep.subr.mxu1 %v5329_v19  ;;  %3978 = vmatprep.subr.mxu0 %v7311_v54  ;;  %7349 = vst [vmem:[#allocation40_spill] sm:$0xff] %v5827_v43 }
 0x1a6   :  { %v4455_v61 = vpop.eup %4454  ;;  %1234 = vmatpush1.msra.mxu1 %v5333_v13  ;;  %3979 = vmatpush3.msra.mxu0 %v5441_v31  ;;  %v5743_v13 = vld [vmem:[#allocation12 + $0x2d8] sm:$0xff] }
 0x1a7   :  { %1235 = vmatprep.subr.mxu1 %v7330_v62  ;;  %3980 = vmatprep.subr.mxu0 %v7311_v54  ;;  %v1027_v63 = vmul.f32 %v4455_v61, %v1026_v34  ;;  %v5835_v34 = vld [vmem:[#allocation12 + $0xf0] sm:$0xff]  ;;  %v5843_v61 = vld [vmem:[#allocation12 + $0xc0] sm:$0xff] }
 0x1a8   :  { %1236 = vmatpush1.msra.mxu1 %v7331_v56  ;;  %3981 = vmatpush3.msra.mxu0 %v5447_v32  ;;  %7351 = vst [vmem:[#allocation42_spill] sm:$0xff] %v5835_v34  ;;  %7353 = vst [vmem:[#allocation44_spill] sm:$0xff] %v5843_v61  ;;  %v5851_v62 = vld [vmem:[#allocation12 + $0x90] sm:$0xff]  ;;  %v5875_v56 = vld [vmem:[#allocation12] sm:$0xff] }
 0x1a9   :  { %1237 = vmatprep.subr.mxu1 %v7332_v40  ;;  %3982 = vmatprep.subr.mxu0 %v7311_v54  ;;  %v5734_v19 = vadd.f32 %v1028_v2, %v1027_v63  ;;  %7355 = vst [vmem:[#allocation46_spill] sm:$0xff] %v5851_v62  ;;  %v5859_v63 = vld [vmem:[#allocation12 + $0x60] sm:$0xff]  ;;  %v5867_v2 = vld [vmem:[#allocation12 + $0x30] sm:$0xff]  ;;  %7361 = vst [vmem:[#allocation93_spill] sm:$0xff] %v5875_v56 }
 0x1aa   :  { %1238 = vmatpush1.msra.mxu1 %v7333_v37  ;;  %1271 = vmatprep.mubr.f32.mxu1 %v7311_v54  ;;  %7357 = vst [vmem:[#allocation89_spill] sm:$0xff] %v5859_v63  ;;  %7359 = vst [vmem:[#allocation91_spill] sm:$0xff] %v5867_v2 }
 0x1ab   :  { %3983 = vmatpush3.msra.mxu0 %v5453_v33  ;;  %3984 = vmatprep.mubr.msk.f32.mxu0 %vm4930_vm1, %v7311_v54 }
 0x1ac   :  { %1272 = vmatmul.mubr.f32.vlgmr.msra.gmra.mxu1 %v5734_v19  ;;  %3985 = vmatmul.mubr.f32.vlgmr.msra.gmra.mxu0 %v5734_v19 }
 0x1ad   :  { %1384 = vmatprep.subr.mxu1 %v5743_v13  ;;  %3987 = vmatprep.subr.mxu0 %v7311_v54 }
 0x1ae   :  { %1385 = vmatpush1.msra.mxu1 %v5747_v3  ;;  %3988 = vmatpush3.msra.mxu0 %v5750_v51 }
 0x1af   :  { %1386 = vmatprep.subr.mxu1 %v5753_v41  ;;  %3989 = vmatprep.subr.mxu0 %v7311_v54 }
 0x1b0   :  { %1387 = vmatpush1.msra.mxu1 %v5757_v6  ;;  %3990 = vmatpush3.msra.mxu0 %v5760_v36 }
 0x1b1   :  { %1388 = vmatprep.subr.mxu1 %v5763_v30  ;;  %3991 = vmatprep.subr.mxu0 %v7311_v54 }
 0x1b2   :  { %1389 = vmatpush1.msra.mxu1 %v5767_v42  ;;  %3992 = vmatpush3.msra.mxu0 %v5770_v44 }
 0x1b3   :  { %1390 = vmatprep.subr.mxu1 %v5773_v0  ;;  %3993 = vmatprep.subr.mxu0 %v7311_v54 }
 0x1b4   :  { %1391 = vmatpush1.msra.mxu1 %v5777_v38  ;;  %3994 = vmatpush3.msra.mxu0 %v5780_v35 }
 0x1b5   :  { %1392 = vmatprep.subr.mxu1 %v5783_v25  ;;  %3995 = vmatprep.subr.mxu0 %v7311_v54 }
 0x1b6   :  { %1393 = vmatpush1.msra.mxu1 %v5787_v59  ;;  %3996 = vmatpush3.msra.mxu0 %v5181_v53  ;;  %v5807_v53 = vld [vmem:[#allocation12 + $0x188] sm:$0xff] }
 0x1b7   :  { %1394 = vmatprep.subr.mxu1 %v5791_v57  ;;  %3997 = vmatprep.subr.mxu0 %v7311_v54  ;;  %7344 = vst [vmem:[#allocation35_spill] sm:$0xff] %v5807_v53 }
 0x1b8   :  { %1395 = vmatpush1.msra.mxu1 %v5795_v52  ;;  %3998 = vmatpush3.msra.mxu0 %v5201_v58  ;;  %v5815_v58 = vld [vmem:[#allocation12 + $0x158] sm:$0xff] }
 0x1b9   :  { %1396 = vmatprep.subr.mxu1 %v5799_v46  ;;  %3999 = vmatprep.subr.mxu0 %v7311_v54  ;;  %7346 = vst [vmem:[#allocation37_spill] sm:$0xff] %v5815_v58 }
 0x1ba   :  { %1397 = vmatpush1.msra.mxu1 %v5803_v47  ;;  %4000 = vmatpush3.msra.mxu0 %v5223_v1  ;;  %v5823_v1 = vld [vmem:[#allocation12 + $0x128] sm:$0xff] }
 0x1bb   :  { %1398 = vmatprep.subr.mxu1 %v5807_v53  ;;  %4001 = vmatprep.subr.mxu0 %v7311_v54  ;;  %7348 = vst [vmem:[#allocation39_spill] sm:$0xff] %v5823_v1 }
 0x1bc   :  { %1399 = vmatpush1.msra.mxu1 %v5811_v45  ;;  %4002 = vmatpush3.msra.mxu0 %v5234_v4  ;;  %v5831_v4 = vld [vmem:[#allocation12 + $0xf8] sm:$0xff] }
 0x1bd   :  { %1400 = vmatprep.subr.mxu1 %v5815_v58  ;;  %4003 = vmatprep.subr.mxu0 %v7311_v54  ;;  %7350 = vst [vmem:[#allocation41_spill] sm:$0xff] %v5831_v4 }
 0x1be   :  { %1401 = vmatpush1.msra.mxu1 %v5819_v39  ;;  %4004 = vmatpush3.msra.mxu0 %v5252_v12  ;;  %v5839_v12 = vld [vmem:[#allocation12 + $0xc8] sm:$0xff] }
 0x1bf   :  { %1402 = vmatprep.subr.mxu1 %v5823_v1  ;;  %4005 = vmatprep.subr.mxu0 %v7311_v54  ;;  %7352 = vst [vmem:[#allocation43_spill] sm:$0xff] %v5839_v12 }
 0x1c0   :  { %1403 = vmatpush1.msra.mxu1 %v5827_v43  ;;  %4006 = vmatpush3.msra.mxu0 %v5263_v16  ;;  %v5847_v16 = vld [vmem:[#allocation12 + $0x98] sm:$0xff] }
 0x1c1   :  { %1404 = vmatprep.subr.mxu1 %v5831_v4  ;;  %4007 = vmatprep.subr.mxu0 %v7311_v54  ;;  %7354 = vst [vmem:[#allocation45_spill] sm:$0xff] %v5847_v16  ;;  %v7363_v4 = vld [vmem:[#allocation75_spill] sm:$0xff] }
 0x1c2   :  { %1405 = vmatpush1.msra.mxu1 %v5835_v34  ;;  %4008 = vmatpush3.msra.mxu0 %v5281_v21  ;;  %v5855_v21 = vld [vmem:[#allocation12 + $0x68] sm:$0xff] }
 0x1c3   :  { %1406 = vmatprep.subr.mxu1 %v5839_v12  ;;  %4009 = vmatprep.subr.mxu0 %v7311_v54  ;;  %7356 = vst [vmem:[#allocation88_spill] sm:$0xff] %v5855_v21 }
 0x1c4   :  { %1407 = vmatpush1.msra.mxu1 %v5843_v61  ;;  %4010 = vmatpush3.msra.mxu0 %v5292_v18  ;;  %v5863_v18 = vld [vmem:[#allocation12 + $0x38] sm:$0xff] }
 0x1c5   :  { %1408 = vmatprep.subr.mxu1 %v5847_v16  ;;  %4011 = vmatprep.subr.mxu0 %v7311_v54  ;;  %7358 = vst [vmem:[#allocation90_spill] sm:$0xff] %v5863_v18 }
 0x1c6   :  { %1409 = vmatpush1.msra.mxu1 %v5851_v62  ;;  %4012 = vmatpush3.msra.mxu0 %v5310_v5  ;;  %v5871_v5 = vld [vmem:[#allocation12 + $0x8] sm:$0xff] }
 0x1c7   :  { %1410 = vmatprep.subr.mxu1 %v5855_v21  ;;  %4013 = vmatprep.subr.mxu0 %v7311_v54  ;;  %7360 = vst [vmem:[#allocation92_spill] sm:$0xff] %v5871_v5 }
 0x1c8   :  { %1411 = vmatpush1.msra.mxu1 %v5859_v63  ;;  %4014 = vmatpush3.msra.mxu0 %v5321_v9  ;;  %v5882_v9 = vld [vmem:[#allocation12 + $0x2f0] sm:$0xff] }
 0x1c9   :  { %1412 = vmatprep.subr.mxu1 %v5863_v18  ;;  %4015 = vmatprep.subr.mxu0 %v7311_v54  ;;  %7362 = vst [vmem:[#allocation94_spill] sm:$0xff] %v5882_v9 }
 0x1ca   :  { %1413 = vmatpush1.msra.mxu1 %v5867_v2  ;;  %4016 = vmatpush3.msra.mxu0 %v5337_v10 }
 0x1cb   :  { %1414 = vmatprep.subr.mxu1 %v5871_v5  ;;  %4017 = vmatprep.subr.mxu0 %v7311_v54 }
 0x1cc   :  { %1415 = vmatpush1.msra.mxu1 %v5875_v56  ;;  %4018 = vmatpush3.msra.mxu0 %v5348_v15 }
 0x1cd   :  { %1448 = vmatprep.mubr.f32.mxu1 %v7311_v54  ;;  %4019 = vmatprep.mubr.msk.f32.mxu0 %vm4930_vm1, %v7311_v54 }
 0x1ce   :  { %1547 = vmatprep.subr.mxu1 %v5882_v9  ;;  %4022 = vmatprep.subr.mxu0 %v7311_v54 }
 0x24b   :  { %v1110_v10 = vpop.f32.mrf.mxu1  ;;  %v1181_v40 = vpop.f32.mrf.mxu0 }
 0x24c   :  { %v1185_v37 = vadd.f32 %v1110_v10, %v5526_v50  ;;  %v1199_v9 = vadd.f32 %v5656_v48, %v1181_v40 }
 0x24d   :  { %v3951_v5 = vpop.f32.mrf.mxu0  ;;  %v1112_v56 = vpop.f32.mrf.mxu1 }
 0x24e   :  { %v3531_v2 = vmul.f32 -1.442695, %v1185_v37  ;;  %v1192_v15 = vadd.f32 %v1112_v56, %v5532_v55  ;;  %v7364_v37 = vld [vmem:[#allocation61_spill] sm:$0xff] }
 0x250   :  { %4456 = vpow2.f32 %v3531_v2  ;;  %v3532_v18 = vmul.f32 -1.442695, %v1192_v15 }
 0x252   :  { %4458 = vpow2.f32 %v3532_v18 }
 0x25d   :  { %v4457_v63 = vpop.eup %4456 }
 0x25e   :  { %v1189_v21 = vadd.f32 1.0, %v4457_v63  ;;  %v7365_v63 = vld [vmem:[#allocation85_spill] sm:$0xff] }
 0x25f   :  { %v4459_v62 = vpop.eup %4458 }
 0x260   :  { %4460 = vrcp.f32 %v1189_v21  ;;  %v1196_v16 = vadd.f32 1.0, %v4459_v62 }
 0x262   :  { %4462 = vrcp.f32 %v1196_v16  ;;  %v5901_v16 = vld [vmem:[#allocation12 + $0x2c0] sm:$0xff] }
 0x26c   :  { %v1273_v61 = vpop.f32.mrf.mxu1  ;;  %v1344_v12 = vpop.f32.mrf.mxu0 }
 0x26d   :  { %v4461_v34 = vpop.eup %4460  ;;  %v1348_v50 = vadd.f32 %v1273_v61, %v7363_v4  ;;  %v5897_v61 = vld [vmem:[#allocation12 + $0x2e8] sm:$0xff] }
 0x26e   :  { %v1200_v5 = vmul.f32 %v4461_v34, %v1199_v9  ;;  %v3986_v10 = vpop.f32.mrf.mxu0  ;;  %v1275_v56 = vpop.f32.mrf.mxu1  ;;  %v5921_v9 = vld [vmem:[#allocation12 + $0x258] sm:$0xff] }
 0x26f   :  { %v3533_v2 = vmul.f32 -1.442695, %v1348_v50  ;;  %v1355_v21 = vadd.f32 %v1275_v56, %v7365_v63  ;;  %v4463_v62 = vpop.eup %4462  ;;  %v5925_v50 = vld [vmem:[#allocation12 + $0x230] sm:$0xff]  ;;  %v5947_v56 = vld [vmem:[#allocation12 + $0x1c8] sm:$0xff]  ;;  %v5951_v63 = vld [vmem:[#allocation12 + $0x1a0] sm:$0xff] }
 0x270   :  { %v1201_v55 = vadd.f32 %v1200_v5, %v7364_v37  ;;  %v1203_v15 = vsub.f32 1.0, %v4463_v62  ;;  %v1205_v4 = vmul.f32 %v4463_v62, %v5663_v49  ;;  %v5930_v5 = vld [vmem:[#allocation12 + $0x228] sm:$0xff]  ;;  %v5938_v37 = vld [vmem:[#allocation12 + $0x1f8] sm:$0xff] }
 0x271   :  { %4464 = vpow2.f32 %v3533_v2  ;;  %v3534_v18 = vmul.f32 -1.442695, %v1355_v21  ;;  %v5934_v2 = vld [vmem:[#allocation12 + $0x200] sm:$0xff]  ;;  %v5959_v21 = vld [vmem:[#allocation12 + $0x170] sm:$0xff]  ;;  %v5971_v62 = vld [vmem:[#allocation12 + $0x138] sm:$0xff] }
 0x272   :  { %4466 = vtanh.f32 %v1201_v55 }
 0x273   :  { %4468 = vpow2.f32 %v3534_v18  ;;  %v5967_v18 = vld [vmem:[#allocation12 + $0x140] sm:$0xff] }
 0x27e   :  { %v4465_v40 = vpop.eup %4464 }
 0x27f   :  { %v4467_v48 = vpop.eup %4466  ;;  %v1352_v43 = vadd.f32 1.0, %v4465_v40  ;;  %v5979_v40 = vld [vmem:[#allocation12 + $0x108] sm:$0xff] }
 0x280   :  { %v1204_v1 = vmul.f32 %v4467_v48, %v1203_v15  ;;  %v5905_v48 = vld [vmem:[#allocation12 + $0x2b8] sm:$0xff]  ;;  %v4469_v49 = vpop.eup %4468 }
 0x281   :  { %4470 = vrcp.f32 %v1352_v43  ;;  %v5917_v43 = vld [vmem:[#allocation12 + $0x260] sm:$0xff]  ;;  %v5987_v15 = vld [vmem:[#allocation12 + $0xd8] sm:$0xff] }
 0x282   :  { %v5893_v34 = vadd.f32 %v1205_v4, %v1204_v1  ;;  %v5909_v1 = vld [vmem:[#allocation12 + $0x290] sm:$0xff] }
 0x283   :  { %v5991_v4 = vld [vmem:[#allocation12 + $0xb0] sm:$0xff] }
 0x284   :  { %1449 = vmatmul.mubr.f32.vlgmr.msra.gmra.mxu1 %v5893_v34  ;;  %4020 = vmatmul.mubr.f32.vlgmr.msra.gmra.mxu0 %v5893_v34 }
 0x285   :  { %1548 = vmatpush1.msra.mxu1 %v5897_v61  ;;  %4023 = vmatpush3.msra.mxu0 %v5363_v17  ;;  %v5913_v17 = vld [vmem:[#allocation12 + $0x288] sm:$0xff] }
 0x286   :  { %1549 = vmatprep.subr.mxu1 %v5901_v16  ;;  %4024 = vmatprep.subr.mxu0 %v7311_v54 }
 0x287   :  { %1550 = vmatpush1.msra.mxu1 %v5905_v48  ;;  %4025 = vmatpush3.msra.mxu0 %v5369_v14  ;;  %v1359_v14 = vadd.f32 1.0, %v4469_v49  ;;  %v5999_v49 = vld [vmem:[#allocation12 + $0x80] sm:$0xff] }
 0x288   :  { %1551 = vmatprep.subr.mxu1 %v5909_v1  ;;  %4026 = vmatprep.subr.mxu0 %v7311_v54 }
 0x289   :  { %1552 = vmatpush1.msra.mxu1 %v5913_v17  ;;  %4027 = vmatpush3.msra.mxu0 %v5375_v7  ;;  %v1362_v7 = vadd.f32 %v5680_v60, %v1344_v12  ;;  %4472 = vrcp.f32 %v1359_v14  ;;  %v5942_v12 = vld [vmem:[#allocation12 + $0x1d0] sm:$0xff] }
 0x28a   :  { %1553 = vmatprep.subr.mxu1 %v5917_v43  ;;  %4028 = vmatprep.subr.mxu0 %v7311_v54 }
 0x28b   :  { %1554 = vmatpush1.msra.mxu1 %v5921_v9  ;;  %4029 = vmatpush3.msra.mxu0 %v5381_v8 }
 0x28c   :  { %1555 = vmatprep.subr.mxu1 %v5925_v50  ;;  %4030 = vmatprep.subr.mxu0 %v7311_v54 }
 0x28d   :  { %1556 = vmatpush1.msra.mxu1 %v5930_v5  ;;  %4031 = vmatpush3.msra.mxu0 %v5387_v20  ;;  %v7366_v20 = vld [vmem:[#allocation86_spill] sm:$0xff] }
 0x28e   :  { %v4471_v10 = vpop.eup %4470  ;;  %1557 = vmatprep.subr.mxu1 %v5934_v2  ;;  %4032 = vmatprep.subr.mxu0 %v7311_v54 }
 0x28f   :  { %v1363_v8 = vmul.f32 %v4471_v10, %v1362_v7  ;;  %1558 = vmatpush1.msra.mxu1 %v5938_v37  ;;  %4033 = vmatpush3.msra.mxu0 %v5393_v11  ;;  %v5955_v11 = vld [vmem:[#allocation12 + $0x198] sm:$0xff]  ;;  %v6007_v10 = vld [vmem:[#allocation12 + $0x50] sm:$0xff] }
 0x290   :  { %1559 = vmatprep.subr.mxu1 %v5942_v12  ;;  %4034 = vmatprep.subr.mxu0 %v7311_v54  ;;  %7367 = vst [vmem:[#allocation75_spill] sm:$0xff] %v6007_v10 }
 0x291   :  { %v1364_v55 = vadd.f32 %v1363_v8, %v7366_v20  ;;  %1560 = vmatpush1.msra.mxu1 %v5947_v56  ;;  %4035 = vmatpush3.msra.mxu0 %v5399_v22  ;;  %v5963_v22 = vld [vmem:[#allocation12 + $0x168] sm:$0xff] }
 0x292   :  { %1561 = vmatprep.subr.mxu1 %v5951_v63  ;;  %4036 = vmatprep.subr.mxu0 %v7311_v54 }
 0x293   :  { %4474 = vtanh.f32 %v1364_v55  ;;  %1562 = vmatpush1.msra.mxu1 %v5955_v11  ;;  %4037 = vmatpush3.msra.mxu0 %v5405_v23  ;;  %v5975_v23 = vld [vmem:[#allocation12 + $0x110] sm:$0xff]  ;;  %v6016_v55 = vld [vmem:[#allocation12 + $0x20] sm:$0xff] }
 0x294   :  { %1563 = vmatprep.subr.mxu1 %v5959_v21  ;;  %4038 = vmatprep.subr.mxu0 %v7311_v54  ;;  %7369 = vst [vmem:[#allocation85_spill] sm:$0xff] %v6016_v55 }
 0x295   :  { %1564 = vmatpush1.msra.mxu1 %v5963_v22  ;;  %4039 = vmatpush3.msra.mxu0 %v5411_v24  ;;  %v5983_v24 = vld [vmem:[#allocation12 + $0xe0] sm:$0xff] }
 0x296   :  { %1565 = vmatprep.subr.mxu1 %v5967_v18  ;;  %4040 = vmatprep.subr.mxu0 %v7311_v54 }
 0x297   :  { %1566 = vmatpush1.msra.mxu1 %v5971_v62  ;;  %4041 = vmatpush3.msra.mxu0 %v5417_v26  ;;  %v4473_v26 = vpop.eup %4472 }
 0x298   :  { %1567 = vmatprep.subr.mxu1 %v5975_v23  ;;  %4042 = vmatprep.subr.mxu0 %v7311_v54  ;;  %v1366_v14 = vsub.f32 1.0, %v4473_v26  ;;  %v1368_v20 = vmul.f32 %v4473_v26, %v5734_v19  ;;  %v6062_v19 = vld [vmem:[#allocation12 + $0x1c0] sm:$0xff]  ;;  %v6068_v26 = vld [vmem:[#allocation12 + $0x190] sm:$0xff] }
 0x299   :  { %1568 = vmatpush1.msra.mxu1 %v5979_v40  ;;  %4043 = vmatpush3.msra.mxu0 %v5423_v27  ;;  %v5995_v27 = vld [vmem:[#allocation12 + $0xa8] sm:$0xff]  ;;  %7373 = vst [vmem:[#allocation97_spill] sm:$0xff] %v6062_v19  ;;  %7374 = vst [vmem:[#allocation98_spill] sm:$0xff] %v6068_v26 }
 0x29a   :  { %1569 = vmatprep.subr.mxu1 %v5983_v24  ;;  %4044 = vmatprep.subr.mxu0 %v7311_v54 }
 0x29b   :  { %1570 = vmatpush1.msra.mxu1 %v5987_v15  ;;  %4045 = vmatpush3.msra.mxu0 %v5429_v28  ;;  %v6003_v28 = vld [vmem:[#allocation12 + $0x78] sm:$0xff] }
 0x29c   :  { %1571 = vmatprep.subr.mxu1 %v5991_v4  ;;  %4046 = vmatprep.subr.mxu0 %v7311_v54 }
 0x29d   :  { %1572 = vmatpush1.msra.mxu1 %v5995_v27  ;;  %4047 = vmatpush3.msra.mxu0 %v5435_v29  ;;  %v6011_v29 = vld [vmem:[#allocation12 + $0x48] sm:$0xff] }
 0x29e   :  { %1573 = vmatprep.subr.mxu1 %v5999_v49  ;;  %4048 = vmatprep.subr.mxu0 %v7311_v54  ;;  %7368 = vst [vmem:[#allocation61_spill] sm:$0xff] %v6011_v29 }
 0x29f   :  { %1574 = vmatpush1.msra.mxu1 %v6003_v28  ;;  %4049 = vmatpush3.msra.mxu0 %v5441_v31  ;;  %v6020_v31 = vld [vmem:[#allocation12 + $0x18] sm:$0xff] }
 0x2a0   :  { %v4475_v7 = vpop.eup %4474  ;;  %1575 = vmatprep.subr.mxu1 %v6007_v10  ;;  %4050 = vmatprep.subr.mxu0 %v7311_v54  ;;  %7370 = vst [vmem:[#allocation86_spill] sm:$0xff] %v6020_v31 }
 0x2a1   :  { %1576 = vmatpush1.msra.mxu1 %v6011_v29  ;;  %4051 = vmatpush3.msra.mxu0 %v5447_v32  ;;  %v1367_v8 = vmul.f32 %v4475_v7, %v1366_v14  ;;  %v6050_v32 = vld [vmem:[#allocation12 + $0x220] sm:$0xff] }
 0x2a2   :  { %1577 = vmatprep.subr.mxu1 %v6016_v55  ;;  %4052 = vmatprep.subr.mxu0 %v7311_v54  ;;  %7371 = vst [vmem:[#allocation95_spill] sm:$0xff] %v6050_v32  ;;  %v6074_v14 = vld [vmem:[#allocation12 + $0x160] sm:$0xff] }
 0x2a3   :  { %1578 = vmatpush1.msra.mxu1 %v6020_v31  ;;  %1611 = vmatprep.mubr.f32.mxu1 %v7311_v54  ;;  %v6024_v10 = vadd.f32 %v1368_v20, %v1367_v8  ;;  %7375 = vst [vmem:[#allocation99_spill] sm:$0xff] %v6074_v14  ;;  %v7376_v7 = vld [vmem:[#allocation39_spill] sm:$0xff]  ;;  %v7377_v8 = vld [vmem:[#allocation40_spill] sm:$0xff]  ;;  %v6080_v20 = vld [vmem:[#allocation12 + $0x130] sm:$0xff] }
 0x2a4   :  { %4053 = vmatpush3.msra.mxu0 %v5453_v33  ;;  %4054 = vmatprep.mubr.msk.f32.mxu0 %vm4930_vm1, %v7311_v54  ;;  %v6056_v33 = vld [vmem:[#allocation12 + $0x1f0] sm:$0xff]  ;;  %7378 = vst [vmem:[#allocation100_spill] sm:$0xff] %v6080_v20 }
 0x2a5   :  { %1612 = vmatmul.mubr.f32.vlgmr.msra.gmra.mxu1 %v6024_v10  ;;  %4055 = vmatmul.mubr.f32.vlgmr.msra.gmra.mxu0 %v6024_v10  ;;  %7372 = vst [vmem:[#allocation96_spill] sm:$0xff] %v6056_v33 }
 0x2a6   :  { %1724 = vmatprep.subr.mxu1 %v5743_v13  ;;  %4057 = vmatprep.subr.mxu0 %v7311_v54 }
 0x2a7   :  { %1725 = vmatpush1.msra.mxu1 %v5747_v3  ;;  %4058 = vmatpush3.msra.mxu0 %v5750_v51 }
 0x2a8   :  { %1726 = vmatprep.subr.mxu1 %v5753_v41  ;;  %4059 = vmatprep.subr.mxu0 %v7311_v54 }
 0x2a9   :  { %1727 = vmatpush1.msra.mxu1 %v5757_v6  ;;  %4060 = vmatpush3.msra.mxu0 %v5760_v36 }
 0x2aa   :  { %1728 = vmatprep.subr.mxu1 %v5763_v30  ;;  %4061 = vmatprep.subr.mxu0 %v7311_v54 }
 0x2ab   :  { %1729 = vmatpush1.msra.mxu1 %v5767_v42  ;;  %4062 = vmatpush3.msra.mxu0 %v5770_v44 }
 0x2ac   :  { %1730 = vmatprep.subr.mxu1 %v5773_v0  ;;  %4063 = vmatprep.subr.mxu0 %v7311_v54 }
 0x2ad   :  { %1731 = vmatpush1.msra.mxu1 %v5777_v38  ;;  %4064 = vmatpush3.msra.mxu0 %v5780_v35  ;;  %v7401_v38 = vld [vmem:[#allocation73_spill] sm:$0xff] }
 0x2ae   :  { %1732 = vmatprep.subr.mxu1 %v5783_v25  ;;  %4065 = vmatprep.subr.mxu0 %v7311_v54 }
 0x2af   :  { %1733 = vmatpush1.msra.mxu1 %v5787_v59  ;;  %4066 = vmatpush3.msra.mxu0 %v6050_v32 }
 0x2b0   :  { %1734 = vmatprep.subr.mxu1 %v5791_v57  ;;  %4067 = vmatprep.subr.mxu0 %v7311_v54 }
 0x2b1   :  { %1735 = vmatpush1.msra.mxu1 %v5795_v52  ;;  %4068 = vmatpush3.msra.mxu0 %v6056_v33 }
 0x2b2   :  { %1736 = vmatprep.subr.mxu1 %v5799_v46  ;;  %4069 = vmatprep.subr.mxu0 %v7311_v54 }
 0x2b3   :  { %1737 = vmatpush1.msra.mxu1 %v5803_v47  ;;  %4070 = vmatpush3.msra.mxu0 %v6062_v19  ;;  %v7399_v19 = vld [vmem:[#allocation55_spill] sm:$0xff] }
 0x2b4   :  { %1738 = vmatprep.subr.mxu1 %v5807_v53  ;;  %4071 = vmatprep.subr.mxu0 %v7311_v54 }
 0x2b5   :  { %1739 = vmatpush1.msra.mxu1 %v5811_v45  ;;  %4072 = vmatpush3.msra.mxu0 %v6068_v26  ;;  %v7379_v26 = vld [vmem:[#allocation41_spill] sm:$0xff] }
 0x2b6   :  { %1740 = vmatprep.subr.mxu1 %v5815_v58  ;;  %4073 = vmatprep.subr.mxu0 %v7311_v54  ;;  %v7380_v58 = vld [vmem:[#allocation42_spill] sm:$0xff] }
 0x2b7   :  { %1741 = vmatpush1.msra.mxu1 %v5819_v39  ;;  %4074 = vmatpush3.msra.mxu0 %v6074_v14  ;;  %v6086_v39 = vld [vmem:[#allocation12 + $0x100] sm:$0xff] }
 0x2b8   :  { %1742 = vmatprep.subr.mxu1 %v7376_v7  ;;  %4075 = vmatprep.subr.mxu0 %v7311_v54  ;;  %7381 = vst [vmem:[#allocation101_spill] sm:$0xff] %v6086_v39  ;;  %v7382_v14 = vld [vmem:[#allocation43_spill] sm:$0xff]  ;;  %v7383_v7 = vld [vmem:[#allocation44_spill] sm:$0xff] }
 0x2b9   :  { %1743 = vmatpush1.msra.mxu1 %v7377_v8  ;;  %4076 = vmatpush3.msra.mxu0 %v6080_v20  ;;  %v6092_v8 = vld [vmem:[#allocation12 + $0xd0] sm:$0xff] }
 0x2ba   :  { %1744 = vmatprep.subr.mxu1 %v7379_v26  ;;  %4077 = vmatprep.subr.mxu0 %v7311_v54  ;;  %7384 = vst [vmem:[#allocation102_spill] sm:$0xff] %v6092_v8  ;;  %v7385_v20 = vld [vmem:[#allocation45_spill] sm:$0xff]  ;;  %v7386_v26 = vld [vmem:[#allocation46_spill] sm:$0xff] }
 0x2bb   :  { %1745 = vmatpush1.msra.mxu1 %v7380_v58  ;;  %4078 = vmatpush3.msra.mxu0 %v6086_v39  ;;  %v6098_v58 = vld [vmem:[#allocation12 + $0xa0] sm:$0xff]  ;;  %v7388_v39 = vld [vmem:[#allocation88_spill] sm:$0xff] }
 0x2bc   :  { %1746 = vmatprep.subr.mxu1 %v7382_v14  ;;  %4079 = vmatprep.subr.mxu0 %v7311_v54  ;;  %7387 = vst [vmem:[#allocation103_spill] sm:$0xff] %v6098_v58  ;;  %v7389_v14 = vld [vmem:[#allocation89_spill] sm:$0xff] }
 0x2bd   :  { %1747 = vmatpush1.msra.mxu1 %v7383_v7  ;;  %4080 = vmatpush3.msra.mxu0 %v6092_v8  ;;  %v6104_v7 = vld [vmem:[#allocation12 + $0x70] sm:$0xff]  ;;  %v7391_v8 = vld [vmem:[#allocation90_spill] sm:$0xff] }
 0x2be   :  { %1748 = vmatprep.subr.mxu1 %v7385_v20  ;;  %4081 = vmatprep.subr.mxu0 %v7311_v54  ;;  %7390 = vst [vmem:[#allocation104_spill] sm:$0xff] %v6104_v7  ;;  %v7392_v20 = vld [vmem:[#allocation91_spill] sm:$0xff] }
 0x2bf   :  { %1749 = vmatpush1.msra.mxu1 %v7386_v26  ;;  %4082 = vmatpush3.msra.mxu0 %v6098_v58  ;;  %v6110_v26 = vld [vmem:[#allocation12 + $0x40] sm:$0xff]  ;;  %v7394_v58 = vld [vmem:[#allocation92_spill] sm:$0xff] }
 0x2c0   :  { %1750 = vmatprep.subr.mxu1 %v7388_v39  ;;  %4083 = vmatprep.subr.mxu0 %v7311_v54  ;;  %7393 = vst [vmem:[#allocation105_spill] sm:$0xff] %v6110_v26  ;;  %v7395_v39 = vld [vmem:[#allocation93_spill] sm:$0xff] }
 0x2c1   :  { %1751 = vmatpush1.msra.mxu1 %v7389_v14  ;;  %4084 = vmatpush3.msra.mxu0 %v6104_v7  ;;  %v6116_v14 = vld [vmem:[#allocation12 + $0x10] sm:$0xff] }
 0x2c2   :  { %1752 = vmatprep.subr.mxu1 %v7391_v8  ;;  %4085 = vmatprep.subr.mxu0 %v7311_v54  ;;  %7396 = vst [vmem:[#allocation106_spill] sm:$0xff] %v6116_v14 }
 0x2c3   :  { %1753 = vmatpush1.msra.mxu1 %v7392_v20  ;;  %4086 = vmatpush3.msra.mxu0 %v6110_v26  ;;  %v7397_v20 = vld [vmem:[#allocation94_spill] sm:$0xff] }
 0x2c4   :  { %1754 = vmatprep.subr.mxu1 %v7394_v58  ;;  %4087 = vmatprep.subr.mxu0 %v7311_v54  ;;  %v7398_v58 = vld [vmem:[#allocation53_spill] sm:$0xff] }
 0x2c5   :  { %1755 = vmatpush1.msra.mxu1 %v7395_v39  ;;  %4088 = vmatpush3.msra.mxu0 %v6116_v14 }
 0x2c6   :  { %1788 = vmatprep.mubr.f32.mxu1 %v7311_v54  ;;  %4089 = vmatprep.mubr.msk.f32.mxu0 %vm4930_vm1, %v7311_v54 }
 0x2c7   :  { %1887 = vmatprep.subr.mxu1 %v7397_v20  ;;  %4092 = vmatprep.subr.mxu0 %v7311_v54  ;;  %v7400_v20 = vld [vmem:[#allocation87_spill] sm:$0xff] }
 0x344   :  { %v1450_v26 = vpop.f32.mrf.mxu1  ;;  %v1521_v8 = vpop.f32.mrf.mxu0 }
 0x345   :  { %v1525_v7 = vadd.f32 %v1450_v26, %v7398_v58  ;;  %v1539_v32 = vadd.f32 %v7400_v20, %v1521_v8 }
 0x346   :  { %v4021_v45 = vpop.f32.mrf.mxu0  ;;  %v1452_v39 = vpop.f32.mrf.mxu1 }
 0x347   :  { %v3535_v53 = vmul.f32 -1.442695, %v1525_v7  ;;  %v1532_v47 = vadd.f32 %v1452_v39, %v7399_v19  ;;  %v7402_v7 = vld [vmem:[#allocation64_spill] sm:$0xff] }
 0x349   :  { %4476 = vpow2.f32 %v3535_v53  ;;  %v3536_v14 = vmul.f32 -1.442695, %v1532_v47 }
 0x34b   :  { %4478 = vpow2.f32 %v3536_v14 }
 0x356   :  { %v4477_v46 = vpop.eup %4476 }
 0x357   :  { %v1529_v33 = vadd.f32 1.0, %v4477_v46  ;;  %v7403_v46 = vld [vmem:[#allocation83_spill] sm:$0xff] }
 0x358   :  { %v4479_v52 = vpop.eup %4478 }
 0x359   :  { %4480 = vrcp.f32 %v1529_v33  ;;  %v1536_v57 = vadd.f32 1.0, %v4479_v52 }
 0x35b   :  { %4482 = vrcp.f32 %v1536_v57  ;;  %v6142_v57 = vld [vmem:[#allocation12 + $0x2c8] sm:$0xff] }
 0x365   :  { %v1613_v59 = vpop.f32.mrf.mxu1  ;;  %v1684_v25 = vpop.f32.mrf.mxu0 }
 0x366   :  { %v4481_v35 = vpop.eup %4480  ;;  %v1688_v58 = vadd.f32 %v1613_v59, %v7401_v38  ;;  %v6136_v59 = vld [vmem:[#allocation12 + $0x2f8] sm:$0xff] }
 0x367   :  { %v1540_v45 = vmul.f32 %v4481_v35, %v1539_v32  ;;  %v4056_v26 = vpop.f32.mrf.mxu0  ;;  %v1615_v47 = vpop.f32.mrf.mxu1  ;;  %v6154_v32 = vld [vmem:[#allocation12 + $0x268] sm:$0xff] }
 0x368   :  { %v3537_v53 = vmul.f32 -1.442695, %v1688_v58  ;;  %v1695_v33 = vadd.f32 %v1615_v47, %v7403_v46  ;;  %v4483_v52 = vpop.eup %4482  ;;  %v1702_v58 = vadd.f32 %v5680_v60, %v1684_v25  ;;  %v7404_v60 = vld [vmem:[#allocation84_spill] sm:$0xff]  ;;  %v6186_v46 = vld [vmem:[#allocation12 + $0x178] sm:$0xff] }
 0x369   :  { %v1541_v39 = vadd.f32 %v1540_v45, %v7402_v7  ;;  %v1543_v8 = vsub.f32 1.0, %v4483_v52  ;;  %v1545_v38 = vmul.f32 %v4483_v52, %v5893_v34  ;;  %v6161_v45 = vld [vmem:[#allocation12 + $0x238] sm:$0xff]  ;;  %v6167_v7 = vld [vmem:[#allocation12 + $0x208] sm:$0xff] }
 0x36a   :  { %4484 = vpow2.f32 %v3537_v53  ;;  %v3538_v19 = vmul.f32 -1.442695, %v1695_v33  ;;  %v6180_v47 = vld [vmem:[#allocation12 + $0x1a8] sm:$0xff] }
 0x36b   :  { %4486 = vtanh.f32 %v1541_v39  ;;  %v6174_v39 = vld [vmem:[#allocation12 + $0x1d8] sm:$0xff]  ;;  %v6192_v33 = vld [vmem:[#allocation12 + $0x148] sm:$0xff] }
 0x36c   :  { %4488 = vpow2.f32 %v3538_v19  ;;  %v6198_v19 = vld [vmem:[#allocation12 + $0x118] sm:$0xff]  ;;  %v6204_v52 = vld [vmem:[#allocation12 + $0xe8] sm:$0xff] }
 0x377   :  { %v4485_v14 = vpop.eup %4484 }
 0x378   :  { %v4487_v20 = vpop.eup %4486  ;;  %v1692_v0 = vadd.f32 1.0, %v4485_v14 }
 0x379   :  { %v1544_v44 = vmul.f32 %v4487_v20, %v1543_v8  ;;  %v6210_v8 = vld [vmem:[#allocation12 + $0xb8] sm:$0xff]  ;;  %v6216_v20 = vld [vmem:[#allocation12 + $0x88] sm:$0xff] }
 0x37a   :  { %4490 = vrcp.f32 %v1692_v0  ;;  %v6148_v0 = vld [vmem:[#allocation12 + $0x298] sm:$0xff]  ;;  %7405 = vst [vmem:[#allocation53_spill] sm:$0xff] %v6216_v20 }
 0x37b   :  { %v6131_v35 = vadd.f32 %v1545_v38, %v1544_v44  ;;  %v4489_v44 = vpop.eup %4488 }
 0x37c   :  { %v1699_v34 = vadd.f32 1.0, %v4489_v44 }
 0x37d   :  { %1789 = vmatmul.mubr.f32.vlgmr.msra.gmra.mxu1 %v6131_v35  ;;  %4090 = vmatmul.mubr.f32.vlgmr.msra.gmra.mxu0 %v6131_v35 }
 0x37e   :  { %1888 = vmatpush1.msra.mxu1 %v5897_v61  ;;  %4093 = vmatpush3.msra.mxu0 %v6136_v59  ;;  %4492 = vrcp.f32 %v1699_v34  ;;  %v7406_v34 = vld [vmem:[#allocation75_spill] sm:$0xff] }
 0x37f   :  { %1889 = vmatprep.subr.mxu1 %v5901_v16  ;;  %4094 = vmatprep.subr.mxu0 %v7311_v54 }
 0x380   :  { %1890 = vmatpush1.msra.mxu1 %v5905_v48  ;;  %4095 = vmatpush3.msra.mxu0 %v6142_v57 }
 0x381   :  { %1891 = vmatprep.subr.mxu1 %v5909_v1  ;;  %4096 = vmatprep.subr.mxu0 %v7311_v54 }
 0x382   :  { %1892 = vmatpush1.msra.mxu1 %v5913_v17  ;;  %4097 = vmatpush3.msra.mxu0 %v6148_v0 }
 0x383   :  { %1893 = vmatprep.subr.mxu1 %v5917_v43  ;;  %4098 = vmatprep.subr.mxu0 %v7311_v54 }
 0x384   :  { %1894 = vmatpush1.msra.mxu1 %v5921_v9  ;;  %4099 = vmatpush3.msra.mxu0 %v6154_v32 }
 0x385   :  { %1895 = vmatprep.subr.mxu1 %v5925_v50  ;;  %4100 = vmatprep.subr.mxu0 %v7311_v54 }
 0x386   :  { %1896 = vmatpush1.msra.mxu1 %v5930_v5  ;;  %4101 = vmatpush3.msra.mxu0 %v6161_v45 }
 0x387   :  { %v4491_v26 = vpop.eup %4490  ;;  %1897 = vmatprep.subr.mxu1 %v5934_v2  ;;  %4102 = vmatprep.subr.mxu0 %v7311_v54 }
 0x388   :  { %v1703_v53 = vmul.f32 %v4491_v26, %v1702_v58  ;;  %1898 = vmatpush1.msra.mxu1 %v5938_v37  ;;  %4103 = vmatpush3.msra.mxu0 %v6167_v7  ;;  %v6222_v58 = vld [vmem:[#allocation12 + $0x58] sm:$0xff] }
 0x389   :  { %1899 = vmatprep.subr.mxu1 %v5942_v12  ;;  %4104 = vmatprep.subr.mxu0 %v7311_v54  ;;  %7407 = vst [vmem:[#allocation55_spill] sm:$0xff] %v6222_v58 }
 0x38a   :  { %v1704_v25 = vadd.f32 %v1703_v53, %v7404_v60  ;;  %1900 = vmatpush1.msra.mxu1 %v5947_v56  ;;  %4105 = vmatpush3.msra.mxu0 %v6174_v39 }
 0x38b   :  { %1901 = vmatprep.subr.mxu1 %v5951_v63  ;;  %4106 = vmatprep.subr.mxu0 %v7311_v54  ;;  %v4493_v14 = vpop.eup %4492 }
 0x38c   :  { %4494 = vtanh.f32 %v1704_v25  ;;  %1902 = vmatpush1.msra.mxu1 %v5955_v11  ;;  %4107 = vmatpush3.msra.mxu0 %v6180_v47  ;;  %v1706_v38 = vsub.f32 1.0, %v4493_v14  ;;  %v1708_v53 = vmul.f32 %v4493_v14, %v6024_v10  ;;  %v6232_v25 = vld [vmem:[#allocation12 + $0x28] sm:$0xff]  ;;  %v7411_v10 = vld [vmem:[#allocation26_spill] sm:$0xff] }
 0x38d   :  { %1903 = vmatprep.subr.mxu1 %v5959_v21  ;;  %4108 = vmatprep.subr.mxu0 %v7311_v54  ;;  %7409 = vst [vmem:[#allocation73_spill] sm:$0xff] %v6232_v25  ;;  %v7419_v14 = vld [vmem:[#allocation96_spill] sm:$0xff] }
 0x38e   :  { %1904 = vmatpush1.msra.mxu1 %v5963_v22  ;;  %4109 = vmatpush3.msra.mxu0 %v6186_v46 }
 0x38f   :  { %1905 = vmatprep.subr.mxu1 %v5967_v18  ;;  %4110 = vmatprep.subr.mxu0 %v7311_v54 }
 0x390   :  { %1906 = vmatpush1.msra.mxu1 %v5971_v62  ;;  %4111 = vmatpush3.msra.mxu0 %v6192_v33 }
 0x391   :  { %1907 = vmatprep.subr.mxu1 %v5975_v23  ;;  %4112 = vmatprep.subr.mxu0 %v7311_v54 }
 0x392   :  { %1908 = vmatpush1.msra.mxu1 %v5979_v40  ;;  %4113 = vmatpush3.msra.mxu0 %v6198_v19 }
 0x393   :  { %1909 = vmatprep.subr.mxu1 %v5983_v24  ;;  %4114 = vmatprep.subr.mxu0 %v7311_v54 }
 0x394   :  { %1910 = vmatpush1.msra.mxu1 %v5987_v15  ;;  %4115 = vmatpush3.msra.mxu0 %v6204_v52 }
 0x395   :  { %1911 = vmatprep.subr.mxu1 %v5991_v4  ;;  %4116 = vmatprep.subr.mxu0 %v7311_v54 }
 0x396   :  { %1912 = vmatpush1.msra.mxu1 %v5995_v27  ;;  %4117 = vmatpush3.msra.mxu0 %v6210_v8 }
 0x397   :  { %1913 = vmatprep.subr.mxu1 %v5999_v49  ;;  %4118 = vmatprep.subr.mxu0 %v7311_v54 }
 0x398   :  { %1914 = vmatpush1.msra.mxu1 %v6003_v28  ;;  %4119 = vmatpush3.msra.mxu0 %v6216_v20 }
 0x399   :  { %v4495_v44 = vpop.eup %4494  ;;  %1915 = vmatprep.subr.mxu1 %v7406_v34  ;;  %4120 = vmatprep.subr.mxu0 %v7311_v54 }
 0x39a   :  { %1916 = vmatpush1.msra.mxu1 %v6011_v29  ;;  %4121 = vmatpush3.msra.mxu0 %v6222_v58  ;;  %v1707_v26 = vmul.f32 %v4495_v44, %v1706_v38  ;;  %v7420_v38 = vld [vmem:[#allocation33_spill] sm:$0xff]  ;;  %v7421_v44 = vld [vmem:[#allocation34_spill] sm:$0xff] }
 0x39b   :  { %1917 = vmatprep.subr.mxu1 %v6016_v55  ;;  %4122 = vmatprep.subr.mxu0 %v7311_v54 }
 0x39c   :  { %1918 = vmatpush1.msra.mxu1 %v6020_v31  ;;  %1951 = vmatprep.mubr.f32.mxu1 %v7311_v54  ;;  %v6230_v60 = vadd.f32 %v1708_v53, %v1707_v26  ;;  %v7422_v26 = vld [vmem:[#allocation97_spill] sm:$0xff]  ;;  %v7423_v53 = vld [vmem:[#allocation35_spill] sm:$0xff] }
 0x39d   :  { %4123 = vmatpush3.msra.mxu0 %v6232_v25  ;;  %4124 = vmatprep.mubr.msk.f32.mxu0 %vm4930_vm1, %v7311_v54 }
 0x39e   :  { %7408 = vst [vmem:[#allocation87_spill] sm:$0xff] %v6230_v60  ;;  %1952 = vmatmul.mubr.f32.vlgmr.msra.gmra.mxu1 %v6230_v60  ;;  %4125 = vmatmul.mubr.f32.vlgmr.msra.gmra.mxu0 %v6230_v60 }
 0x39f   :  { %2050 = vmatprep.subr.mxu1 %v5743_v13  ;;  %4127 = vmatprep.subr.mxu0 %v7311_v54  ;;  %v7410_v13 = vld [vmem:[#allocation25_spill] sm:$0xff] }
 0x3a0   :  { %2051 = vmatpush1.msra.mxu1 %v5747_v3  ;;  %4128 = vmatpush3.msra.mxu0 %v5750_v51  ;;  %v7412_v3 = vld [vmem:[#allocation27_spill] sm:$0xff]  ;;  %v7413_v51 = vld [vmem:[#allocation28_spill] sm:$0xff] }
 0x3a1   :  { %2052 = vmatprep.subr.mxu1 %v5753_v41  ;;  %4129 = vmatprep.subr.mxu0 %v7311_v54  ;;  %v7414_v41 = vld [vmem:[#allocation29_spill] sm:$0xff] }
 0x3a2   :  { %2053 = vmatpush1.msra.mxu1 %v5757_v6  ;;  %4130 = vmatpush3.msra.mxu0 %v5760_v36  ;;  %v7415_v6 = vld [vmem:[#allocation30_spill] sm:$0xff]  ;;  %v7416_v36 = vld [vmem:[#allocation95_spill] sm:$0xff] }
 0x3a3   :  { %2054 = vmatprep.subr.mxu1 %v5763_v30  ;;  %4131 = vmatprep.subr.mxu0 %v7311_v54  ;;  %v7417_v30 = vld [vmem:[#allocation31_spill] sm:$0xff] }
 0x3a4   :  { %2055 = vmatpush1.msra.mxu1 %v5767_v42  ;;  %4132 = vmatpush3.msra.mxu0 %v7410_v13  ;;  %v7418_v42 = vld [vmem:[#allocation32_spill] sm:$0xff] }
 0x3a5   :  { %2056 = vmatprep.subr.mxu1 %v7411_v10  ;;  %4133 = vmatprep.subr.mxu0 %v7311_v54  ;;  %v7424_v13 = vld [vmem:[#allocation36_spill] sm:$0xff]  ;;  %v7425_v10 = vld [vmem:[#allocation98_spill] sm:$0xff] }
 0x3a6   :  { %2057 = vmatpush1.msra.mxu1 %v7412_v3  ;;  %4134 = vmatpush3.msra.mxu0 %v7413_v51  ;;  %v7426_v3 = vld [vmem:[#allocation37_spill] sm:$0xff]  ;;  %v7427_v51 = vld [vmem:[#allocation38_spill] sm:$0xff] }
 0x3a7   :  { %2058 = vmatprep.subr.mxu1 %v7414_v41  ;;  %4135 = vmatprep.subr.mxu0 %v7311_v54  ;;  %v7428_v41 = vld [vmem:[#allocation99_spill] sm:$0xff] }
 0x3a8   :  { %2059 = vmatpush1.msra.mxu1 %v7415_v6  ;;  %4136 = vmatpush3.msra.mxu0 %v7416_v36  ;;  %v7429_v6 = vld [vmem:[#allocation39_spill] sm:$0xff] }
 0x3a9   :  { %2060 = vmatprep.subr.mxu1 %v7417_v30  ;;  %4137 = vmatprep.subr.mxu0 %v7311_v54  ;;  %v7430_v30 = vld [vmem:[#allocation40_spill] sm:$0xff] }
 0x3aa   :  { %2061 = vmatpush1.msra.mxu1 %v7418_v42  ;;  %4138 = vmatpush3.msra.mxu0 %v7419_v14  ;;  %v7431_v42 = vld [vmem:[#allocation100_spill] sm:$0xff] }
 0x3ab   :  { %2062 = vmatprep.subr.mxu1 %v7420_v38  ;;  %4139 = vmatprep.subr.mxu0 %v7311_v54  ;;  %v7432_v38 = vld [vmem:[#allocation41_spill] sm:$0xff] }
 0x3ac   :  { %2063 = vmatpush1.msra.mxu1 %v7421_v44  ;;  %4140 = vmatpush3.msra.mxu0 %v7422_v26  ;;  %v7433_v44 = vld [vmem:[#allocation42_spill] sm:$0xff] }
 0x3ad   :  { %2064 = vmatprep.subr.mxu1 %v7423_v53  ;;  %4141 = vmatprep.subr.mxu0 %v7311_v54  ;;  %v7434_v53 = vld [vmem:[#allocation101_spill] sm:$0xff] }
 0x3ae   :  { %2065 = vmatpush1.msra.mxu1 %v7424_v13  ;;  %4142 = vmatpush3.msra.mxu0 %v7425_v10  ;;  %v7435_v13 = vld [vmem:[#allocation43_spill] sm:$0xff] }
 0x3af   :  { %2066 = vmatprep.subr.mxu1 %v7426_v3  ;;  %4143 = vmatprep.subr.mxu0 %v7311_v54  ;;  %v7436_v3 = vld [vmem:[#allocation44_spill] sm:$0xff] }
 0x3b0   :  { %2067 = vmatpush1.msra.mxu1 %v7427_v51  ;;  %4144 = vmatpush3.msra.mxu0 %v7428_v41  ;;  %v7437_v51 = vld [vmem:[#allocation102_spill] sm:$0xff] }
 0x3b1   :  { %2068 = vmatprep.subr.mxu1 %v7429_v6  ;;  %4145 = vmatprep.subr.mxu0 %v7311_v54  ;;  %v7438_v6 = vld [vmem:[#allocation45_spill] sm:$0xff] }
 0x3b2   :  { %2069 = vmatpush1.msra.mxu1 %v7430_v30  ;;  %4146 = vmatpush3.msra.mxu0 %v7431_v42  ;;  %v7439_v30 = vld [vmem:[#allocation46_spill] sm:$0xff]  ;;  %v7441_v42 = vld [vmem:[#allocation88_spill] sm:$0xff] }
 0x3b3   :  { %2070 = vmatprep.subr.mxu1 %v7432_v38  ;;  %4147 = vmatprep.subr.mxu0 %v7311_v54  ;;  %v7440_v38 = vld [vmem:[#allocation103_spill] sm:$0xff] }
 0x3b4   :  { %2071 = vmatpush1.msra.mxu1 %v7433_v44  ;;  %4148 = vmatpush3.msra.mxu0 %v7434_v53  ;;  %v7442_v44 = vld [vmem:[#allocation89_spill] sm:$0xff]  ;;  %v7444_v53 = vld [vmem:[#allocation90_spill] sm:$0xff] }
 0x3b5   :  { %2072 = vmatprep.subr.mxu1 %v7435_v13  ;;  %4149 = vmatprep.subr.mxu0 %v7311_v54  ;;  %v7443_v13 = vld [vmem:[#allocation104_spill] sm:$0xff] }
 0x3b6   :  { %2073 = vmatpush1.msra.mxu1 %v7436_v3  ;;  %4150 = vmatpush3.msra.mxu0 %v7437_v51  ;;  %v7445_v3 = vld [vmem:[#allocation91_spill] sm:$0xff]  ;;  %v7447_v51 = vld [vmem:[#allocation92_spill] sm:$0xff] }
 0x3b7   :  { %2074 = vmatprep.subr.mxu1 %v7438_v6  ;;  %4151 = vmatprep.subr.mxu0 %v7311_v54  ;;  %v7446_v6 = vld [vmem:[#allocation105_spill] sm:$0xff] }
 0x3b8   :  { %2075 = vmatpush1.msra.mxu1 %v7439_v30  ;;  %4152 = vmatpush3.msra.mxu0 %v7440_v38  ;;  %v7448_v30 = vld [vmem:[#allocation93_spill] sm:$0xff] }
 0x3b9   :  { %2076 = vmatprep.subr.mxu1 %v7441_v42  ;;  %4153 = vmatprep.subr.mxu0 %v7311_v54  ;;  %v7449_v42 = vld [vmem:[#allocation106_spill] sm:$0xff] }
 0x3ba   :  { %2077 = vmatpush1.msra.mxu1 %v7442_v44  ;;  %4154 = vmatpush3.msra.mxu0 %v7443_v13 }
 0x3bb   :  { %2078 = vmatprep.subr.mxu1 %v7444_v53  ;;  %4155 = vmatprep.subr.mxu0 %v7311_v54  ;;  %v7450_v53 = vld [vmem:[#allocation94_spill] sm:$0xff] }
 0x3bc   :  { %2079 = vmatpush1.msra.mxu1 %v7445_v3  ;;  %4156 = vmatpush3.msra.mxu0 %v7446_v6  ;;  %v7451_v6 = vld [vmem:[#allocation57_spill] sm:$0xff] }
 0x3bd   :  { %2080 = vmatprep.subr.mxu1 %v7447_v51  ;;  %4157 = vmatprep.subr.mxu0 %v7311_v54 }
 0x3be   :  { %2081 = vmatpush1.msra.mxu1 %v7448_v30  ;;  %4158 = vmatpush3.msra.mxu0 %v7449_v42  ;;  %v7452_v30 = vld [vmem:[#allocation58_spill] sm:$0xff] }
 0x3bf   :  { %2114 = vmatprep.mubr.f32.mxu1 %v7311_v54  ;;  %4159 = vmatprep.mubr.msk.f32.mxu0 %vm4930_vm1, %v7311_v54 }
 0x3c0   :  { %2213 = vmatprep.subr.mxu1 %v7450_v53  ;;  %4162 = vmatprep.subr.mxu0 %v7311_v54  ;;  %v6313_v53 = vld [vmem:[%s7073_s6] ss:$0 sm:$0xff] }
 0x3c1   :  { %7453 = vst [vmem:[#allocation64_spill] sm:$0xff] %v6313_v53 }
 0x43d   :  { %v1790_v44 = vpop.f32.mrf.mxu1  ;;  %v1861_v3 = vpop.f32.mrf.mxu0 }
 0x43e   :  { %v1865_v13 = vadd.f32 %v1790_v44, %v7451_v6  ;;  %v1879_v6 = vadd.f32 %v6313_v53, %v1861_v3 }
 0x43f   :  { %v4091_v51 = vpop.f32.mrf.mxu0  ;;  %v1792_v41 = vpop.f32.mrf.mxu1 }
 0x440   :  { %v3539_v38 = vmul.f32 -1.442695, %v1865_v13  ;;  %v1872_v10 = vadd.f32 %v1792_v41, %v7452_v30 }
 0x442   :  { %4496 = vpow2.f32 %v3539_v38  ;;  %v3540_v42 = vmul.f32 -1.442695, %v1872_v10  ;;  %v7454_v38 = vld [vmem:[#allocation71_spill] sm:$0xff] }
 0x444   :  { %4498 = vpow2.f32 %v3540_v42 }
 0x44f   :  { %v4497_v26 = vpop.eup %4496 }
 0x450   :  { %v1869_v14 = vadd.f32 1.0, %v4497_v26  ;;  %v7455_v26 = vld [vmem:[#allocation66_spill] sm:$0xff] }
 0x451   :  { %v4499_v36 = vpop.eup %4498 }
 0x452   :  { %4500 = vrcp.f32 %v1869_v14  ;;  %v1876_v25 = vadd.f32 1.0, %v4499_v36  ;;  %v7456_v36 = vld [vmem:[#allocation81_spill] sm:$0xff] }
 0x454   :  { %4502 = vrcp.f32 %v1876_v25 }
 0x45e   :  { %v1953_v44 = vpop.f32.mrf.mxu1  ;;  %v2024_v13 = vpop.f32.mrf.mxu0 }
 0x45f   :  { %v4501_v51 = vpop.eup %4500  ;;  %v2028_v31 = vadd.f32 %v1953_v44, %v7454_v38  ;;  %v7472_v44 = vld [vmem:[#allocation95_spill] sm:$0xff]  ;;  %v7475_v38 = vld [vmem:[#allocation96_spill] sm:$0xff] }
 0x460   :  { %v1880_v41 = vmul.f32 %v4501_v51, %v1879_v6  ;;  %v4126_v10 = vpop.f32.mrf.mxu0  ;;  %v1955_v30 = vpop.f32.mrf.mxu1  ;;  %v6453_v51 = vld [vmem:[#allocation12 + $0x1e0] sm:$0xff] }
 0x461   :  { %v3541_v42 = vmul.f32 -1.442695, %v2028_v31  ;;  %v2035_v55 = vadd.f32 %v1955_v30, %v7456_v36  ;;  %v4503_v58 = vpop.eup %4502  ;;  %v6425_v31 = vld [vmem:[#allocation12 + $0x270] sm:$0xff]  ;;  %7474 = vst [vmem:[#allocation30_spill] sm:$0xff] %v6453_v51  ;;  %v7481_v30 = vld [vmem:[#allocation98_spill] sm:$0xff] }
 0x462   :  { %v1881_v14 = vadd.f32 %v1880_v41, %v7455_v26  ;;  %v1883_v53 = vsub.f32 1.0, %v4503_v58  ;;  %v1885_v6 = vmul.f32 %v4503_v58, %v6131_v35  ;;  %v6428_v35 = vld [vmem:[#allocation12 + $0x280] sm:$0xff]  ;;  %v6438_v58 = vld [vmem:[#allocation12 + $0x250] sm:$0xff]  ;;  %v6457_v41 = vld [vmem:[#allocation12 + $0x1b8] sm:$0xff] }
 0x463   :  { %4504 = vpow2.f32 %v3541_v42  ;;  %v3542_v60 = vmul.f32 -1.442695, %v2035_v55  ;;  %v6421_v55 = vld [vmem:[#allocation12 + $0x278] sm:$0xff]  ;;  %7466 = vst [vmem:[#allocation83_spill] sm:$0xff] %v6428_v35  ;;  %7469 = vst [vmem:[#allocation26_spill] sm:$0xff] %v6438_v58  ;;  %v6461_v10 = vld [vmem:[#allocation12 + $0x1b0] sm:$0xff] }
 0x464   :  { %4506 = vtanh.f32 %v1881_v14  ;;  %7476 = vst [vmem:[#allocation31_spill] sm:$0xff] %v6457_v41  ;;  %7477 = vst [vmem:[#allocation32_spill] sm:$0xff] %v6461_v10  ;;  %v7478_v42 = vld [vmem:[#allocation97_spill] sm:$0xff]  ;;  %v6465_v26 = vld [vmem:[#allocation12 + $0x188] sm:$0xff] }
 0x465   :  { %4508 = vpow2.f32 %v3542_v60  ;;  %v6441_v60 = vld [vmem:[#allocation12 + $0x218] sm:$0xff]  ;;  %7479 = vst [vmem:[#allocation33_spill] sm:$0xff] %v6465_v26  ;;  %v6469_v14 = vld [vmem:[#allocation12 + $0x180] sm:$0xff] }
 0x466   :  { %7470 = vst [vmem:[#allocation27_spill] sm:$0xff] %v6441_v60  ;;  %7480 = vst [vmem:[#allocation34_spill] sm:$0xff] %v6469_v14  ;;  %v6473_v36 = vld [vmem:[#allocation12 + $0x158] sm:$0xff] }
 0x467   :  { %7482 = vst [vmem:[#allocation35_spill] sm:$0xff] %v6473_v36 }
 0x470   :  { %v4505_v3 = vpop.eup %4504 }
 0x471   :  { %v4507_v29 = vpop.eup %4506  ;;  %v2032_v34 = vadd.f32 1.0, %v4505_v3  ;;  %v6477_v3 = vld [vmem:[#allocation12 + $0x150] sm:$0xff] }
 0x472   :  { %v1884_v20 = vmul.f32 %v4507_v29, %v1883_v53  ;;  %v4509_v29 = vpop.eup %4508  ;;  %v6445_v53 = vld [vmem:[#allocation12 + $0x210] sm:$0xff]  ;;  %7483 = vst [vmem:[#allocation36_spill] sm:$0xff] %v6477_v3 }
 0x473   :  { %4510 = vrcp.f32 %v2032_v34  ;;  %v6435_v34 = vld [vmem:[#allocation12 + $0x240] sm:$0xff]  ;;  %7471 = vst [vmem:[#allocation28_spill] sm:$0xff] %v6445_v53 }
 0x474   :  { %v6320_v25 = vadd.f32 %v1885_v6, %v1884_v20  ;;  %v6431_v20 = vld [vmem:[#allocation12 + $0x248] sm:$0xff]  ;;  %7468 = vst [vmem:[#allocation25_spill] sm:$0xff] %v6435_v34  ;;  %v7484_v6 = vld [vmem:[#allocation99_spill] sm:$0xff] }
 0x475   :  { %7467 = vst [vmem:[#allocation84_spill] sm:$0xff] %v6431_v20 }
 0x476   :  { %2115 = vmatmul.mubr.f32.vlgmr.msra.gmra.mxu1 %v6320_v25  ;;  %4160 = vmatmul.mubr.f32.vlgmr.msra.gmra.mxu0 %v6320_v25 }
 0x477   :  { %2214 = vmatpush1.msra.mxu1 %v5897_v61  ;;  %4163 = vmatpush3.msra.mxu0 %v6136_v59  ;;  %v2039_v61 = vadd.f32 1.0, %v4509_v29  ;;  %v6481_v29 = vld [vmem:[#allocation12 + $0x128] sm:$0xff] }
 0x478   :  { %2215 = vmatprep.subr.mxu1 %v5901_v16  ;;  %4164 = vmatprep.subr.mxu0 %v7311_v54  ;;  %v6343_v16 = vld [vmem:[%s7073_s6 + $0x1] ss:$0 sm:$0xff]  ;;  %7485 = vst [vmem:[#allocation37_spill] sm:$0xff] %v6481_v29 }
 0x479   :  { %2216 = vmatpush1.msra.mxu1 %v5905_v48  ;;  %4165 = vmatpush3.msra.mxu0 %v6142_v57  ;;  %v2042_v48 = vadd.f32 %v6343_v16, %v2024_v13  ;;  %4512 = vrcp.f32 %v2039_v61  ;;  %v6449_v13 = vld [vmem:[#allocation12 + $0x1e8] sm:$0xff]  ;;  %v6485_v61 = vld [vmem:[#allocation12 + $0x120] sm:$0xff] }
 0x47a   :  { %2217 = vmatprep.subr.mxu1 %v5909_v1  ;;  %4166 = vmatprep.subr.mxu0 %v7311_v54  ;;  %7473 = vst [vmem:[#allocation29_spill] sm:$0xff] %v6449_v13  ;;  %7486 = vst [vmem:[#allocation38_spill] sm:$0xff] %v6485_v61 }
 0x47b   :  { %2218 = vmatpush1.msra.mxu1 %v5913_v17  ;;  %4167 = vmatpush3.msra.mxu0 %v6148_v0 }
 0x47c   :  { %2219 = vmatprep.subr.mxu1 %v5917_v43  ;;  %4168 = vmatprep.subr.mxu0 %v7311_v54  ;;  %v7457_v43 = vld [vmem:[#allocation82_spill] sm:$0xff] }
 0x47d   :  { %2220 = vmatpush1.msra.mxu1 %v5921_v9  ;;  %4169 = vmatpush3.msra.mxu0 %v6154_v32 }
 0x47e   :  { %2221 = vmatprep.subr.mxu1 %v5925_v50  ;;  %4170 = vmatprep.subr.mxu0 %v7311_v54 }
 0x47f   :  { %2222 = vmatpush1.msra.mxu1 %v5930_v5  ;;  %4171 = vmatpush3.msra.mxu0 %v6161_v45  ;;  %v7458_v5 = vld [vmem:[#allocation53_spill] sm:$0xff] }
 0x480   :  { %v4511_v1 = vpop.eup %4510  ;;  %2223 = vmatprep.subr.mxu1 %v5934_v2  ;;  %4172 = vmatprep.subr.mxu0 %v7311_v54 }
 0x481   :  { %v2043_v17 = vmul.f32 %v4511_v1, %v2042_v48  ;;  %2224 = vmatpush1.msra.mxu1 %v5938_v37  ;;  %4173 = vmatpush3.msra.mxu0 %v6167_v7  ;;  %v7487_v48 = vld [vmem:[#allocation100_spill] sm:$0xff]  ;;  %v6489_v1 = vld [vmem:[#allocation12 + $0xf8] sm:$0xff] }
 0x482   :  { %2225 = vmatprep.subr.mxu1 %v5942_v12  ;;  %4174 = vmatprep.subr.mxu0 %v7311_v54  ;;  %v7459_v12 = vld [vmem:[#allocation75_spill] sm:$0xff]  ;;  %7488 = vst [vmem:[#allocation39_spill] sm:$0xff] %v6489_v1 }
 0x483   :  { %v2044_v9 = vadd.f32 %v2043_v17, %v7457_v43  ;;  %2226 = vmatpush1.msra.mxu1 %v5947_v56  ;;  %4175 = vmatpush3.msra.mxu0 %v6174_v39  ;;  %v7460_v56 = vld [vmem:[#allocation61_spill] sm:$0xff] }
 0x484   :  { %2227 = vmatprep.subr.mxu1 %v5951_v63  ;;  %4176 = vmatprep.subr.mxu0 %v7311_v54  ;;  %v7461_v63 = vld [vmem:[#allocation55_spill] sm:$0xff]  ;;  %v6493_v17 = vld [vmem:[#allocation12 + $0xf0] sm:$0xff] }
 0x485   :  { %4514 = vtanh.f32 %v2044_v9  ;;  %2228 = vmatpush1.msra.mxu1 %v5955_v11  ;;  %4177 = vmatpush3.msra.mxu0 %v6180_v47  ;;  %7489 = vst [vmem:[#allocation40_spill] sm:$0xff] %v6493_v17  ;;  %v7490_v43 = vld [vmem:[#allocation101_spill] sm:$0xff]  ;;  %v6497_v9 = vld [vmem:[#allocation12 + $0xc8] sm:$0xff] }
 0x486   :  { %2229 = vmatprep.subr.mxu1 %v5959_v21  ;;  %4178 = vmatprep.subr.mxu0 %v7311_v54  ;;  %v4513_v50 = vpop.eup %4512  ;;  %v7462_v21 = vld [vmem:[#allocation87_spill] sm:$0xff]  ;;  %7491 = vst [vmem:[#allocation41_spill] sm:$0xff] %v6497_v9 }
 0x487   :  { %2230 = vmatpush1.msra.mxu1 %v5963_v22  ;;  %4179 = vmatpush3.msra.mxu0 %v6186_v46  ;;  %v2046_v2 = vsub.f32 1.0, %v4513_v50  ;;  %v2048_v22 = vmul.f32 %v4513_v50, %v7462_v21  ;;  %v6501_v50 = vld [vmem:[#allocation12 + $0xc0] sm:$0xff] }
 0x488   :  { %2231 = vmatprep.subr.mxu1 %v5967_v18  ;;  %4180 = vmatprep.subr.mxu0 %v7311_v54  ;;  %v7463_v18 = vld [vmem:[#allocation85_spill] sm:$0xff]  ;;  %7492 = vst [vmem:[#allocation42_spill] sm:$0xff] %v6501_v50  ;;  %v6517_v21 = vld [vmem:[#allocation12 + $0x60] sm:$0xff] }
 0x489   :  { %2232 = vmatpush1.msra.mxu1 %v5971_v62  ;;  %4181 = vmatpush3.msra.mxu0 %v6192_v33  ;;  %v7464_v62 = vld [vmem:[#allocation86_spill] sm:$0xff]  ;;  %7498 = vst [vmem:[#allocation46_spill] sm:$0xff] %v6517_v21 }
 0x48a   :  { %2233 = vmatprep.subr.mxu1 %v5975_v23  ;;  %4182 = vmatprep.subr.mxu0 %v7311_v54 }
 0x48b   :  { %2234 = vmatpush1.msra.mxu1 %v5979_v40  ;;  %4183 = vmatpush3.msra.mxu0 %v6198_v19  ;;  %v7465_v40 = vld [vmem:[#allocation73_spill] sm:$0xff] }
 0x48c   :  { %2235 = vmatprep.subr.mxu1 %v5983_v24  ;;  %4184 = vmatprep.subr.mxu0 %v7311_v54  ;;  %v6401_v24 = vld [vmem:[#allocation12 + $0x2d8] sm:$0xff] }
 0x48d   :  { %2236 = vmatpush1.msra.mxu1 %v5987_v15  ;;  %4185 = vmatpush3.msra.mxu0 %v6204_v52  ;;  %v6405_v15 = vld [vmem:[#allocation12 + $0x2d0] sm:$0xff] }
 0x48e   :  { %2237 = vmatprep.subr.mxu1 %v5991_v4  ;;  %4186 = vmatprep.subr.mxu0 %v7311_v54  ;;  %v6408_v4 = vld [vmem:[#allocation12 + $0x2e0] sm:$0xff] }
 0x48f   :  { %2238 = vmatpush1.msra.mxu1 %v5995_v27  ;;  %4187 = vmatpush3.msra.mxu0 %v6210_v8  ;;  %v6411_v27 = vld [vmem:[#allocation12 + $0x2a8] sm:$0xff] }
 0x490   :  { %2239 = vmatprep.subr.mxu1 %v5999_v49  ;;  %4188 = vmatprep.subr.mxu0 %v7311_v54  ;;  %v6415_v49 = vld [vmem:[#allocation12 + $0x2a0] sm:$0xff] }
 0x491   :  { %2240 = vmatpush1.msra.mxu1 %v6003_v28  ;;  %4189 = vmatpush3.msra.mxu0 %v7458_v5  ;;  %v6418_v28 = vld [vmem:[#allocation12 + $0x2b0] sm:$0xff] }
 0x492   :  { %v4515_v37 = vpop.eup %4514  ;;  %2241 = vmatprep.subr.mxu1 %v7459_v12  ;;  %4190 = vmatprep.subr.mxu0 %v7311_v54  ;;  %v6509_v12 = vld [vmem:[#allocation12 + $0x90] sm:$0xff] }
 0x493   :  { %2242 = vmatpush1.msra.mxu1 %v7460_v56  ;;  %4191 = vmatpush3.msra.mxu0 %v7461_v63  ;;  %v2047_v11 = vmul.f32 %v4515_v37, %v2046_v2  ;;  %v7493_v2 = vld [vmem:[#allocation102_spill] sm:$0xff]  ;;  %7495 = vst [vmem:[#allocation44_spill] sm:$0xff] %v6509_v12  ;;  %v7496_v56 = vld [vmem:[#allocation103_spill] sm:$0xff] }
 0x494   :  { %2243 = vmatprep.subr.mxu1 %v7463_v18  ;;  %4192 = vmatprep.subr.mxu0 %v7311_v54  ;;  %v6505_v37 = vld [vmem:[#allocation12 + $0x98] sm:$0xff] }
 0x495   :  { %2244 = vmatpush1.msra.mxu1 %v7464_v62  ;;  %2277 = vmatprep.mubr.f32.mxu1 %v7311_v54  ;;  %v6394_v23 = vadd.f32 %v2048_v22, %v2047_v11  ;;  %7494 = vst [vmem:[#allocation43_spill] sm:$0xff] %v6505_v37  ;;  %v6513_v11 = vld [vmem:[#allocation12 + $0x68] sm:$0xff]  ;;  %v6521_v18 = vld [vmem:[#allocation12 + $0x38] sm:$0xff]  ;;  %v6525_v62 = vld [vmem:[#allocation12 + $0x30] sm:$0xff] }
 0x496   :  { %4193 = vmatpush3.msra.mxu0 %v7465_v40  ;;  %4194 = vmatprep.mubr.msk.f32.mxu0 %vm4930_vm1, %v7311_v54  ;;  %7497 = vst [vmem:[#allocation45_spill] sm:$0xff] %v6513_v11  ;;  %v7499_v22 = vld [vmem:[#allocation104_spill] sm:$0xff]  ;;  %7500 = vst [vmem:[#allocation88_spill] sm:$0xff] %v6521_v18 }
 0x497   :  { %2278 = vmatmul.mubr.f32.vlgmr.msra.gmra.mxu1 %v6394_v23  ;;  %4195 = vmatmul.mubr.f32.vlgmr.msra.gmra.mxu0 %v6394_v23  ;;  %7501 = vst [vmem:[#allocation89_spill] sm:$0xff] %v6525_v62 }
 0x498   :  { %2376 = vmatprep.subr.mxu1 %v6401_v24  ;;  %4197 = vmatprep.subr.mxu0 %v7311_v54 }
 0x499   :  { %2377 = vmatpush1.msra.mxu1 %v6405_v15  ;;  %4198 = vmatpush3.msra.mxu0 %v6408_v4 }
 0x49a   :  { %2378 = vmatprep.subr.mxu1 %v6411_v27  ;;  %4199 = vmatprep.subr.mxu0 %v7311_v54 }
 0x49b   :  { %2379 = vmatpush1.msra.mxu1 %v6415_v49  ;;  %4200 = vmatpush3.msra.mxu0 %v6418_v28 }
 0x49c   :  { %2380 = vmatprep.subr.mxu1 %v6421_v55  ;;  %4201 = vmatprep.subr.mxu0 %v7311_v54 }
 0x49d   :  { %2381 = vmatpush1.msra.mxu1 %v6425_v31  ;;  %4202 = vmatpush3.msra.mxu0 %v6428_v35 }
 0x49e   :  { %2382 = vmatprep.subr.mxu1 %v6431_v20  ;;  %4203 = vmatprep.subr.mxu0 %v7311_v54 }
 0x49f   :  { %2383 = vmatpush1.msra.mxu1 %v6435_v34  ;;  %4204 = vmatpush3.msra.mxu0 %v6438_v58 }
 0x4a0   :  { %2384 = vmatprep.subr.mxu1 %v6441_v60  ;;  %4205 = vmatprep.subr.mxu0 %v7311_v54 }
 0x4a1   :  { %2385 = vmatpush1.msra.mxu1 %v6445_v53  ;;  %4206 = vmatpush3.msra.mxu0 %v7472_v44  ;;  %v7502_v44 = vld [vmem:[#allocation105_spill] sm:$0xff] }
 0x4a2   :  { %2386 = vmatprep.subr.mxu1 %v6449_v13  ;;  %4207 = vmatprep.subr.mxu0 %v7311_v54 }
 0x4a3   :  { %2387 = vmatpush1.msra.mxu1 %v6453_v51  ;;  %4208 = vmatpush3.msra.mxu0 %v7475_v38  ;;  %v6529_v38 = vld [vmem:[#allocation12 + $0x8] sm:$0xff] }
 0x4a4   :  { %2388 = vmatprep.subr.mxu1 %v6457_v41  ;;  %4209 = vmatprep.subr.mxu0 %v7311_v54  ;;  %7503 = vst [vmem:[#allocation90_spill] sm:$0xff] %v6529_v38 }
 0x4a5   :  { %2389 = vmatpush1.msra.mxu1 %v6461_v10  ;;  %4210 = vmatpush3.msra.mxu0 %v7478_v42  ;;  %v6533_v42 = vld [vmem:[#allocation12] sm:$0xff] }
 0x4a6   :  { %2390 = vmatprep.subr.mxu1 %v6465_v26  ;;  %4211 = vmatprep.subr.mxu0 %v7311_v54  ;;  %7504 = vst [vmem:[#allocation91_spill] sm:$0xff] %v6533_v42 }
 0x4a7   :  { %2391 = vmatpush1.msra.mxu1 %v6469_v14  ;;  %4212 = vmatpush3.msra.mxu0 %v7481_v30  ;;  %v7505_v30 = vld [vmem:[#allocation106_spill] sm:$0xff] }
 0x4a8   :  { %2392 = vmatprep.subr.mxu1 %v6473_v36  ;;  %4213 = vmatprep.subr.mxu0 %v7311_v54 }
 0x4a9   :  { %2393 = vmatpush1.msra.mxu1 %v6477_v3  ;;  %4214 = vmatpush3.msra.mxu0 %v7484_v6  ;;  %v6540_v6 = vld [vmem:[#allocation12 + $0x2f0] sm:$0xff] }
 0x4aa   :  { %2394 = vmatprep.subr.mxu1 %v6481_v29  ;;  %4215 = vmatprep.subr.mxu0 %v7311_v54  ;;  %7506 = vst [vmem:[#allocation92_spill] sm:$0xff] %v6540_v6 }
 0x4ab   :  { %2395 = vmatpush1.msra.mxu1 %v6485_v61  ;;  %4216 = vmatpush3.msra.mxu0 %v7487_v48 }
 0x4ac   :  { %2396 = vmatprep.subr.mxu1 %v6489_v1  ;;  %4217 = vmatprep.subr.mxu0 %v7311_v54  ;;  %v7510_v1 = vld [vmem:[#allocation67_spill] sm:$0xff] }
 0x4ad   :  { %2397 = vmatpush1.msra.mxu1 %v6493_v17  ;;  %4218 = vmatpush3.msra.mxu0 %v7490_v43 }
 0x4ae   :  { %2398 = vmatprep.subr.mxu1 %v6497_v9  ;;  %4219 = vmatprep.subr.mxu0 %v7311_v54 }
 0x4af   :  { %2399 = vmatpush1.msra.mxu1 %v6501_v50  ;;  %4220 = vmatpush3.msra.mxu0 %v7493_v2  ;;  %v7507_v2 = vld [vmem:[#allocation47_spill] sm:$0xff] }
 0x4b0   :  { %2400 = vmatprep.subr.mxu1 %v6505_v37  ;;  %4221 = vmatprep.subr.mxu0 %v7311_v54 }
 0x4b1   :  { %2401 = vmatpush1.msra.mxu1 %v6509_v12  ;;  %4222 = vmatpush3.msra.mxu0 %v7496_v56 }
 0x4b2   :  { %2402 = vmatprep.subr.mxu1 %v6513_v11  ;;  %4223 = vmatprep.subr.mxu0 %v7311_v54 }
 0x4b3   :  { %2403 = vmatpush1.msra.mxu1 %v6517_v21  ;;  %4224 = vmatpush3.msra.mxu0 %v7499_v22 }
 0x4b4   :  { %2404 = vmatprep.subr.mxu1 %v6521_v18  ;;  %4225 = vmatprep.subr.mxu0 %v7311_v54 }
 0x4b5   :  { %2405 = vmatpush1.msra.mxu1 %v6525_v62  ;;  %4226 = vmatpush3.msra.mxu0 %v7502_v44 }
 0x4b6   :  { %2406 = vmatprep.subr.mxu1 %v6529_v38  ;;  %4227 = vmatprep.subr.mxu0 %v7311_v54 }
 0x4b7   :  { %2407 = vmatpush1.msra.mxu1 %v6533_v42  ;;  %4228 = vmatpush3.msra.mxu0 %v7505_v30  ;;  %v7508_v30 = vld [vmem:[#allocation48_spill] sm:$0xff] }
 0x4b8   :  { %2440 = vmatprep.mubr.f32.mxu1 %v7311_v54  ;;  %4229 = vmatprep.mubr.msk.f32.mxu0 %vm4930_vm1, %v7311_v54 }
 0x4b9   :  { %2539 = vmatprep.subr.mxu1 %v6540_v6  ;;  %4232 = vmatprep.subr.mxu0 %v7311_v54  ;;  %v7509_v6 = vld [vmem:[#allocation64_spill] sm:$0xff] }
 0x536   :  { %v2116_v48 = vpop.f32.mrf.mxu1  ;;  %v2187_v43 = vpop.f32.mrf.mxu0 }
 0x537   :  { %v2191_v56 = vadd.f32 %v2116_v48, %v7507_v2  ;;  %v2205_v37 = vadd.f32 %v7509_v6, %v2187_v43 }
 0x538   :  { %v4161_v22 = vpop.f32.mrf.mxu0  ;;  %v2118_v42 = vpop.f32.mrf.mxu1 }
 0x539   :  { %v3543_v44 = vmul.f32 -1.442695, %v2191_v56  ;;  %v2198_v38 = vadd.f32 %v2118_v42, %v7508_v30 }
 0x53b   :  { %4516 = vpow2.f32 %v3543_v44  ;;  %v3544_v62 = vmul.f32 -1.442695, %v2198_v38  ;;  %v7511_v44 = vld [vmem:[#allocation69_spill] sm:$0xff] }
 0x53d   :  { %4518 = vpow2.f32 %v3544_v62 }
 0x548   :  { %v4517_v18 = vpop.eup %4516 }
 0x549   :  { %v2195_v21 = vadd.f32 1.0, %v4517_v18  ;;  %v7512_v18 = vld [vmem:[#allocation79_spill] sm:$0xff] }
 0x54a   :  { %v4519_v11 = vpop.eup %4518 }
 0x54b   :  { %4520 = vrcp.f32 %v2195_v21  ;;  %v2202_v12 = vadd.f32 1.0, %v4519_v11 }
 0x54d   :  { %4522 = vrcp.f32 %v2202_v12  ;;  %v6575_v12 = vld [vmem:[#allocation12 + $0x260] sm:$0xff] }
 0x557   :  { %v2279_v50 = vpop.f32.mrf.mxu1  ;;  %v2350_v9 = vpop.f32.mrf.mxu0 }
 0x558   :  { %v4521_v17 = vpop.eup %4520  ;;  %v2354_v48 = vadd.f32 %v2279_v50, %v7510_v1  ;;  %v6555_v50 = vld [vmem:[#allocation12 + $0x2e8] sm:$0xff] }
 0x559   :  { %v2206_v2 = vmul.f32 %v4521_v17, %v2205_v37  ;;  %v4196_v56 = vpop.f32.mrf.mxu0  ;;  %v2281_v38 = vpop.f32.mrf.mxu1  ;;  %v6559_v37 = vld [vmem:[#allocation12 + $0x2c0] sm:$0xff] }
 0x55a   :  { %v3545_v22 = vmul.f32 -1.442695, %v2354_v48  ;;  %v2361_v21 = vadd.f32 %v2281_v38, %v7512_v18  ;;  %v4523_v11 = vpop.eup %4522  ;;  %v6583_v48 = vld [vmem:[#allocation12 + $0x230] sm:$0xff]  ;;  %v6605_v38 = vld [vmem:[#allocation12 + $0x1c8] sm:$0xff]  ;;  %v6609_v18 = vld [vmem:[#allocation12 + $0x1a0] sm:$0xff] }
 0x55b   :  { %v2207_v42 = vadd.f32 %v2206_v2, %v7511_v44  ;;  %v2209_v30 = vsub.f32 1.0, %v4523_v11  ;;  %v2211_v1 = vmul.f32 %v4523_v11, %v6320_v25  ;;  %v6563_v25 = vld [vmem:[#allocation12 + $0x2b8] sm:$0xff]  ;;  %v6588_v2 = vld [vmem:[#allocation12 + $0x228] sm:$0xff] }
 0x55c   :  { %4524 = vpow2.f32 %v3545_v22  ;;  %v3546_v62 = vmul.f32 -1.442695, %v2361_v21  ;;  %v6592_v22 = vld [vmem:[#allocation12 + $0x200] sm:$0xff]  ;;  %v6596_v44 = vld [vmem:[#allocation12 + $0x1f8] sm:$0xff]  ;;  %v6617_v21 = vld [vmem:[#allocation12 + $0x170] sm:$0xff] }
 0x55d   :  { %4526 = vtanh.f32 %v2207_v42  ;;  %v6629_v11 = vld [vmem:[#allocation12 + $0x138] sm:$0xff] }
 0x55e   :  { %4528 = vpow2.f32 %v3546_v62  ;;  %v6625_v62 = vld [vmem:[#allocation12 + $0x140] sm:$0xff] }
 0x569   :  { %v4525_v43 = vpop.eup %4524 }
 0x56a   :  { %v4527_v6 = vpop.eup %4526  ;;  %v2358_v61 = vadd.f32 1.0, %v4525_v43  ;;  %v6637_v43 = vld [vmem:[#allocation12 + $0x108] sm:$0xff] }
 0x56b   :  { %v2210_v29 = vmul.f32 %v4527_v6, %v2209_v30  ;;  %v6579_v6 = vld [vmem:[#allocation12 + $0x258] sm:$0xff] }
 0x56c   :  { %4530 = vrcp.f32 %v2358_v61  ;;  %v6567_v61 = vld [vmem:[#allocation12 + $0x290] sm:$0xff]  ;;  %v6645_v30 = vld [vmem:[#allocation12 + $0xd8] sm:$0xff] }
 0x56d   :  { %v6551_v17 = vadd.f32 %v2211_v1, %v2210_v29  ;;  %v4529_v29 = vpop.eup %4528  ;;  %v6649_v1 = vld [vmem:[#allocation12 + $0xb0] sm:$0xff] }
 0x56f   :  { %2441 = vmatmul.mubr.f32.vlgmr.msra.gmra.mxu1 %v6551_v17  ;;  %4230 = vmatmul.mubr.f32.vlgmr.msra.gmra.mxu0 %v6551_v17 }
 0x570   :  { %2540 = vmatpush1.msra.mxu1 %v6555_v50  ;;  %4233 = vmatpush3.msra.mxu0 %v6136_v59  ;;  %v6571_v59 = vld [vmem:[#allocation12 + $0x288] sm:$0xff] }
 0x571   :  { %2541 = vmatprep.subr.mxu1 %v6559_v37  ;;  %4234 = vmatprep.subr.mxu0 %v7311_v54 }
 0x572   :  { %2542 = vmatpush1.msra.mxu1 %v6563_v25  ;;  %4235 = vmatpush3.msra.mxu0 %v6142_v57  ;;  %v2365_v57 = vadd.f32 1.0, %v4529_v29  ;;  %v6657_v29 = vld [vmem:[#allocation12 + $0x80] sm:$0xff] }
 0x573   :  { %2543 = vmatprep.subr.mxu1 %v6567_v61  ;;  %4236 = vmatprep.subr.mxu0 %v7311_v54 }
 0x574   :  { %2544 = vmatpush1.msra.mxu1 %v6571_v59  ;;  %4237 = vmatpush3.msra.mxu0 %v6148_v0  ;;  %v2368_v0 = vadd.f32 %v6343_v16, %v2350_v9  ;;  %4532 = vrcp.f32 %v2365_v57  ;;  %v6600_v9 = vld [vmem:[#allocation12 + $0x1d0] sm:$0xff] }
 0x575   :  { %2545 = vmatprep.subr.mxu1 %v6575_v12  ;;  %4238 = vmatprep.subr.mxu0 %v7311_v54 }
 0x576   :  { %2546 = vmatpush1.msra.mxu1 %v6579_v6  ;;  %4239 = vmatpush3.msra.mxu0 %v6154_v32 }
 0x577   :  { %2547 = vmatprep.subr.mxu1 %v6583_v48  ;;  %4240 = vmatprep.subr.mxu0 %v7311_v54 }
 0x578   :  { %2548 = vmatpush1.msra.mxu1 %v6588_v2  ;;  %4241 = vmatpush3.msra.mxu0 %v6161_v45  ;;  %v7513_v45 = vld [vmem:[#allocation80_spill] sm:$0xff] }
 0x579   :  { %v4531_v56 = vpop.eup %4530  ;;  %2549 = vmatprep.subr.mxu1 %v6592_v22  ;;  %4242 = vmatprep.subr.mxu0 %v7311_v54 }
 0x57a   :  { %v2369_v32 = vmul.f32 %v4531_v56, %v2368_v0  ;;  %2550 = vmatpush1.msra.mxu1 %v6596_v44  ;;  %4243 = vmatpush3.msra.mxu0 %v6167_v7  ;;  %v6613_v7 = vld [vmem:[#allocation12 + $0x198] sm:$0xff]  ;;  %v6665_v56 = vld [vmem:[#allocation12 + $0x50] sm:$0xff] }
 0x57b   :  { %2551 = vmatprep.subr.mxu1 %v6600_v9  ;;  %4244 = vmatprep.subr.mxu0 %v7311_v54  ;;  %7514 = vst [vmem:[#allocation93_spill] sm:$0xff] %v6665_v56 }
 0x57c   :  { %v2370_v42 = vadd.f32 %v2369_v32, %v7513_v45  ;;  %2552 = vmatpush1.msra.mxu1 %v6605_v38  ;;  %4245 = vmatpush3.msra.mxu0 %v6174_v39  ;;  %v6621_v39 = vld [vmem:[#allocation12 + $0x168] sm:$0xff] }
 0x57d   :  { %2553 = vmatprep.subr.mxu1 %v6609_v18  ;;  %4246 = vmatprep.subr.mxu0 %v7311_v54 }
 0x57e   :  { %4534 = vtanh.f32 %v2370_v42  ;;  %2554 = vmatpush1.msra.mxu1 %v6613_v7  ;;  %4247 = vmatpush3.msra.mxu0 %v6180_v47  ;;  %v6633_v47 = vld [vmem:[#allocation12 + $0x110] sm:$0xff]  ;;  %v6674_v42 = vld [vmem:[#allocation12 + $0x20] sm:$0xff] }
 0x57f   :  { %2555 = vmatprep.subr.mxu1 %v6617_v21  ;;  %4248 = vmatprep.subr.mxu0 %v7311_v54  ;;  %7516 = vst [vmem:[#allocation57_spill] sm:$0xff] %v6674_v42 }
 0x580   :  { %2556 = vmatpush1.msra.mxu1 %v6621_v39  ;;  %4249 = vmatpush3.msra.mxu0 %v6186_v46  ;;  %v6641_v46 = vld [vmem:[#allocation12 + $0xe0] sm:$0xff] }
 0x581   :  { %2557 = vmatprep.subr.mxu1 %v6625_v62  ;;  %4250 = vmatprep.subr.mxu0 %v7311_v54 }
 0x582   :  { %2558 = vmatpush1.msra.mxu1 %v6629_v11  ;;  %4251 = vmatpush3.msra.mxu0 %v6192_v33  ;;  %v4533_v33 = vpop.eup %4532 }
 0x583   :  { %2559 = vmatprep.subr.mxu1 %v6633_v47  ;;  %4252 = vmatprep.subr.mxu0 %v7311_v54  ;;  %v2372_v57 = vsub.f32 1.0, %v4533_v33  ;;  %v2374_v45 = vmul.f32 %v4533_v33, %v6394_v23  ;;  %v6714_v23 = vld [vmem:[#allocation12 + $0x1f0] sm:$0xff] }
 0x584   :  { %2560 = vmatpush1.msra.mxu1 %v6637_v43  ;;  %4253 = vmatpush3.msra.mxu0 %v6198_v19  ;;  %v6653_v19 = vld [vmem:[#allocation12 + $0xa8] sm:$0xff]  ;;  %7519 = vst [vmem:[#allocation66_spill] sm:$0xff] %v6714_v23  ;;  %v6726_v33 = vld [vmem:[#allocation12 + $0x190] sm:$0xff] }
 0x585   :  { %2561 = vmatprep.subr.mxu1 %v6641_v46  ;;  %4254 = vmatprep.subr.mxu0 %v7311_v54  ;;  %7521 = vst [vmem:[#allocation82_spill] sm:$0xff] %v6726_v33 }
 0x586   :  { %2562 = vmatpush1.msra.mxu1 %v6645_v30  ;;  %4255 = vmatpush3.msra.mxu0 %v6204_v52  ;;  %v6661_v52 = vld [vmem:[#allocation12 + $0x78] sm:$0xff] }
 0x587   :  { %2563 = vmatprep.subr.mxu1 %v6649_v1  ;;  %4256 = vmatprep.subr.mxu0 %v7311_v54 }
 0x588   :  { %2564 = vmatpush1.msra.mxu1 %v6653_v19  ;;  %4257 = vmatpush3.msra.mxu0 %v6210_v8  ;;  %v6669_v8 = vld [vmem:[#allocation12 + $0x48] sm:$0xff] }
 0x589   :  { %2565 = vmatprep.subr.mxu1 %v6657_v29  ;;  %4258 = vmatprep.subr.mxu0 %v7311_v54  ;;  %7515 = vst [vmem:[#allocation94_spill] sm:$0xff] %v6669_v8 }
 0x58a   :  { %2566 = vmatpush1.msra.mxu1 %v6661_v52  ;;  %4259 = vmatpush3.msra.mxu0 %v7458_v5  ;;  %v6678_v5 = vld [vmem:[#allocation12 + $0x18] sm:$0xff] }
 0x58b   :  { %v4535_v0 = vpop.eup %4534  ;;  %2567 = vmatprep.subr.mxu1 %v6665_v56  ;;  %4260 = vmatprep.subr.mxu0 %v7311_v54  ;;  %7517 = vst [vmem:[#allocation58_spill] sm:$0xff] %v6678_v5 }
 0x58c   :  { %2568 = vmatpush1.msra.mxu1 %v6669_v8  ;;  %4261 = vmatpush3.msra.mxu0 %v7461_v63  ;;  %v2373_v32 = vmul.f32 %v4535_v0, %v2372_v57  ;;  %v6708_v63 = vld [vmem:[#allocation12 + $0x220] sm:$0xff]  ;;  %v7523_v0 = vld [vmem:[#allocation37_spill] sm:$0xff] }
 0x58d   :  { %2569 = vmatprep.subr.mxu1 %v6674_v42  ;;  %4262 = vmatprep.subr.mxu0 %v7311_v54  ;;  %7518 = vst [vmem:[#allocation71_spill] sm:$0xff] %v6708_v63  ;;  %v6732_v57 = vld [vmem:[#allocation12 + $0x160] sm:$0xff] }
 0x58e   :  { %2570 = vmatpush1.msra.mxu1 %v6678_v5  ;;  %2603 = vmatprep.mubr.f32.mxu1 %v7311_v54  ;;  %v6682_v56 = vadd.f32 %v2374_v45, %v2373_v32  ;;  %7522 = vst [vmem:[#allocation53_spill] sm:$0xff] %v6732_v57  ;;  %v7524_v32 = vld [vmem:[#allocation38_spill] sm:$0xff]  ;;  %v6738_v45 = vld [vmem:[#allocation12 + $0x130] sm:$0xff] }
 0x58f   :  { %4263 = vmatpush3.msra.mxu0 %v7465_v40  ;;  %4264 = vmatprep.mubr.msk.f32.mxu0 %vm4930_vm1, %v7311_v54  ;;  %v6720_v40 = vld [vmem:[#allocation12 + $0x1c0] sm:$0xff]  ;;  %7525 = vst [vmem:[#allocation75_spill] sm:$0xff] %v6738_v45 }
 0x590   :  { %2604 = vmatmul.mubr.f32.vlgmr.msra.gmra.mxu1 %v6682_v56  ;;  %4265 = vmatmul.mubr.f32.vlgmr.msra.gmra.mxu0 %v6682_v56  ;;  %7520 = vst [vmem:[#allocation81_spill] sm:$0xff] %v6720_v40 }
 0x591   :  { %2702 = vmatprep.subr.mxu1 %v6401_v24  ;;  %4267 = vmatprep.subr.mxu0 %v7311_v54 }
 0x592   :  { %2703 = vmatpush1.msra.mxu1 %v6405_v15  ;;  %4268 = vmatpush3.msra.mxu0 %v6408_v4 }
 0x593   :  { %2704 = vmatprep.subr.mxu1 %v6411_v27  ;;  %4269 = vmatprep.subr.mxu0 %v7311_v54 }
 0x594   :  { %2705 = vmatpush1.msra.mxu1 %v6415_v49  ;;  %4270 = vmatpush3.msra.mxu0 %v6418_v28 }
 0x595   :  { %2706 = vmatprep.subr.mxu1 %v6421_v55  ;;  %4271 = vmatprep.subr.mxu0 %v7311_v54 }
 0x596   :  { %2707 = vmatpush1.msra.mxu1 %v6425_v31  ;;  %4272 = vmatpush3.msra.mxu0 %v6428_v35 }
 0x597   :  { %2708 = vmatprep.subr.mxu1 %v6431_v20  ;;  %4273 = vmatprep.subr.mxu0 %v7311_v54 }
 0x598   :  { %2709 = vmatpush1.msra.mxu1 %v6435_v34  ;;  %4274 = vmatpush3.msra.mxu0 %v6438_v58  ;;  %v7548_v34 = vld [vmem:[#allocation65_spill] sm:$0xff] }
 0x599   :  { %2710 = vmatprep.subr.mxu1 %v6441_v60  ;;  %4275 = vmatprep.subr.mxu0 %v7311_v54 }
 0x59a   :  { %2711 = vmatpush1.msra.mxu1 %v6445_v53  ;;  %4276 = vmatpush3.msra.mxu0 %v6708_v63 }
 0x59b   :  { %2712 = vmatprep.subr.mxu1 %v6449_v13  ;;  %4277 = vmatprep.subr.mxu0 %v7311_v54 }
 0x59c   :  { %2713 = vmatpush1.msra.mxu1 %v6453_v51  ;;  %4278 = vmatpush3.msra.mxu0 %v6714_v23 }
 0x59d   :  { %2714 = vmatprep.subr.mxu1 %v6457_v41  ;;  %4279 = vmatprep.subr.mxu0 %v7311_v54 }
 0x59e   :  { %2715 = vmatpush1.msra.mxu1 %v6461_v10  ;;  %4280 = vmatpush3.msra.mxu0 %v6720_v40  ;;  %v7546_v40 = vld [vmem:[#allocation50_spill] sm:$0xff] }
 0x59f   :  { %2716 = vmatprep.subr.mxu1 %v6465_v26  ;;  %4281 = vmatprep.subr.mxu0 %v7311_v54 }
 0x5a0   :  { %2717 = vmatpush1.msra.mxu1 %v6469_v14  ;;  %4282 = vmatpush3.msra.mxu0 %v6726_v33  ;;  %v7526_v33 = vld [vmem:[#allocation39_spill] sm:$0xff] }
 0x5a1   :  { %2718 = vmatprep.subr.mxu1 %v6473_v36  ;;  %4283 = vmatprep.subr.mxu0 %v7311_v54  ;;  %v7527_v36 = vld [vmem:[#allocation40_spill] sm:$0xff] }
 0x5a2   :  { %2719 = vmatpush1.msra.mxu1 %v6477_v3  ;;  %4284 = vmatpush3.msra.mxu0 %v6732_v57  ;;  %v6744_v3 = vld [vmem:[#allocation12 + $0x100] sm:$0xff]  ;;  %v7529_v57 = vld [vmem:[#allocation41_spill] sm:$0xff] }
 0x5a3   :  { %2720 = vmatprep.subr.mxu1 %v7523_v0  ;;  %4285 = vmatprep.subr.mxu0 %v7311_v54  ;;  %7528 = vst [vmem:[#allocation61_spill] sm:$0xff] %v6744_v3  ;;  %v7530_v0 = vld [vmem:[#allocation42_spill] sm:$0xff] }
 0x5a4   :  { %2721 = vmatpush1.msra.mxu1 %v7524_v32  ;;  %4286 = vmatpush3.msra.mxu0 %v6738_v45  ;;  %v6750_v32 = vld [vmem:[#allocation12 + $0xd0] sm:$0xff]  ;;  %v7532_v45 = vld [vmem:[#allocation43_spill] sm:$0xff] }
 0x5a5   :  { %2722 = vmatprep.subr.mxu1 %v7526_v33  ;;  %4287 = vmatprep.subr.mxu0 %v7311_v54  ;;  %7531 = vst [vmem:[#allocation55_spill] sm:$0xff] %v6750_v32  ;;  %v7533_v33 = vld [vmem:[#allocation44_spill] sm:$0xff] }
 0x5a6   :  { %2723 = vmatpush1.msra.mxu1 %v7527_v36  ;;  %4288 = vmatpush3.msra.mxu0 %v6744_v3  ;;  %v6756_v36 = vld [vmem:[#allocation12 + $0xa0] sm:$0xff]  ;;  %v7535_v3 = vld [vmem:[#allocation45_spill] sm:$0xff] }
 0x5a7   :  { %2724 = vmatprep.subr.mxu1 %v7529_v57  ;;  %4289 = vmatprep.subr.mxu0 %v7311_v54  ;;  %7534 = vst [vmem:[#allocation87_spill] sm:$0xff] %v6756_v36  ;;  %v7536_v57 = vld [vmem:[#allocation46_spill] sm:$0xff] }
 0x5a8   :  { %2725 = vmatpush1.msra.mxu1 %v7530_v0  ;;  %4290 = vmatpush3.msra.mxu0 %v6750_v32  ;;  %v6762_v0 = vld [vmem:[#allocation12 + $0x70] sm:$0xff]  ;;  %v7538_v32 = vld [vmem:[#allocation88_spill] sm:$0xff] }
 0x5a9   :  { %2726 = vmatprep.subr.mxu1 %v7532_v45  ;;  %4291 = vmatprep.subr.mxu0 %v7311_v54  ;;  %7537 = vst [vmem:[#allocation85_spill] sm:$0xff] %v6762_v0  ;;  %v7539_v45 = vld [vmem:[#allocation89_spill] sm:$0xff] }
 0x5aa   :  { %2727 = vmatpush1.msra.mxu1 %v7533_v33  ;;  %4292 = vmatpush3.msra.mxu0 %v6756_v36  ;;  %v6768_v33 = vld [vmem:[#allocation12 + $0x40] sm:$0xff]  ;;  %v7541_v36 = vld [vmem:[#allocation90_spill] sm:$0xff] }
 0x5ab   :  { %2728 = vmatprep.subr.mxu1 %v7535_v3  ;;  %4293 = vmatprep.subr.mxu0 %v7311_v54  ;;  %7540 = vst [vmem:[#allocation86_spill] sm:$0xff] %v6768_v33  ;;  %v7542_v3 = vld [vmem:[#allocation91_spill] sm:$0xff] }
 0x5ac   :  { %2729 = vmatpush1.msra.mxu1 %v7536_v57  ;;  %4294 = vmatpush3.msra.mxu0 %v6762_v0  ;;  %v6774_v57 = vld [vmem:[#allocation12 + $0x10] sm:$0xff] }
 0x5ad   :  { %2730 = vmatprep.subr.mxu1 %v7538_v32  ;;  %4295 = vmatprep.subr.mxu0 %v7311_v54  ;;  %7543 = vst [vmem:[#allocation73_spill] sm:$0xff] %v6774_v57 }
 0x5ae   :  { %2731 = vmatpush1.msra.mxu1 %v7539_v45  ;;  %4296 = vmatpush3.msra.mxu0 %v6768_v33  ;;  %v7544_v45 = vld [vmem:[#allocation92_spill] sm:$0xff] }
 0x5af   :  { %2732 = vmatprep.subr.mxu1 %v7541_v36  ;;  %4297 = vmatprep.subr.mxu0 %v7311_v54  ;;  %v7545_v36 = vld [vmem:[#allocation49_spill] sm:$0xff] }
 0x5b0   :  { %2733 = vmatpush1.msra.mxu1 %v7542_v3  ;;  %4298 = vmatpush3.msra.mxu0 %v6774_v57 }
 0x5b1   :  { %2766 = vmatprep.mubr.f32.mxu1 %v7311_v54  ;;  %4299 = vmatprep.mubr.msk.f32.mxu0 %vm4930_vm1, %v7311_v54 }
 0x5b2   :  { %2865 = vmatprep.subr.mxu1 %v7544_v45  ;;  %4302 = vmatprep.subr.mxu0 %v7311_v54  ;;  %v7547_v45 = vld [vmem:[#allocation64_spill] sm:$0xff] }
 0x62f   :  { %v2442_v33 = vpop.f32.mrf.mxu1  ;;  %v2513_v32 = vpop.f32.mrf.mxu0 }
 0x630   :  { %v2517_v0 = vadd.f32 %v2442_v33, %v7545_v36  ;;  %v2531_v63 = vadd.f32 %v7547_v45, %v2513_v32 }
 0x631   :  { %v4231_v14 = vpop.f32.mrf.mxu0  ;;  %v2444_v3 = vpop.f32.mrf.mxu1 }
 0x632   :  { %v3547_v26 = vmul.f32 -1.442695, %v2517_v0  ;;  %v2524_v10 = vadd.f32 %v2444_v3, %v7546_v40  ;;  %v7549_v0 = vld [vmem:[#allocation72_spill] sm:$0xff] }
 0x634   :  { %4536 = vpow2.f32 %v3547_v26  ;;  %v3548_v57 = vmul.f32 -1.442695, %v2524_v10 }
 0x636   :  { %4538 = vpow2.f32 %v3548_v57 }
 0x641   :  { %v4537_v41 = vpop.eup %4536 }
 0x642   :  { %v2521_v23 = vadd.f32 1.0, %v4537_v41  ;;  %v7550_v41 = vld [vmem:[#allocation76_spill] sm:$0xff] }
 0x643   :  { %v4539_v51 = vpop.eup %4538 }
 0x644   :  { %4540 = vrcp.f32 %v2521_v23  ;;  %v2528_v13 = vadd.f32 1.0, %v4539_v51 }
 0x646   :  { %4542 = vrcp.f32 %v2528_v13  ;;  %v6800_v13 = vld [vmem:[#allocation12 + $0x2c8] sm:$0xff] }
 0x650   :  { %v2605_v53 = vpop.f32.mrf.mxu1  ;;  %v2676_v60 = vpop.f32.mrf.mxu0 }
 0x651   :  { %v4541_v58 = vpop.eup %4540  ;;  %v2680_v36 = vadd.f32 %v2605_v53, %v7548_v34  ;;  %v6794_v53 = vld [vmem:[#allocation12 + $0x2f8] sm:$0xff] }
 0x652   :  { %v2532_v14 = vmul.f32 %v4541_v58, %v2531_v63  ;;  %v4266_v33 = vpop.f32.mrf.mxu0  ;;  %v2607_v10 = vpop.f32.mrf.mxu1  ;;  %v6812_v63 = vld [vmem:[#allocation12 + $0x268] sm:$0xff] }
 0x653   :  { %v3549_v26 = vmul.f32 -1.442695, %v2680_v36  ;;  %v2687_v23 = vadd.f32 %v2607_v10, %v7550_v41  ;;  %v4543_v51 = vpop.eup %4542  ;;  %v2694_v36 = vadd.f32 %v6343_v16, %v2676_v60  ;;  %v7551_v16 = vld [vmem:[#allocation78_spill] sm:$0xff]  ;;  %v6838_v10 = vld [vmem:[#allocation12 + $0x1a8] sm:$0xff] }
 0x654   :  { %v2533_v3 = vadd.f32 %v2532_v14, %v7549_v0  ;;  %v2535_v32 = vsub.f32 1.0, %v4543_v51  ;;  %v2537_v34 = vmul.f32 %v4543_v51, %v6551_v17  ;;  %v6819_v14 = vld [vmem:[#allocation12 + $0x238] sm:$0xff]  ;;  %v6825_v0 = vld [vmem:[#allocation12 + $0x208] sm:$0xff] }
 0x655   :  { %4544 = vpow2.f32 %v3549_v26  ;;  %v3550_v40 = vmul.f32 -1.442695, %v2687_v23  ;;  %v6844_v41 = vld [vmem:[#allocation12 + $0x178] sm:$0xff]  ;;  %v6850_v23 = vld [vmem:[#allocation12 + $0x148] sm:$0xff] }
 0x656   :  { %4546 = vtanh.f32 %v2533_v3  ;;  %v6832_v3 = vld [vmem:[#allocation12 + $0x1d8] sm:$0xff]  ;;  %v6862_v51 = vld [vmem:[#allocation12 + $0xe8] sm:$0xff] }
 0x657   :  { %4548 = vpow2.f32 %v3550_v40  ;;  %v6856_v40 = vld [vmem:[#allocation12 + $0x118] sm:$0xff] }
 0x662   :  { %v4545_v57 = vpop.eup %4544 }
 0x663   :  { %v4547_v45 = vpop.eup %4546  ;;  %v2684_v20 = vadd.f32 1.0, %v4545_v57 }
 0x664   :  { %v2536_v35 = vmul.f32 %v4547_v45, %v2535_v32  ;;  %v6868_v32 = vld [vmem:[#allocation12 + $0xb8] sm:$0xff]  ;;  %v6874_v45 = vld [vmem:[#allocation12 + $0x88] sm:$0xff] }
 0x665   :  { %4550 = vrcp.f32 %v2684_v20  ;;  %v6806_v20 = vld [vmem:[#allocation12 + $0x298] sm:$0xff]  ;;  %7552 = vst [vmem:[#allocation95_spill] sm:$0xff] %v6874_v45 }
 0x666   :  { %v6789_v58 = vadd.f32 %v2537_v34, %v2536_v35  ;;  %v4549_v35 = vpop.eup %4548 }
 0x667   :  { %v2691_v17 = vadd.f32 1.0, %v4549_v35 }
 0x668   :  { %2767 = vmatmul.mubr.f32.vlgmr.msra.gmra.mxu1 %v6789_v58  ;;  %4300 = vmatmul.mubr.f32.vlgmr.msra.gmra.mxu0 %v6789_v58 }
 0x669   :  { %2866 = vmatpush1.msra.mxu1 %v6555_v50  ;;  %4303 = vmatpush3.msra.mxu0 %v6794_v53  ;;  %4552 = vrcp.f32 %v2691_v17  ;;  %v7553_v17 = vld [vmem:[#allocation93_spill] sm:$0xff] }
 0x66a   :  { %2867 = vmatprep.subr.mxu1 %v6559_v37  ;;  %4304 = vmatprep.subr.mxu0 %v7311_v54 }
 0x66b   :  { %2868 = vmatpush1.msra.mxu1 %v6563_v25  ;;  %4305 = vmatpush3.msra.mxu0 %v6800_v13 }
 0x66c   :  { %2869 = vmatprep.subr.mxu1 %v6567_v61  ;;  %4306 = vmatprep.subr.mxu0 %v7311_v54 }
 0x66d   :  { %2870 = vmatpush1.msra.mxu1 %v6571_v59  ;;  %4307 = vmatpush3.msra.mxu0 %v6806_v20 }
 0x66e   :  { %2871 = vmatprep.subr.mxu1 %v6575_v12  ;;  %4308 = vmatprep.subr.mxu0 %v7311_v54 }
 0x66f   :  { %2872 = vmatpush1.msra.mxu1 %v6579_v6  ;;  %4309 = vmatpush3.msra.mxu0 %v6812_v63 }
 0x670   :  { %2873 = vmatprep.subr.mxu1 %v6583_v48  ;;  %4310 = vmatprep.subr.mxu0 %v7311_v54 }
 0x671   :  { %2874 = vmatpush1.msra.mxu1 %v6588_v2  ;;  %4311 = vmatpush3.msra.mxu0 %v6819_v14 }
 0x672   :  { %v4551_v33 = vpop.eup %4550  ;;  %2875 = vmatprep.subr.mxu1 %v6592_v22  ;;  %4312 = vmatprep.subr.mxu0 %v7311_v54 }
 0x673   :  { %v2695_v26 = vmul.f32 %v4551_v33, %v2694_v36  ;;  %2876 = vmatpush1.msra.mxu1 %v6596_v44  ;;  %4313 = vmatpush3.msra.mxu0 %v6825_v0  ;;  %v6880_v36 = vld [vmem:[#allocation12 + $0x58] sm:$0xff] }
 0x674   :  { %2877 = vmatprep.subr.mxu1 %v6600_v9  ;;  %4314 = vmatprep.subr.mxu0 %v7311_v54  ;;  %7554 = vst [vmem:[#allocation96_spill] sm:$0xff] %v6880_v36 }
 0x675   :  { %v2696_v60 = vadd.f32 %v2695_v26, %v7551_v16  ;;  %2878 = vmatpush1.msra.mxu1 %v6605_v38  ;;  %4315 = vmatpush3.msra.mxu0 %v6832_v3 }
 0x676   :  { %2879 = vmatprep.subr.mxu1 %v6609_v18  ;;  %4316 = vmatprep.subr.mxu0 %v7311_v54  ;;  %v4553_v57 = vpop.eup %4552 }
 0x677   :  { %4554 = vtanh.f32 %v2696_v60  ;;  %2880 = vmatpush1.msra.mxu1 %v6613_v7  ;;  %4317 = vmatpush3.msra.mxu0 %v6838_v10  ;;  %v2698_v34 = vsub.f32 1.0, %v4553_v57  ;;  %v2700_v26 = vmul.f32 %v4553_v57, %v6682_v56  ;;  %v6890_v60 = vld [vmem:[#allocation12 + $0x28] sm:$0xff]  ;;  %v7566_v57 = vld [vmem:[#allocation66_spill] sm:$0xff] }
 0x678   :  { %2881 = vmatprep.subr.mxu1 %v6617_v21  ;;  %4318 = vmatprep.subr.mxu0 %v7311_v54  ;;  %7556 = vst [vmem:[#allocation98_spill] sm:$0xff] %v6890_v60  ;;  %v7558_v56 = vld [vmem:[#allocation84_spill] sm:$0xff] }
 0x679   :  { %2882 = vmatpush1.msra.mxu1 %v6621_v39  ;;  %4319 = vmatpush3.msra.mxu0 %v6844_v41 }
 0x67a   :  { %2883 = vmatprep.subr.mxu1 %v6625_v62  ;;  %4320 = vmatprep.subr.mxu0 %v7311_v54 }
 0x67b   :  { %2884 = vmatpush1.msra.mxu1 %v6629_v11  ;;  %4321 = vmatpush3.msra.mxu0 %v6850_v23 }
 0x67c   :  { %2885 = vmatprep.subr.mxu1 %v6633_v47  ;;  %4322 = vmatprep.subr.mxu0 %v7311_v54 }
 0x67d   :  { %2886 = vmatpush1.msra.mxu1 %v6637_v43  ;;  %4323 = vmatpush3.msra.mxu0 %v6856_v40 }
 0x67e   :  { %2887 = vmatprep.subr.mxu1 %v6641_v46  ;;  %4324 = vmatprep.subr.mxu0 %v7311_v54 }
 0x67f   :  { %2888 = vmatpush1.msra.mxu1 %v6645_v30  ;;  %4325 = vmatpush3.msra.mxu0 %v6862_v51 }
 0x680   :  { %2889 = vmatprep.subr.mxu1 %v6649_v1  ;;  %4326 = vmatprep.subr.mxu0 %v7311_v54 }
 0x681   :  { %2890 = vmatpush1.msra.mxu1 %v6653_v19  ;;  %4327 = vmatpush3.msra.mxu0 %v6868_v32 }
 0x682   :  { %2891 = vmatprep.subr.mxu1 %v6657_v29  ;;  %4328 = vmatprep.subr.mxu0 %v7311_v54 }
 0x683   :  { %2892 = vmatpush1.msra.mxu1 %v6661_v52  ;;  %4329 = vmatpush3.msra.mxu0 %v6874_v45 }
 0x684   :  { %v4555_v35 = vpop.eup %4554  ;;  %2893 = vmatprep.subr.mxu1 %v7553_v17  ;;  %4330 = vmatprep.subr.mxu0 %v7311_v54 }
 0x685   :  { %2894 = vmatpush1.msra.mxu1 %v6669_v8  ;;  %4331 = vmatpush3.msra.mxu0 %v6880_v36  ;;  %v2699_v33 = vmul.f32 %v4555_v35, %v2698_v34  ;;  %v7567_v34 = vld [vmem:[#allocation31_spill] sm:$0xff]  ;;  %v7568_v35 = vld [vmem:[#allocation32_spill] sm:$0xff] }
 0x686   :  { %2895 = vmatprep.subr.mxu1 %v6674_v42  ;;  %4332 = vmatprep.subr.mxu0 %v7311_v54 }
 0x687   :  { %2896 = vmatpush1.msra.mxu1 %v6678_v5  ;;  %2929 = vmatprep.mubr.f32.mxu1 %v7311_v54  ;;  %v6888_v16 = vadd.f32 %v2700_v26, %v2699_v33  ;;  %v7569_v33 = vld [vmem:[#allocation81_spill] sm:$0xff] }
 0x688   :  { %4333 = vmatpush3.msra.mxu0 %v6890_v60  ;;  %4334 = vmatprep.mubr.msk.f32.mxu0 %vm4930_vm1, %v7311_v54  ;;  %v7570_v26 = vld [vmem:[#allocation33_spill] sm:$0xff] }
 0x689   :  { %7555 = vst [vmem:[#allocation97_spill] sm:$0xff] %v6888_v16  ;;  %2930 = vmatmul.mubr.f32.vlgmr.msra.gmra.mxu1 %v6888_v16  ;;  %4335 = vmatmul.mubr.f32.vlgmr.msra.gmra.mxu0 %v6888_v16 }
 0x68a   :  { %3028 = vmatprep.subr.mxu1 %v6401_v24  ;;  %4337 = vmatprep.subr.mxu0 %v7311_v54  ;;  %v7557_v24 = vld [vmem:[#allocation83_spill] sm:$0xff] }
 0x68b   :  { %3029 = vmatpush1.msra.mxu1 %v6405_v15  ;;  %4338 = vmatpush3.msra.mxu0 %v6408_v4  ;;  %v7559_v15 = vld [vmem:[#allocation25_spill] sm:$0xff]  ;;  %v7560_v4 = vld [vmem:[#allocation26_spill] sm:$0xff] }
 0x68c   :  { %3030 = vmatprep.subr.mxu1 %v6411_v27  ;;  %4339 = vmatprep.subr.mxu0 %v7311_v54  ;;  %v7561_v27 = vld [vmem:[#allocation27_spill] sm:$0xff] }
 0x68d   :  { %3031 = vmatpush1.msra.mxu1 %v6415_v49  ;;  %4340 = vmatpush3.msra.mxu0 %v6418_v28  ;;  %v7562_v49 = vld [vmem:[#allocation28_spill] sm:$0xff]  ;;  %v7563_v28 = vld [vmem:[#allocation71_spill] sm:$0xff] }
 0x68e   :  { %3032 = vmatprep.subr.mxu1 %v6421_v55  ;;  %4341 = vmatprep.subr.mxu0 %v7311_v54  ;;  %v7564_v55 = vld [vmem:[#allocation29_spill] sm:$0xff] }
 0x68f   :  { %3033 = vmatpush1.msra.mxu1 %v6425_v31  ;;  %4342 = vmatpush3.msra.mxu0 %v7557_v24  ;;  %v7565_v31 = vld [vmem:[#allocation30_spill] sm:$0xff] }
 0x690   :  { %3034 = vmatprep.subr.mxu1 %v7558_v56  ;;  %4343 = vmatprep.subr.mxu0 %v7311_v54  ;;  %v7571_v24 = vld [vmem:[#allocation34_spill] sm:$0xff] }
 0x691   :  { %3035 = vmatpush1.msra.mxu1 %v7559_v15  ;;  %4344 = vmatpush3.msra.mxu0 %v7560_v4  ;;  %v7572_v56 = vld [vmem:[#allocation82_spill] sm:$0xff]  ;;  %v7573_v15 = vld [vmem:[#allocation35_spill] sm:$0xff]  ;;  %v7574_v4 = vld [vmem:[#allocation36_spill] sm:$0xff] }
 0x692   :  { %3036 = vmatprep.subr.mxu1 %v7561_v27  ;;  %4345 = vmatprep.subr.mxu0 %v7311_v54  ;;  %v7575_v27 = vld [vmem:[#allocation53_spill] sm:$0xff] }
 0x693   :  { %3037 = vmatpush1.msra.mxu1 %v7562_v49  ;;  %4346 = vmatpush3.msra.mxu0 %v7563_v28  ;;  %v7576_v49 = vld [vmem:[#allocation37_spill] sm:$0xff]  ;;  %v7577_v28 = vld [vmem:[#allocation38_spill] sm:$0xff] }
 0x694   :  { %3038 = vmatprep.subr.mxu1 %v7564_v55  ;;  %4347 = vmatprep.subr.mxu0 %v7311_v54  ;;  %v7578_v55 = vld [vmem:[#allocation75_spill] sm:$0xff] }
 0x695   :  { %3039 = vmatpush1.msra.mxu1 %v7565_v31  ;;  %4348 = vmatpush3.msra.mxu0 %v7566_v57  ;;  %v7579_v31 = vld [vmem:[#allocation39_spill] sm:$0xff]  ;;  %v7580_v57 = vld [vmem:[#allocation40_spill] sm:$0xff] }
 0x696   :  { %3040 = vmatprep.subr.mxu1 %v7567_v34  ;;  %4349 = vmatprep.subr.mxu0 %v7311_v54  ;;  %v7581_v34 = vld [vmem:[#allocation61_spill] sm:$0xff] }
 0x697   :  { %3041 = vmatpush1.msra.mxu1 %v7568_v35  ;;  %4350 = vmatpush3.msra.mxu0 %v7569_v33  ;;  %v7582_v35 = vld [vmem:[#allocation41_spill] sm:$0xff]  ;;  %v7583_v33 = vld [vmem:[#allocation42_spill] sm:$0xff] }
 0x698   :  { %3042 = vmatprep.subr.mxu1 %v7570_v26  ;;  %4351 = vmatprep.subr.mxu0 %v7311_v54  ;;  %v7584_v26 = vld [vmem:[#allocation55_spill] sm:$0xff] }
 0x699   :  { %3043 = vmatpush1.msra.mxu1 %v7571_v24  ;;  %4352 = vmatpush3.msra.mxu0 %v7572_v56  ;;  %v7585_v24 = vld [vmem:[#allocation43_spill] sm:$0xff]  ;;  %v7586_v56 = vld [vmem:[#allocation44_spill] sm:$0xff] }
 0x69a   :  { %3044 = vmatprep.subr.mxu1 %v7573_v15  ;;  %4353 = vmatprep.subr.mxu0 %v7311_v54  ;;  %v7587_v15 = vld [vmem:[#allocation87_spill] sm:$0xff] }
 0x69b   :  { %3045 = vmatpush1.msra.mxu1 %v7574_v4  ;;  %4354 = vmatpush3.msra.mxu0 %v7575_v27  ;;  %v7588_v4 = vld [vmem:[#allocation45_spill] sm:$0xff]  ;;  %v7589_v27 = vld [vmem:[#allocation46_spill] sm:$0xff] }
 0x69c   :  { %3046 = vmatprep.subr.mxu1 %v7576_v49  ;;  %4355 = vmatprep.subr.mxu0 %v7311_v54  ;;  %v7590_v49 = vld [vmem:[#allocation85_spill] sm:$0xff] }
 0x69d   :  { %3047 = vmatpush1.msra.mxu1 %v7577_v28  ;;  %4356 = vmatpush3.msra.mxu0 %v7578_v55  ;;  %v7591_v28 = vld [vmem:[#allocation88_spill] sm:$0xff]  ;;  %v7592_v55 = vld [vmem:[#allocation89_spill] sm:$0xff] }
 0x69e   :  { %3048 = vmatprep.subr.mxu1 %v7579_v31  ;;  %4357 = vmatprep.subr.mxu0 %v7311_v54  ;;  %v7593_v31 = vld [vmem:[#allocation86_spill] sm:$0xff] }
 0x69f   :  { %3049 = vmatpush1.msra.mxu1 %v7580_v57  ;;  %4358 = vmatpush3.msra.mxu0 %v7581_v34  ;;  %v7594_v57 = vld [vmem:[#allocation90_spill] sm:$0xff]  ;;  %v7595_v34 = vld [vmem:[#allocation91_spill] sm:$0xff] }
 0x6a0   :  { %3050 = vmatprep.subr.mxu1 %v7582_v35  ;;  %4359 = vmatprep.subr.mxu0 %v7311_v54  ;;  %v7596_v35 = vld [vmem:[#allocation73_spill] sm:$0xff] }
 0x6a1   :  { %3051 = vmatpush1.msra.mxu1 %v7583_v33  ;;  %4360 = vmatpush3.msra.mxu0 %v7584_v26  ;;  %v7597_v33 = vld [vmem:[#allocation92_spill] sm:$0xff] }
 0x6a2   :  { %3052 = vmatprep.subr.mxu1 %v7585_v24  ;;  %4361 = vmatprep.subr.mxu0 %v7311_v54 }
 0x6a3   :  { %3053 = vmatpush1.msra.mxu1 %v7586_v56  ;;  %4362 = vmatpush3.msra.mxu0 %v7587_v15  ;;  %v7598_v56 = vld [vmem:[#allocation51_spill] sm:$0xff] }
 0x6a4   :  { %3054 = vmatprep.subr.mxu1 %v7588_v4  ;;  %4363 = vmatprep.subr.mxu0 %v7311_v54 }
 0x6a5   :  { %3055 = vmatpush1.msra.mxu1 %v7589_v27  ;;  %4364 = vmatpush3.msra.mxu0 %v7590_v49 }
 0x6a6   :  { %3056 = vmatprep.subr.mxu1 %v7591_v28  ;;  %4365 = vmatprep.subr.mxu0 %v7311_v54  ;;  %v7599_v28 = vld [vmem:[#allocation52_spill] sm:$0xff] }
 0x6a7   :  { %3057 = vmatpush1.msra.mxu1 %v7592_v55  ;;  %4366 = vmatpush3.msra.mxu0 %v7593_v31 }
 0x6a8   :  { %3058 = vmatprep.subr.mxu1 %v7594_v57  ;;  %4367 = vmatprep.subr.mxu0 %v7311_v54 }
 0x6a9   :  { %3059 = vmatpush1.msra.mxu1 %v7595_v34  ;;  %4368 = vmatpush3.msra.mxu0 %v7596_v35 }
 0x6aa   :  { %3092 = vmatprep.mubr.f32.mxu1 %v7311_v54  ;;  %4369 = vmatprep.mubr.msk.f32.mxu0 %vm4930_vm1, %v7311_v54 }
 0x6ab   :  { %3191 = vmatprep.subr.mxu1 %v7597_v33  ;;  %4372 = vmatprep.subr.mxu0 %v7311_v54  ;;  %v6971_v33 = vld [vmem:[%s7073_s6] ss:$0 sm:$0xff] }
 0x6ac   :  { %7600 = vst [vmem:[#allocation99_spill] sm:$0xff] %v6971_v33 }
 0x728   :  { %v2768_v26 = vpop.f32.mrf.mxu1  ;;  %v2839_v24 = vpop.f32.mrf.mxu0 }
 0x729   :  { %v2843_v15 = vadd.f32 %v2768_v26, %v7598_v56  ;;  %v2857_v26 = vadd.f32 %v6971_v33, %v2839_v24 }
 0x72a   :  { %v4301_v4 = vpop.f32.mrf.mxu0  ;;  %v2770_v49 = vpop.f32.mrf.mxu1 }
 0x72b   :  { %v3551_v27 = vmul.f32 -1.442695, %v2843_v15  ;;  %v2850_v55 = vadd.f32 %v2770_v49, %v7599_v28 }
 0x72d   :  { %4556 = vpow2.f32 %v3551_v27  ;;  %v3552_v31 = vmul.f32 -1.442695, %v2850_v55  ;;  %v7601_v27 = vld [vmem:[#allocation63_spill] sm:$0xff] }
 0x72f   :  { %4558 = vpow2.f32 %v3552_v31  ;;  %v7602_v31 = vld [vmem:[#allocation74_spill] sm:$0xff] }
 0x73a   :  { %v4557_v57 = vpop.eup %4556 }
 0x73b   :  { %v2847_v34 = vadd.f32 1.0, %v4557_v57 }
 0x73c   :  { %v4559_v35 = vpop.eup %4558 }
 0x73d   :  { %4560 = vrcp.f32 %v2847_v34  ;;  %v2854_v60 = vadd.f32 1.0, %v4559_v35  ;;  %v7603_v35 = vld [vmem:[#allocation68_spill] sm:$0xff] }
 0x73f   :  { %4562 = vrcp.f32 %v2854_v60 }
 0x749   :  { %v2931_v56 = vpop.f32.mrf.mxu1  ;;  %v3002_v15 = vpop.f32.mrf.mxu0 }
 0x74a   :  { %v4561_v4 = vpop.eup %4560  ;;  %v3006_v5 = vadd.f32 %v2931_v56, %v7601_v27 }
 0x74b   :  { %v2858_v49 = vmul.f32 %v4561_v4, %v2857_v26  ;;  %v4336_v28 = vpop.f32.mrf.mxu0  ;;  %v2933_v34 = vpop.f32.mrf.mxu1 }
 0x74c   :  { %v3553_v55 = vmul.f32 -1.442695, %v3006_v5  ;;  %v3013_v42 = vadd.f32 %v2933_v34, %v7603_v35  ;;  %v4563_v36 = vpop.eup %4562  ;;  %v7614_v5 = vld [vmem:[#allocation56_spill] sm:$0xff] }
 0x74d   :  { %v2859_v57 = vadd.f32 %v2858_v49, %v7602_v31  ;;  %v2861_v33 = vsub.f32 1.0, %v4563_v36  ;;  %v2863_v26 = vmul.f32 %v4563_v36, %v6789_v58 }
 0x74e   :  { %4564 = vpow2.f32 %v3553_v55  ;;  %v3554_v16 = vmul.f32 -1.442695, %v3013_v42 }
 0x74f   :  { %4566 = vtanh.f32 %v2859_v57 }
 0x750   :  { %4568 = vpow2.f32 %v3554_v16 }
 0x75b   :  { %v4565_v24 = vpop.eup %4564 }
 0x75c   :  { %v4567_v8 = vpop.eup %4566  ;;  %v3010_v17 = vadd.f32 1.0, %v4565_v24 }
 0x75d   :  { %v2862_v45 = vmul.f32 %v4567_v8, %v2861_v33  ;;  %v4569_v8 = vpop.eup %4568  ;;  %v7618_v33 = vld [vmem:[#allocation60_spill] sm:$0xff] }
 0x75e   :  { %4570 = vrcp.f32 %v3010_v17  ;;  %v7617_v17 = vld [vmem:[#allocation77_spill] sm:$0xff] }
 0x75f   :  { %v6978_v60 = vadd.f32 %v2863_v26, %v2862_v45 }
 0x761   :  { %3093 = vmatmul.mubr.f32.vlgmr.msra.gmra.mxu1 %v6978_v60  ;;  %4370 = vmatmul.mubr.f32.vlgmr.msra.gmra.mxu0 %v6978_v60 }
 0x762   :  { %3192 = vmatpush1.msra.mxu1 %v6555_v50  ;;  %4373 = vmatpush3.msra.mxu0 %v6794_v53  ;;  %v3017_v50 = vadd.f32 1.0, %v4569_v8 }
 0x763   :  { %3193 = vmatprep.subr.mxu1 %v6559_v37  ;;  %4374 = vmatprep.subr.mxu0 %v7311_v54  ;;  %v7001_v37 = vld [vmem:[%s7073_s6 + $0x1] ss:$0 sm:$0xff]  ;;  %s4931_s6 = smov [#allocation14]  }
 0x764   :  { %3194 = vmatpush1.msra.mxu1 %v6563_v25  ;;  %4375 = vmatpush3.msra.mxu0 %v6800_v13  ;;  %v3020_v25 = vadd.f32 %v7001_v37, %v3002_v15  ;;  %4572 = vrcp.f32 %v3017_v50  ;;  %s3362_s24 = sshll.u32 %s4931_s6, 4  ;;  %s3363_s24 = int_to_ptr.vmem [resolvable:$true] %s3362_s24 }
 0x765   :  { %3195 = vmatprep.subr.mxu1 %v6567_v61  ;;  %4376 = vmatprep.subr.mxu0 %v7311_v54  ;;  %s4874_s25 = scalar_lea.vmem %s3363_s24, 256  ;;  %p4879_p0 = scmp.lt.s32.totalorder %s3363_s24, %s3363_s24 }
 0x766   :  { %3196 = vmatpush1.msra.mxu1 %v6571_v59  ;;  %4377 = vmatpush3.msra.mxu0 %v6806_v20  ;;  %p4875_p13 = scmp.ne.s32.totalorder %s3363_s24, %s4874_s25  ;;  %p4880_p1 = scmp.lt.s32.totalorder %s4874_s25, %s4874_s25 }
 0x767   :  { %3197 = vmatprep.subr.mxu1 %v6575_v12  ;;  %4378 = vmatprep.subr.mxu0 %v7311_v54  ;;  %v7604_v12 = vld [vmem:[#allocation70_spill] sm:$0xff] }
 0x768   :  { %3198 = vmatpush1.msra.mxu1 %v6579_v6  ;;  %4379 = vmatpush3.msra.mxu0 %v6812_v63  ;;  %p4881_p2 = por %p4880_p1, %p4879_p0 }
 0x769   :  { %3199 = vmatprep.subr.mxu1 %v6583_v48  ;;  %4380 = vmatprep.subr.mxu0 %v7311_v54 }
 0x76a   :  { %3200 = vmatpush1.msra.mxu1 %v6588_v2  ;;  %4381 = vmatpush3.msra.mxu0 %v6819_v14  ;;  %v7605_v2 = vld [vmem:[#allocation95_spill] sm:$0xff]  ;;  %p4882_p3 = pnand %p4881_p2, %p4875_p13 }
 0x76b   :  { %v4571_v61 = vpop.eup %4570  ;;  %3201 = vmatprep.subr.mxu1 %v6592_v22  ;;  %4382 = vmatprep.subr.mxu0 %v7311_v54 }
 0x76c   :  { %v3021_v59 = vmul.f32 %v4571_v61, %v3020_v25  ;;  %3202 = vmatpush1.msra.mxu1 %v6596_v44  ;;  %4383 = vmatpush3.msra.mxu0 %v6825_v0  ;;  %v7619_v25 = vld [vmem:[#allocation62_spill] sm:$0xff] }
 0x76d   :  { %3203 = vmatprep.subr.mxu1 %v6600_v9  ;;  %4384 = vmatprep.subr.mxu0 %v7311_v54  ;;  %v7606_v9 = vld [vmem:[#allocation93_spill] sm:$0xff] }
 0x76e   :  { %v3022_v6 = vadd.f32 %v3021_v59, %v7604_v12  ;;  %3204 = vmatpush1.msra.mxu1 %v6605_v38  ;;  %4385 = vmatpush3.msra.mxu0 %v6832_v3  ;;  %v7607_v38 = vld [vmem:[#allocation94_spill] sm:$0xff] }
 0x76f   :  { %3205 = vmatprep.subr.mxu1 %v6609_v18  ;;  %4386 = vmatprep.subr.mxu0 %v7311_v54  ;;  %v7608_v18 = vld [vmem:[#allocation96_spill] sm:$0xff] }
 0x770   :  { %4574 = vtanh.f32 %v3022_v6  ;;  %3206 = vmatpush1.msra.mxu1 %v6613_v7  ;;  %4387 = vmatpush3.msra.mxu0 %v6838_v10 }
 0x771   :  { %3207 = vmatprep.subr.mxu1 %v6617_v21  ;;  %4388 = vmatprep.subr.mxu0 %v7311_v54  ;;  %v4573_v48 = vpop.eup %4572  ;;  %v7609_v21 = vld [vmem:[#allocation97_spill] sm:$0xff] }
 0x772   :  { %3208 = vmatpush1.msra.mxu1 %v6621_v39  ;;  %4389 = vmatpush3.msra.mxu0 %v6844_v41  ;;  %v3024_v22 = vsub.f32 1.0, %v4573_v48  ;;  %v3026_v39 = vmul.f32 %v4573_v48, %v7609_v21 }
 0x773   :  { %3209 = vmatprep.subr.mxu1 %v6625_v62  ;;  %4390 = vmatprep.subr.mxu0 %v7311_v54  ;;  %v7610_v62 = vld [vmem:[#allocation57_spill] sm:$0xff] }
 0x774   :  { %3210 = vmatpush1.msra.mxu1 %v6629_v11  ;;  %4391 = vmatpush3.msra.mxu0 %v6850_v23  ;;  %v7611_v11 = vld [vmem:[#allocation58_spill] sm:$0xff]  ;;  %v7616_v23 = vld [vmem:[#allocation59_spill] sm:$0xff] }
 0x775   :  { %3211 = vmatprep.subr.mxu1 %v6633_v47  ;;  %4392 = vmatprep.subr.mxu0 %v7311_v54 }
 0x776   :  { %3212 = vmatpush1.msra.mxu1 %v6637_v43  ;;  %4393 = vmatpush3.msra.mxu0 %v6856_v40  ;;  %v7612_v43 = vld [vmem:[#allocation98_spill] sm:$0xff] }
 0x777   :  { %3213 = vmatprep.subr.mxu1 %v6641_v46  ;;  %4394 = vmatprep.subr.mxu0 %v7311_v54 }
 0x778   :  { %3214 = vmatpush1.msra.mxu1 %v6645_v30  ;;  %4395 = vmatpush3.msra.mxu0 %v6862_v51 }
 0x779   :  { %3215 = vmatprep.subr.mxu1 %v6649_v1  ;;  %4396 = vmatprep.subr.mxu0 %v7311_v54  ;;  %v7613_v1 = vld [vmem:[#allocation54_spill] sm:$0xff] }
 0x77a   :  { %3216 = vmatpush1.msra.mxu1 %v6653_v19  ;;  %4397 = vmatpush3.msra.mxu0 %v6868_v32 }
 0x77b   :  { %3217 = vmatprep.subr.mxu1 %v6657_v29  ;;  %4398 = vmatprep.subr.mxu0 %v7311_v54 }
 0x77c   :  { %3218 = vmatpush1.msra.mxu1 %v6661_v52  ;;  %4399 = vmatpush3.msra.mxu0 %v7605_v2 }
 0x77d   :  { %v4575_v44 = vpop.eup %4574  ;;  %3219 = vmatprep.subr.mxu1 %v7606_v9  ;;  %4400 = vmatprep.subr.mxu0 %v7311_v54 }
 0x77e   :  { %3220 = vmatpush1.msra.mxu1 %v7607_v38  ;;  %4401 = vmatpush3.msra.mxu0 %v7608_v18  ;;  %v3025_v7 = vmul.f32 %v4575_v44, %v3024_v22 }
 0x77f   :  { %3221 = vmatprep.subr.mxu1 %v7610_v62  ;;  %4402 = vmatprep.subr.mxu0 %v7311_v54 }
 0x780   :  { %3222 = vmatpush1.msra.mxu1 %v7611_v11  ;;  %3255 = vmatprep.mubr.f32.mxu1 %v7311_v54  ;;  %v3027_v47 = vadd.f32 %v3026_v39, %v3025_v7 }
 0x781   :  { %4403 = vmatpush3.msra.mxu0 %v7612_v43  ;;  %4404 = vmatprep.mubr.msk.f32.mxu0 %vm4930_vm1, %v7311_v54  ;;  %v7615_v54 = vld [vmem:[#allocation99_spill] sm:$0xff] }
 0x782   :  { %3256 = vmatmul.mubr.f32.vlgmr.msra.gmra.mxu1 %v3027_v47  ;;  %4405 = vmatmul.mubr.f32.vlgmr.msra.gmra.mxu0 %v3027_v47 }
 0x821   :  { %v3094_v46 = vpop.f32.mrf.mxu1  ;;  %v3165_v30 = vpop.f32.mrf.mxu0 }
 0x822   :  { %v3169_v19 = vadd.f32 %v3094_v46, %v7613_v1  ;;  %v3183_v0 = vadd.f32 %v7615_v54, %v3165_v30 }
 0x823   :  { %v4371_v29 = vpop.f32.mrf.mxu0  ;;  %v3096_v42 = vpop.f32.mrf.mxu1 }
 0x824   :  { %v3555_v52 = vmul.f32 -1.442695, %v3169_v19  ;;  %v3176_v58 = vadd.f32 %v3096_v42, %v7614_v5 }
 0x826   :  { %4576 = vpow2.f32 %v3555_v52  ;;  %v3556_v53 = vmul.f32 -1.442695, %v3176_v58 }
 0x828   :  { %4578 = vpow2.f32 %v3556_v53 }
 0x833   :  { %v4577_v13 = vpop.eup %4576 }
 0x834   :  { %v3173_v20 = vadd.f32 1.0, %v4577_v13 }
 0x835   :  { %v4579_v63 = vpop.eup %4578 }
 0x836   :  { %4580 = vrcp.f32 %v3173_v20  ;;  %v3180_v14 = vadd.f32 1.0, %v4579_v63 }
 0x838   :  { %4582 = vrcp.f32 %v3180_v14 }
 0x842   :  { %v3257_v3 = vpop.f32.mrf.mxu1  ;;  %v3328_v10 = vpop.f32.mrf.mxu0 }
 0x843   :  { %v4581_v41 = vpop.eup %4580  ;;  %v3332_v40 = vadd.f32 %v3257_v3, %v7616_v23  ;;  %v3346_v26 = vadd.f32 %v7001_v37, %v3328_v10 }
 0x844   :  { %v3184_v51 = vmul.f32 %v4581_v41, %v3183_v0  ;;  %v4406_v32 = vpop.f32.mrf.mxu0  ;;  %v3259_v16 = vpop.f32.mrf.mxu1 }
 0x845   :  { %v3557_v45 = vmul.f32 -1.442695, %v3332_v40  ;;  %v3339_v56 = vadd.f32 %v3259_v16, %v7618_v33  ;;  %v4583_v4 = vpop.eup %4582 }
 0x846   :  { %v3185_v36 = vadd.f32 %v3184_v51, %v7617_v17  ;;  %v3187_v49 = vsub.f32 1.0, %v4583_v4  ;;  %v3189_v57 = vmul.f32 %v4583_v4, %v6978_v60 }
 0x847   :  { %4584 = vpow2.f32 %v3557_v45  ;;  %v3558_v15 = vmul.f32 -1.442695, %v3339_v56 }
 0x848   :  { %4586 = vtanh.f32 %v3185_v36 }
 0x849   :  { %4588 = vpow2.f32 %v3558_v15 }
 0x854   :  { %v4585_v27 = vpop.eup %4584 }
 0x855   :  { %v4587_v28 = vpop.eup %4586  ;;  %v3336_v55 = vadd.f32 1.0, %v4585_v27 }
 0x856   :  { %v3188_v31 = vmul.f32 %v4587_v28, %v3187_v49  ;;  %v4589_v35 = vpop.eup %4588 }
 0x857   :  { %4590 = vrcp.f32 %v3336_v55  ;;  %v3343_v24 = vadd.f32 1.0, %v4589_v35 }
 0x858   :  { %v3190_v34 = vadd.f32 %v3189_v57, %v3188_v31 }
 0x859   :  { %4592 = vrcp.f32 %v3343_v24 }
 0x85a   :  { %3354 = vst [vmem:[#allocation14] sm:$0xff] %v3190_v34 }
 0x864   :  { %v4591_v8 = vpop.eup %4590 }
 0x865   :  { %v3347_v50 = vmul.f32 %v4591_v8, %v3346_v26 }
 0x866   :  { %v4593_v59 = vpop.eup %4592 }
 0x867   :  { %v3348_v61 = vadd.f32 %v3347_v50, %v7619_v25  ;;  %v3350_v12 = vsub.f32 1.0, %v4593_v59  ;;  %v3352_v60 = vmul.f32 %v4593_v59, %v3027_v47 }
 0x869   :  { %4594 = vtanh.f32 %v3348_v61 }
 0x876   :  { %v4595_v6 = vpop.eup %4594 }
 0x877   :  { %v3351_v48 = vmul.f32 %v4595_v6, %v3350_v12 }
 0x879   :  { %v3353_v2 = vadd.f32 %v3352_v60, %v3351_v48 }
 0x87b   :  { %3355 = vst [vmem:[#allocation14 + $0x8] sm:$0xff] %v3353_v2 }
 0x87c   :  { %4885 = shalt.err (!%p4882_p3)
}
 0x87d   :  { %3365 = dma.vmem_to_hbm [thread:$0]  %s3363_s24, 256, %s7074_s7, [#allocation7]  }
 0x87e   :  { %4912 = dma.done.wait [#allocation7], 256  }
 0x87f   :  { %4913 = vsyncadd [#allocation7], 4294967040 }
 0x880   :  { %3369 = vsyncpa [#allocation6], 1 }
 0x881   :  { %3370 = vsyncpa [#allocation13], 1 }
 0x882   :  { %3371 = vsyncpa [#allocation7], 1 }
 0x883   :  { %3372 = vsyncpa [#allocation8], 1 }
 0x884   :  { %3373 = vsyncpa [#allocation9], 1 }
 0x885   :  { %3374 = vsyncmov [#allocation4] }
 0x888   :  { %s3375_s28 = vpop.sfrf %3374 }
 0x889   :  { %p3559_p4 = scmp.ne.s32.totalorder %s3375_s28, 0 }
 0x88b   :  { %3379 = shalt.err (%p3559_p4)  }
 0x88c   :  { %3381 = vsyncmov [#allocation4 + $0x1] }
 0x88f   :  { %s3382_s29 = vpop.sfrf %3381 }
 0x890   :  { %p3560_p5 = scmp.ne.s32.totalorder %s3382_s29, 0 }
 0x892   :  { %3386 = shalt.err (%p3560_p5)  }
 0x893   :  { %3388 = vsyncmov [#allocation4 + $0x2] }
 0x896   :  { %s3389_s30 = vpop.sfrf %3388 }
 0x897   :  { %p3561_p6 = scmp.ne.s32.totalorder %s3389_s30, 0 }
 0x899   :  { %3393 = shalt.err (%p3561_p6)  }
 0x89a   :  { %3395 = vsyncmov [#allocation4 + $0x3] }
 0x89d   :  { %s3396_s7 = vpop.sfrf %3395 }
 0x89e   :  { %p3562_p7 = scmp.ne.s32.totalorder %s3396_s7, 0 }
 0x8a0   :  { %3400 = shalt.err (%p3562_p7)  }
 0x8a1   :  { %3402 = vsyncmov [#allocation4 + $0x4] }
 0x8a4   :  { %s3403_s8 = vpop.sfrf %3402 }
 0x8a5   :  { %p3563_p8 = scmp.ne.s32.totalorder %s3403_s8, 0 }
 0x8a7   :  { %3407 = shalt.err (%p3563_p8)  }
 0x8a8   :  { %3409 = vsyncmov [#allocation4 + $0x5] }
 0x8ab   :  { %s3410_s9 = vpop.sfrf %3409 }
 0x8ac   :  { %p3564_p9 = scmp.ne.s32.totalorder %s3410_s9, 0 }
 0x8ae   :  { %3414 = shalt.err (%p3564_p9)  }
 0x8af   :  { %3416 = vsyncmov [#allocation4 + $0x6] }
 0x8b2   :  { %s3417_s10 = vpop.sfrf %3416 }
 0x8b3   :  { %p3565_p10 = scmp.ne.s32.totalorder %s3417_s10, 0 }
 0x8b5   :  { %3421 = shalt.err (%p3565_p10)  }
 0x8b6   :  { %3423 = vsyncmov [#allocation4 + $0x7] }
 0x8b9   :  { %s3424_s11 = vpop.sfrf %3423 }
 0x8ba   :  { %p3566_p11 = scmp.ne.s32.totalorder %s3424_s11, 0 }
 0x8bc   :  { %3428 = shalt.err (%p3566_p11)  }
 0x8bd   :  { %3430 = vsyncmov [#allocation4 + $0x8] }
 0x8c0   :  { %s3431_s0 = vpop.sfrf %3430 }
 0x8c1   :  { %p3567_p12 = scmp.ne.s32.totalorder %s3431_s0, 0 }
 0x8c3   :  { %3435 = shalt.err (%p3567_p12)  }
 0x8c4   :  { %3437 = vsyncmov [#allocation4 + $0x9] }
 0x8c7   :  { %s3438_s1 = vpop.sfrf %3437 }
 0x8c8   :  { %p3568_p13 = scmp.ne.s32.totalorder %s3438_s1, 0 }
 0x8ca   :  { %3442 = shalt.err (%p3568_p13)  }
 0x8cb   :  { %3444 = vsyncmov [#allocation4 + $0xa] }
 0x8ce   :  { %s3445_s12 = vpop.sfrf %3444 }
 0x8cf   :  { %p3569_p0 = scmp.ne.s32.totalorder %s3445_s12, 0 }
 0x8d1   :  { %3449 = shalt.err (%p3569_p0)  }
 0x8d2   :  { %3451 = vsyncmov [#allocation4 + $0xb] }
 0x8d5   :  { %s3452_s13 = vpop.sfrf %3451 }
 0x8d6   :  { %p3570_p1 = scmp.ne.s32.totalorder %s3452_s13, 0 }
 0x8d8   :  { %3456 = shalt.err (%p3570_p1)  }
 0x8d9   :  { %3458 = vsyncmov [#allocation4 + $0xc] }
 0x8dc   :  { %s3459_s2 = vpop.sfrf %3458 }
 0x8dd   :  { %p3571_p2 = scmp.ne.s32.totalorder %s3459_s2, 0 }
 0x8df   :  { %3463 = shalt.err (%p3571_p2)  }
 0x8e0   :  { %3465 = vsyncmov [#allocation4 + $0xd] }
 0x8e3   :  { %s3466_s14 = vpop.sfrf %3465 }
 0x8e4   :  { %p3572_p3 = scmp.ne.s32.totalorder %s3466_s14, 0 }
 0x8e6   :  { %3470 = shalt.err (%p3572_p3)  }
 0x8e7   :  { %3472 = vsyncmov [#allocation4 + $0xe] }
 0x8ea   :  { %s3473_s5 = vpop.sfrf %3472 }
 0x8eb   :  { %p3573_p4 = scmp.ne.s32.totalorder %s3473_s5, 0 }
 0x8ed   :  { %3477 = shalt.err (%p3573_p4)  }
 0x8ee   :  { %3479 = vsyncmov [#allocation4 + $0xf] }
 0x8f1   :  { %s3480_s15 = vpop.sfrf %3479 }
 0x8f2   :  { %p3574_p5 = scmp.ne.s32.totalorder %s3480_s15, 0 }
 0x8f4   :  { %3484 = shalt.err (%p3574_p5)  }

</bundles_post_ra>
